<compile_context>
chip_gen: v5e
topology: v5e:2x2
jax: 0.10.0
libtpu: 0.0.40
codegen_flags: <defaults>
</compile_context>

<pallas_src>
import jax
import jax.numpy as jnp
from jax.experimental import pallas as pl
from jax.experimental.pallas import tpu as pltpu


# ----------------------------- Pallas kernel ---------------------------------

def _make_kernel(K, Ho, Wo, Cin, Cout, groups, eps):
    n_per_group = float(Ho * Wo * (Cout // groups))

    def kernel(xu_ref, w_ref, b_ref, gamma_ref, beta_ref, mg_ref, o_ref):
        xu = xu_ref[0]                                        # (Hu, Wu*Cin)

        # ---- ConvTranspose2d: sum of K*K lane-dense GEMMs --------------------
        acc = jnp.zeros((Ho, Wo * Cout), jnp.float32)
        tap = 0
        for kh in range(K):
            for kw in range(K):
                patch = xu[kh:kh + Ho, kw * Cin:(kw + Wo) * Cin]   # (Ho, Wo*Cin)
                acc = acc + jnp.dot(patch, w_ref[tap],
                                    preferred_element_type=jnp.float32)
                tap += 1
        y = acc + b_ref[...]                                   # (Ho, Wo*Cout)

        # ---- GroupNorm (stats aggregated with a group-membership matmul) ----
        s1 = jnp.sum(y, axis=0, keepdims=True)                 # (1, Wo*Cout)
        mean = jnp.dot(s1, mg_ref[...],
                       preferred_element_type=jnp.float32) / n_per_group
        d = y - mean
        s2 = jnp.sum(d * d, axis=0, keepdims=True)
        var = jnp.dot(s2, mg_ref[...],
                      preferred_element_type=jnp.float32) / n_per_group
        yn = d * jax.lax.rsqrt(var + eps)
        yn = yn * gamma_ref[...] + beta_ref[...]

        # ---- GELU (exact erf via Abramowitz & Stegun 7.1.26, |err| < 1.5e-7) -
        z = yn * 0.7071067811865476
        az = jnp.abs(z)
        t = 1.0 / (1.0 + 0.3275911 * az)
        poly = t * (0.254829592 + t * (-0.284496736 + t * (1.421413741
                    + t * (-1.453152027 + t * 1.061405429))))
        erf_abs = 1.0 - poly * jnp.exp(-az * az)
        erf_z = jnp.where(z < 0.0, -erf_abs, erf_abs)
        o_ref[0] = (0.5 * yn * (1.0 + erf_z)).astype(o_ref.dtype)

    return kernel


# ------------------------------- wrapper --------------------------------------

def transpose_conv_block_pallas(x, params, *, stride, padding, groups, eps=1e-5):
    """x: (B, Cin, H, W) NCHW; params: w (Cin,Cout,K,K), b/gamma/beta (Cout,)."""
    B, Cin, H, W = x.shape
    w = params["w"]
    Cout, K = w.shape[1], w.shape[2]
    s, p = stride, padding
    Ho = (H - 1) * s - 2 * p + K
    Wo = (W - 1) * s - 2 * p + K
    pt = K - 1 - p
    assert pt >= 0, "padding > kernel_size - 1 not supported"
    assert Cout % groups == 0

    # --- wrapper-side layout plumbing (no compute) ----------------------------
    # NCHW -> NHWC, zero-dilate by the stride, pad by (K-1-padding) on each side.
    xh = jnp.transpose(x, (0, 2, 3, 1))
    Hd, Wd = (H - 1) * s + 1, (W - 1) * s + 1
    Hu, Wu = Hd + 2 * pt, Wd + 2 * pt
    xu = jnp.zeros((B, Hu, Wu, Cin), x.dtype)
    xu = xu.at[:, pt:pt + Hd:s, pt:pt + Wd:s, :].set(xh)
    xu = xu.reshape(B, Hu, Wu * Cin)
    # TODO(synk): at production sizes, move the zero-dilation in-kernel (manual
    # DMA of un-dilated rows) to avoid the ~stride^2 HBM inflation, and tile Ho
    # over a second "parallel" grid axis for the 2-TC chips.

    # Equivalent-correlation kernel (spatial flip + channel swap), taps flat.
    w_conv = jnp.transpose(w, (2, 3, 0, 1))[::-1, ::-1, :, :]       # (K,K,Cin,Cout)
    w_taps = w_conv.reshape(K * K, Cin, Cout)
    # Fold the output-width dim into the GEMM N axis: per-tap block-diagonal
    # weights (Wo*Cin, Wo*Cout) so the kernel never reshapes/concats.
    eye_w = jnp.eye(Wo, dtype=w.dtype)
    w_big = jnp.einsum("wx,tcd->twcxd", eye_w, w_taps)
    w_big = w_big.reshape(K * K, Wo * Cin, Wo * Cout)

    b_flat = jnp.tile(params["b"], Wo)[None, :]                     # (1, Wo*Cout)
    g_flat = jnp.tile(params["gamma"], Wo)[None, :]
    be_flat = jnp.tile(params["beta"], Wo)[None, :]

    # Group-membership matrix over the (ow, co)-flattened lane axis.
    ch = jnp.arange(Wo * Cout) % Cout
    grp = ch // (Cout // groups)
    mg = (grp[:, None] == grp[None, :]).astype(jnp.float32)         # (WoCout, WoCout)

    const = lambda shape: pl.BlockSpec(shape, lambda b: tuple(0 for _ in shape))

    out_flat = pl.pallas_call(
        _make_kernel(K, Ho, Wo, Cin, Cout, groups, eps),
        out_shape=jax.ShapeDtypeStruct((B, Ho, Wo * Cout), x.dtype),
        grid_spec=pltpu.PrefetchScalarGridSpec(
            num_scalar_prefetch=0,
            grid=(B,),
            in_specs=[
                pl.BlockSpec((1, Hu, Wu * Cin), lambda b: (b, 0, 0)),   # dilated x
                const((K * K, Wo * Cin, Wo * Cout)),                    # conv taps
                const((1, Wo * Cout)),                                  # bias
                const((1, Wo * Cout)),                                  # gamma
                const((1, Wo * Cout)),                                  # beta
                const((Wo * Cout, Wo * Cout)),                          # group matrix
            ],
            out_specs=pl.BlockSpec((1, Ho, Wo * Cout), lambda b: (b, 0, 0)),
        ),
        compiler_params=pltpu.CompilerParams(
            dimension_semantics=("parallel",)),
    )(xu, w_big, b_flat, g_flat, be_flat, mg)

    # (B, Ho, Wo*Cout) -> NCHW
    return out_flat.reshape(B, Ho, Wo, Cout).transpose(0, 3, 1, 2)


# --------------------------- pure-JAX reference --------------------------------

def transpose_conv_block_ref(x, params, *, stride, padding, groups, eps=1e-5):
    w, b = params["w"], params["b"]
    gamma, beta = params["gamma"], params["beta"]
    K = w.shape[2]
    pt = K - 1 - padding
    rhs = jnp.transpose(w, (1, 0, 2, 3))[:, :, ::-1, ::-1]          # (Cout,Cin,K,K)
    y = jax.lax.conv_general_dilated(
        x, rhs, window_strides=(1, 1),
        padding=[(pt, pt), (pt, pt)],
        lhs_dilation=(stride, stride),
        dimension_numbers=("NCHW", "OIHW", "NCHW"),
        precision=jax.lax.Precision.HIGHEST)
    y = y + b[None, :, None, None]
    B, C, Ho, Wo = y.shape
    yg = y.reshape(B, groups, C // groups, Ho, Wo)
    mean = yg.mean(axis=(2, 3, 4), keepdims=True)
    var = yg.var(axis=(2, 3, 4), keepdims=True)
    yn = ((yg - mean) / jnp.sqrt(var + eps)).reshape(B, C, Ho, Wo)
    yn = yn * gamma[None, :, None, None] + beta[None, :, None, None]
    return jax.nn.gelu(yn, approximate=False)


# ---------------------------------- main ---------------------------------------

if __name__ == "__main__":
    B, Cin, Cout = 2, 8, 16
    H = W = 8
    K, stride, padding, groups = 4, 2, 1, 8          # groups=8 is the module default

    key = jax.random.PRNGKey(0)
    k1, k2, k3, k4, k5 = jax.random.split(key, 5)
    wscale = (Cin * K * K) ** -0.5
    params = {
        "w": jax.random.normal(k1, (Cin, Cout, K, K), jnp.float32) * wscale,
        "b": 0.1 * jax.random.normal(k2, (Cout,), jnp.float32),
        "gamma": 1.0 + 0.1 * jax.random.normal(k3, (Cout,), jnp.float32),
        "beta": 0.1 * jax.random.normal(k4, (Cout,), jnp.float32),
    }
    x = jax.random.normal(k5, (B, Cin, H, W), jnp.float32)

    out = transpose_conv_block_pallas(x, params, stride=stride, padding=padding,
                                      groups=groups)
    out = jax.block_until_ready(out)

    ref = transpose_conv_block_ref(x, params, stride=stride, padding=padding,
                                   groups=groups)
    Ho = (H - 1) * stride - 2 * padding + K
    assert out.shape == (B, Cout, Ho, Ho)
    assert jnp.allclose(out, ref, atol=2e-4, rtol=2e-4), (
        "mismatch vs JAX reference, max abs err = "
        + str(float(jnp.max(jnp.abs(out - ref)))))

    print("KERNEL_OK")
</pallas_src>

<mosaic_0001>
module attributes {stable_mosaic.version = 11 : i64} {
  func.func @kernel(%arg0: i32, %arg1: memref<1x19x152xf32, #tpu.memory_space<vmem>>, %arg2: memref<16x128x256xf32, #tpu.memory_space<vmem>>, %arg3: memref<1x256xf32, #tpu.memory_space<vmem>>, %arg4: memref<1x256xf32, #tpu.memory_space<vmem>>, %arg5: memref<1x256xf32, #tpu.memory_space<vmem>>, %arg6: memref<256x256xf32, #tpu.memory_space<vmem>>, %arg7: memref<1x16x256xf32, #tpu.memory_space<vmem>>) attributes {dimension_semantics = [#tpu.dimension_semantics<parallel>], iteration_bounds = array<i64: 2>, scalar_prefetch = 0 : i64, scratch_operands = 0 : i64, tpu.core_type = #tpu.core_type<tc>, window_params = [{transform_indices = @transform_0, window_bounds = array<i64: 1, 19, 152>}, {pipeline_mode = #tpu.pipeline_mode<synchronous>, transform_indices = @transform_1, window_bounds = array<i64: 16, 128, 256>}, {pipeline_mode = #tpu.pipeline_mode<synchronous>, transform_indices = @transform_2, window_bounds = array<i64: 1, 256>}, {pipeline_mode = #tpu.pipeline_mode<synchronous>, transform_indices = @transform_3, window_bounds = array<i64: 1, 256>}, {pipeline_mode = #tpu.pipeline_mode<synchronous>, transform_indices = @transform_4, window_bounds = array<i64: 1, 256>}, {pipeline_mode = #tpu.pipeline_mode<synchronous>, transform_indices = @transform_5, window_bounds = array<i64: 256, 256>}, {transform_indices = @transform_6, window_bounds = array<i64: 1, 16, 256>}]} {
    %c0 = arith.constant 0 : index
    %c0_0 = arith.constant 0 : index
    %c0_1 = arith.constant 0 : index
    %0 = vector.load %arg1[%c0, %c0_0, %c0_1] : memref<1x19x152xf32, #tpu.memory_space<vmem>>, vector<1x19x152xf32>
    %1 = vector.shape_cast %0 : vector<1x19x152xf32> to vector<19x152xf32>
    %cst = arith.constant 0.000000e+00 : f32
    %2 = vector.broadcast %cst : f32 to vector<16x256xf32>
    %3 = vector.extract_strided_slice %1 {offsets = [0, 0], sizes = [16, 128], strides = [1, 1]} : vector<19x152xf32> to vector<16x128xf32>
    %c0_2 = arith.constant 0 : index
    %c0_3 = arith.constant 0 : index
    %c0_4 = arith.constant 0 : index
    %4 = vector.load %arg2[%c0_2, %c0_3, %c0_4] : memref<16x128x256xf32, #tpu.memory_space<vmem>>, vector<1x128x256xf32>
    %5 = vector.shape_cast %4 : vector<1x128x256xf32> to vector<128x256xf32>
    %cst_5 = arith.constant dense<0.000000e+00> : vector<16x256xf32>
    %6 = tpu.matmul %3, %5, %cst_5 {dimension_numbers = #tpu.dot_dimension_numbers<[1], [0], [0], [1], [0, 0, 1, 1], [], []>} : vector<16x128xf32>, vector<128x256xf32>, vector<16x256xf32> -> vector<16x256xf32>
    %7 = arith.addf %2, %6 : vector<16x256xf32>
    %8 = vector.extract_strided_slice %1 {offsets = [0, 8], sizes = [16, 128], strides = [1, 1]} : vector<19x152xf32> to vector<16x128xf32>
    %c1 = arith.constant 1 : index
    %c0_6 = arith.constant 0 : index
    %c0_7 = arith.constant 0 : index
    %9 = vector.load %arg2[%c1, %c0_6, %c0_7] : memref<16x128x256xf32, #tpu.memory_space<vmem>>, vector<1x128x256xf32>
    %10 = vector.shape_cast %9 : vector<1x128x256xf32> to vector<128x256xf32>
    %cst_8 = arith.constant dense<0.000000e+00> : vector<16x256xf32>
    %11 = tpu.matmul %8, %10, %cst_8 {dimension_numbers = #tpu.dot_dimension_numbers<[1], [0], [0], [1], [0, 0, 1, 1], [], []>} : vector<16x128xf32>, vector<128x256xf32>, vector<16x256xf32> -> vector<16x256xf32>
    %12 = arith.addf %7, %11 : vector<16x256xf32>
    %13 = vector.extract_strided_slice %1 {offsets = [0, 16], sizes = [16, 128], strides = [1, 1]} : vector<19x152xf32> to vector<16x128xf32>
    %c2 = arith.constant 2 : index
    %c0_9 = arith.constant 0 : index
    %c0_10 = arith.constant 0 : index
    %14 = vector.load %arg2[%c2, %c0_9, %c0_10] : memref<16x128x256xf32, #tpu.memory_space<vmem>>, vector<1x128x256xf32>
    %15 = vector.shape_cast %14 : vector<1x128x256xf32> to vector<128x256xf32>
    %cst_11 = arith.constant dense<0.000000e+00> : vector<16x256xf32>
    %16 = tpu.matmul %13, %15, %cst_11 {dimension_numbers = #tpu.dot_dimension_numbers<[1], [0], [0], [1], [0, 0, 1, 1], [], []>} : vector<16x128xf32>, vector<128x256xf32>, vector<16x256xf32> -> vector<16x256xf32>
    %17 = arith.addf %12, %16 : vector<16x256xf32>
    %18 = vector.extract_strided_slice %1 {offsets = [0, 24], sizes = [16, 128], strides = [1, 1]} : vector<19x152xf32> to vector<16x128xf32>
    %c3 = arith.constant 3 : index
    %c0_12 = arith.constant 0 : index
    %c0_13 = arith.constant 0 : index
    %19 = vector.load %arg2[%c3, %c0_12, %c0_13] : memref<16x128x256xf32, #tpu.memory_space<vmem>>, vector<1x128x256xf32>
    %20 = vector.shape_cast %19 : vector<1x128x256xf32> to vector<128x256xf32>
    %cst_14 = arith.constant dense<0.000000e+00> : vector<16x256xf32>
    %21 = tpu.matmul %18, %20, %cst_14 {dimension_numbers = #tpu.dot_dimension_numbers<[1], [0], [0], [1], [0, 0, 1, 1], [], []>} : vector<16x128xf32>, vector<128x256xf32>, vector<16x256xf32> -> vector<16x256xf32>
    %22 = arith.addf %17, %21 : vector<16x256xf32>
    %23 = vector.extract_strided_slice %1 {offsets = [1, 0], sizes = [16, 128], strides = [1, 1]} : vector<19x152xf32> to vector<16x128xf32>
    %c4 = arith.constant 4 : index
    %c0_15 = arith.constant 0 : index
    %c0_16 = arith.constant 0 : index
    %24 = vector.load %arg2[%c4, %c0_15, %c0_16] : memref<16x128x256xf32, #tpu.memory_space<vmem>>, vector<1x128x256xf32>
    %25 = vector.shape_cast %24 : vector<1x128x256xf32> to vector<128x256xf32>
    %cst_17 = arith.constant dense<0.000000e+00> : vector<16x256xf32>
    %26 = tpu.matmul %23, %25, %cst_17 {dimension_numbers = #tpu.dot_dimension_numbers<[1], [0], [0], [1], [0, 0, 1, 1], [], []>} : vector<16x128xf32>, vector<128x256xf32>, vector<16x256xf32> -> vector<16x256xf32>
    %27 = arith.addf %22, %26 : vector<16x256xf32>
    %28 = vector.extract_strided_slice %1 {offsets = [1, 8], sizes = [16, 128], strides = [1, 1]} : vector<19x152xf32> to vector<16x128xf32>
    %c5 = arith.constant 5 : index
    %c0_18 = arith.constant 0 : index
    %c0_19 = arith.constant 0 : index
    %29 = vector.load %arg2[%c5, %c0_18, %c0_19] : memref<16x128x256xf32, #tpu.memory_space<vmem>>, vector<1x128x256xf32>
    %30 = vector.shape_cast %29 : vector<1x128x256xf32> to vector<128x256xf32>
    %cst_20 = arith.constant dense<0.000000e+00> : vector<16x256xf32>
    %31 = tpu.matmul %28, %30, %cst_20 {dimension_numbers = #tpu.dot_dimension_numbers<[1], [0], [0], [1], [0, 0, 1, 1], [], []>} : vector<16x128xf32>, vector<128x256xf32>, vector<16x256xf32> -> vector<16x256xf32>
    %32 = arith.addf %27, %31 : vector<16x256xf32>
    %33 = vector.extract_strided_slice %1 {offsets = [1, 16], sizes = [16, 128], strides = [1, 1]} : vector<19x152xf32> to vector<16x128xf32>
    %c6 = arith.constant 6 : index
    %c0_21 = arith.constant 0 : index
    %c0_22 = arith.constant 0 : index
    %34 = vector.load %arg2[%c6, %c0_21, %c0_22] : memref<16x128x256xf32, #tpu.memory_space<vmem>>, vector<1x128x256xf32>
    %35 = vector.shape_cast %34 : vector<1x128x256xf32> to vector<128x256xf32>
    %cst_23 = arith.constant dense<0.000000e+00> : vector<16x256xf32>
    %36 = tpu.matmul %33, %35, %cst_23 {dimension_numbers = #tpu.dot_dimension_numbers<[1], [0], [0], [1], [0, 0, 1, 1], [], []>} : vector<16x128xf32>, vector<128x256xf32>, vector<16x256xf32> -> vector<16x256xf32>
    %37 = arith.addf %32, %36 : vector<16x256xf32>
    %38 = vector.extract_strided_slice %1 {offsets = [1, 24], sizes = [16, 128], strides = [1, 1]} : vector<19x152xf32> to vector<16x128xf32>
    %c7 = arith.constant 7 : index
    %c0_24 = arith.constant 0 : index
    %c0_25 = arith.constant 0 : index
    %39 = vector.load %arg2[%c7, %c0_24, %c0_25] : memref<16x128x256xf32, #tpu.memory_space<vmem>>, vector<1x128x256xf32>
    %40 = vector.shape_cast %39 : vector<1x128x256xf32> to vector<128x256xf32>
    %cst_26 = arith.constant dense<0.000000e+00> : vector<16x256xf32>
    %41 = tpu.matmul %38, %40, %cst_26 {dimension_numbers = #tpu.dot_dimension_numbers<[1], [0], [0], [1], [0, 0, 1, 1], [], []>} : vector<16x128xf32>, vector<128x256xf32>, vector<16x256xf32> -> vector<16x256xf32>
    %42 = arith.addf %37, %41 : vector<16x256xf32>
    %43 = vector.extract_strided_slice %1 {offsets = [2, 0], sizes = [16, 128], strides = [1, 1]} : vector<19x152xf32> to vector<16x128xf32>
    %c8 = arith.constant 8 : index
    %c0_27 = arith.constant 0 : index
    %c0_28 = arith.constant 0 : index
    %44 = vector.load %arg2[%c8, %c0_27, %c0_28] : memref<16x128x256xf32, #tpu.memory_space<vmem>>, vector<1x128x256xf32>
    %45 = vector.shape_cast %44 : vector<1x128x256xf32> to vector<128x256xf32>
    %cst_29 = arith.constant dense<0.000000e+00> : vector<16x256xf32>
    %46 = tpu.matmul %43, %45, %cst_29 {dimension_numbers = #tpu.dot_dimension_numbers<[1], [0], [0], [1], [0, 0, 1, 1], [], []>} : vector<16x128xf32>, vector<128x256xf32>, vector<16x256xf32> -> vector<16x256xf32>
    %47 = arith.addf %42, %46 : vector<16x256xf32>
    %48 = vector.extract_strided_slice %1 {offsets = [2, 8], sizes = [16, 128], strides = [1, 1]} : vector<19x152xf32> to vector<16x128xf32>
    %c9 = arith.constant 9 : index
    %c0_30 = arith.constant 0 : index
    %c0_31 = arith.constant 0 : index
    %49 = vector.load %arg2[%c9, %c0_30, %c0_31] : memref<16x128x256xf32, #tpu.memory_space<vmem>>, vector<1x128x256xf32>
    %50 = vector.shape_cast %49 : vector<1x128x256xf32> to vector<128x256xf32>
    %cst_32 = arith.constant dense<0.000000e+00> : vector<16x256xf32>
    %51 = tpu.matmul %48, %50, %cst_32 {dimension_numbers = #tpu.dot_dimension_numbers<[1], [0], [0], [1], [0, 0, 1, 1], [], []>} : vector<16x128xf32>, vector<128x256xf32>, vector<16x256xf32> -> vector<16x256xf32>
    %52 = arith.addf %47, %51 : vector<16x256xf32>
    %53 = vector.extract_strided_slice %1 {offsets = [2, 16], sizes = [16, 128], strides = [1, 1]} : vector<19x152xf32> to vector<16x128xf32>
    %c10 = arith.constant 10 : index
    %c0_33 = arith.constant 0 : index
    %c0_34 = arith.constant 0 : index
    %54 = vector.load %arg2[%c10, %c0_33, %c0_34] : memref<16x128x256xf32, #tpu.memory_space<vmem>>, vector<1x128x256xf32>
    %55 = vector.shape_cast %54 : vector<1x128x256xf32> to vector<128x256xf32>
    %cst_35 = arith.constant dense<0.000000e+00> : vector<16x256xf32>
    %56 = tpu.matmul %53, %55, %cst_35 {dimension_numbers = #tpu.dot_dimension_numbers<[1], [0], [0], [1], [0, 0, 1, 1], [], []>} : vector<16x128xf32>, vector<128x256xf32>, vector<16x256xf32> -> vector<16x256xf32>
    %57 = arith.addf %52, %56 : vector<16x256xf32>
    %58 = vector.extract_strided_slice %1 {offsets = [2, 24], sizes = [16, 128], strides = [1, 1]} : vector<19x152xf32> to vector<16x128xf32>
    %c11 = arith.constant 11 : index
    %c0_36 = arith.constant 0 : index
    %c0_37 = arith.constant 0 : index
    %59 = vector.load %arg2[%c11, %c0_36, %c0_37] : memref<16x128x256xf32, #tpu.memory_space<vmem>>, vector<1x128x256xf32>
    %60 = vector.shape_cast %59 : vector<1x128x256xf32> to vector<128x256xf32>
    %cst_38 = arith.constant dense<0.000000e+00> : vector<16x256xf32>
    %61 = tpu.matmul %58, %60, %cst_38 {dimension_numbers = #tpu.dot_dimension_numbers<[1], [0], [0], [1], [0, 0, 1, 1], [], []>} : vector<16x128xf32>, vector<128x256xf32>, vector<16x256xf32> -> vector<16x256xf32>
    %62 = arith.addf %57, %61 : vector<16x256xf32>
    %63 = vector.extract_strided_slice %1 {offsets = [3, 0], sizes = [16, 128], strides = [1, 1]} : vector<19x152xf32> to vector<16x128xf32>
    %c12 = arith.constant 12 : index
    %c0_39 = arith.constant 0 : index
    %c0_40 = arith.constant 0 : index
    %64 = vector.load %arg2[%c12, %c0_39, %c0_40] : memref<16x128x256xf32, #tpu.memory_space<vmem>>, vector<1x128x256xf32>
    %65 = vector.shape_cast %64 : vector<1x128x256xf32> to vector<128x256xf32>
    %cst_41 = arith.constant dense<0.000000e+00> : vector<16x256xf32>
    %66 = tpu.matmul %63, %65, %cst_41 {dimension_numbers = #tpu.dot_dimension_numbers<[1], [0], [0], [1], [0, 0, 1, 1], [], []>} : vector<16x128xf32>, vector<128x256xf32>, vector<16x256xf32> -> vector<16x256xf32>
    %67 = arith.addf %62, %66 : vector<16x256xf32>
    %68 = vector.extract_strided_slice %1 {offsets = [3, 8], sizes = [16, 128], strides = [1, 1]} : vector<19x152xf32> to vector<16x128xf32>
    %c13 = arith.constant 13 : index
    %c0_42 = arith.constant 0 : index
    %c0_43 = arith.constant 0 : index
    %69 = vector.load %arg2[%c13, %c0_42, %c0_43] : memref<16x128x256xf32, #tpu.memory_space<vmem>>, vector<1x128x256xf32>
    %70 = vector.shape_cast %69 : vector<1x128x256xf32> to vector<128x256xf32>
    %cst_44 = arith.constant dense<0.000000e+00> : vector<16x256xf32>
    %71 = tpu.matmul %68, %70, %cst_44 {dimension_numbers = #tpu.dot_dimension_numbers<[1], [0], [0], [1], [0, 0, 1, 1], [], []>} : vector<16x128xf32>, vector<128x256xf32>, vector<16x256xf32> -> vector<16x256xf32>
    %72 = arith.addf %67, %71 : vector<16x256xf32>
    %73 = vector.extract_strided_slice %1 {offsets = [3, 16], sizes = [16, 128], strides = [1, 1]} : vector<19x152xf32> to vector<16x128xf32>
    %c14 = arith.constant 14 : index
    %c0_45 = arith.constant 0 : index
    %c0_46 = arith.constant 0 : index
    %74 = vector.load %arg2[%c14, %c0_45, %c0_46] : memref<16x128x256xf32, #tpu.memory_space<vmem>>, vector<1x128x256xf32>
    %75 = vector.shape_cast %74 : vector<1x128x256xf32> to vector<128x256xf32>
    %cst_47 = arith.constant dense<0.000000e+00> : vector<16x256xf32>
    %76 = tpu.matmul %73, %75, %cst_47 {dimension_numbers = #tpu.dot_dimension_numbers<[1], [0], [0], [1], [0, 0, 1, 1], [], []>} : vector<16x128xf32>, vector<128x256xf32>, vector<16x256xf32> -> vector<16x256xf32>
    %77 = arith.addf %72, %76 : vector<16x256xf32>
    %78 = vector.extract_strided_slice %1 {offsets = [3, 24], sizes = [16, 128], strides = [1, 1]} : vector<19x152xf32> to vector<16x128xf32>
    %c15 = arith.constant 15 : index
    %c0_48 = arith.constant 0 : index
    %c0_49 = arith.constant 0 : index
    %79 = vector.load %arg2[%c15, %c0_48, %c0_49] : memref<16x128x256xf32, #tpu.memory_space<vmem>>, vector<1x128x256xf32>
    %80 = vector.shape_cast %79 : vector<1x128x256xf32> to vector<128x256xf32>
    %cst_50 = arith.constant dense<0.000000e+00> : vector<16x256xf32>
    %81 = tpu.matmul %78, %80, %cst_50 {dimension_numbers = #tpu.dot_dimension_numbers<[1], [0], [0], [1], [0, 0, 1, 1], [], []>} : vector<16x128xf32>, vector<128x256xf32>, vector<16x256xf32> -> vector<16x256xf32>
    %82 = arith.addf %77, %81 : vector<16x256xf32>
    %c0_51 = arith.constant 0 : index
    %c0_52 = arith.constant 0 : index
    %83 = vector.load %arg3[%c0_51, %c0_52] : memref<1x256xf32, #tpu.memory_space<vmem>>, vector<1x256xf32>
    %84 = vector.broadcast %83 : vector<1x256xf32> to vector<16x256xf32>
    %85 = arith.addf %82, %84 : vector<16x256xf32>
    %cst_53 = arith.constant dense<0.000000e+00> : vector<256xf32>
    %86 = vector.multi_reduction <add>, %85, %cst_53 [0] : vector<16x256xf32> to vector<256xf32>
    %87 = vector.shape_cast %86 : vector<256xf32> to vector<1x256xf32>
    %c0_54 = arith.constant 0 : index
    %c0_55 = arith.constant 0 : index
    %88 = vector.load %arg6[%c0_54, %c0_55] : memref<256x256xf32, #tpu.memory_space<vmem>>, vector<256x256xf32>
    %cst_56 = arith.constant dense<0.000000e+00> : vector<1x256xf32>
    %89 = tpu.matmul %87, %88, %cst_56 {dimension_numbers = #tpu.dot_dimension_numbers<[1], [0], [0], [1], [0, 0, 1, 1], [], []>} : vector<1x256xf32>, vector<256x256xf32>, vector<1x256xf32> -> vector<1x256xf32>
    %cst_57 = arith.constant 5.120000e+02 : f32
    %90 = vector.broadcast %cst_57 : f32 to vector<1x256xf32>
    %91 = arith.divf %89, %90 : vector<1x256xf32>
    %92 = vector.broadcast %91 : vector<1x256xf32> to vector<16x256xf32>
    %93 = arith.subf %85, %92 : vector<16x256xf32>
    %94 = arith.mulf %93, %93 : vector<16x256xf32>
    %cst_58 = arith.constant dense<0.000000e+00> : vector<256xf32>
    %95 = vector.multi_reduction <add>, %94, %cst_58 [0] : vector<16x256xf32> to vector<256xf32>
    %96 = vector.shape_cast %95 : vector<256xf32> to vector<1x256xf32>
    %c0_59 = arith.constant 0 : index
    %c0_60 = arith.constant 0 : index
    %97 = vector.load %arg6[%c0_59, %c0_60] : memref<256x256xf32, #tpu.memory_space<vmem>>, vector<256x256xf32>
    %cst_61 = arith.constant dense<0.000000e+00> : vector<1x256xf32>
    %98 = tpu.matmul %96, %97, %cst_61 {dimension_numbers = #tpu.dot_dimension_numbers<[1], [0], [0], [1], [0, 0, 1, 1], [], []>} : vector<1x256xf32>, vector<256x256xf32>, vector<1x256xf32> -> vector<1x256xf32>
    %cst_62 = arith.constant 5.120000e+02 : f32
    %99 = vector.broadcast %cst_62 : f32 to vector<1x256xf32>
    %100 = arith.divf %98, %99 : vector<1x256xf32>
    %cst_63 = arith.constant 9.99999974E-6 : f32
    %101 = vector.broadcast %cst_63 : f32 to vector<1x256xf32>
    %102 = arith.addf %100, %101 : vector<1x256xf32>
    %103 = math.rsqrt %102 : vector<1x256xf32>
    %104 = vector.broadcast %103 : vector<1x256xf32> to vector<16x256xf32>
    %105 = arith.mulf %93, %104 : vector<16x256xf32>
    %c0_64 = arith.constant 0 : index
    %c0_65 = arith.constant 0 : index
    %106 = vector.load %arg4[%c0_64, %c0_65] : memref<1x256xf32, #tpu.memory_space<vmem>>, vector<1x256xf32>
    %107 = vector.broadcast %106 : vector<1x256xf32> to vector<16x256xf32>
    %108 = arith.mulf %105, %107 : vector<16x256xf32>
    %c0_66 = arith.constant 0 : index
    %c0_67 = arith.constant 0 : index
    %109 = vector.load %arg5[%c0_66, %c0_67] : memref<1x256xf32, #tpu.memory_space<vmem>>, vector<1x256xf32>
    %110 = vector.broadcast %109 : vector<1x256xf32> to vector<16x256xf32>
    %111 = arith.addf %108, %110 : vector<16x256xf32>
    %cst_68 = arith.constant 0.707106769 : f32
    %112 = vector.broadcast %cst_68 : f32 to vector<16x256xf32>
    %113 = arith.mulf %111, %112 : vector<16x256xf32>
    %114 = math.absf %113 : vector<16x256xf32>
    %cst_69 = arith.constant 0.327591091 : f32
    %115 = vector.broadcast %cst_69 : f32 to vector<16x256xf32>
    %116 = arith.mulf %115, %114 : vector<16x256xf32>
    %cst_70 = arith.constant 1.000000e+00 : f32
    %117 = vector.broadcast %cst_70 : f32 to vector<16x256xf32>
    %118 = arith.addf %117, %116 : vector<16x256xf32>
    %cst_71 = arith.constant 1.000000e+00 : f32
    %119 = vector.broadcast %cst_71 : f32 to vector<16x256xf32>
    %120 = arith.divf %119, %118 : vector<16x256xf32>
    %cst_72 = arith.constant 1.06140542 : f32
    %121 = vector.broadcast %cst_72 : f32 to vector<16x256xf32>
    %122 = arith.mulf %120, %121 : vector<16x256xf32>
    %cst_73 = arith.constant -1.45315206 : f32
    %123 = vector.broadcast %cst_73 : f32 to vector<16x256xf32>
    %124 = arith.addf %123, %122 : vector<16x256xf32>
    %125 = arith.mulf %120, %124 : vector<16x256xf32>
    %cst_74 = arith.constant 1.42141378 : f32
    %126 = vector.broadcast %cst_74 : f32 to vector<16x256xf32>
    %127 = arith.addf %126, %125 : vector<16x256xf32>
    %128 = arith.mulf %120, %127 : vector<16x256xf32>
    %cst_75 = arith.constant -0.284496725 : f32
    %129 = vector.broadcast %cst_75 : f32 to vector<16x256xf32>
    %130 = arith.addf %129, %128 : vector<16x256xf32>
    %131 = arith.mulf %120, %130 : vector<16x256xf32>
    %cst_76 = arith.constant 0.254829586 : f32
    %132 = vector.broadcast %cst_76 : f32 to vector<16x256xf32>
    %133 = arith.addf %132, %131 : vector<16x256xf32>
    %134 = arith.mulf %120, %133 : vector<16x256xf32>
    %cst_77 = arith.constant 0.000000e+00 : f32
    %135 = vector.broadcast %cst_77 : f32 to vector<16x256xf32>
    %136 = arith.subf %135, %114 : vector<16x256xf32>
    %137 = arith.mulf %136, %114 : vector<16x256xf32>
    %138 = math.exp %137 : vector<16x256xf32>
    %139 = arith.mulf %134, %138 : vector<16x256xf32>
    %cst_78 = arith.constant 1.000000e+00 : f32
    %140 = vector.broadcast %cst_78 : f32 to vector<16x256xf32>
    %141 = arith.subf %140, %139 : vector<16x256xf32>
    %cst_79 = arith.constant 0.000000e+00 : f32
    %142 = vector.broadcast %cst_79 : f32 to vector<16x256xf32>
    %143 = arith.cmpf olt, %113, %142 : vector<16x256xf32>
    %cst_80 = arith.constant 0.000000e+00 : f32
    %144 = vector.broadcast %cst_80 : f32 to vector<16x256xf32>
    %145 = arith.subf %144, %141 : vector<16x256xf32>
    %146 = arith.select %143, %145, %141 : vector<16x256xi1>, vector<16x256xf32>
    %cst_81 = arith.constant 5.000000e-01 : f32
    %147 = vector.broadcast %cst_81 : f32 to vector<16x256xf32>
    %148 = arith.mulf %147, %111 : vector<16x256xf32>
    %cst_82 = arith.constant 1.000000e+00 : f32
    %149 = vector.broadcast %cst_82 : f32 to vector<16x256xf32>
    %150 = arith.addf %149, %146 : vector<16x256xf32>
    %151 = arith.mulf %148, %150 : vector<16x256xf32>
    %c0_83 = arith.constant 0 : index
    %c0_84 = arith.constant 0 : index
    %c0_85 = arith.constant 0 : index
    %152 = vector.load %arg7[%c0_83, %c0_84, %c0_85] : memref<1x16x256xf32, #tpu.memory_space<vmem>>, vector<1x16x256xf32>
    %153 = vector.shape_cast %152 : vector<1x16x256xf32> to vector<16x256xf32>
    %154 = vector.shape_cast %151 : vector<16x256xf32> to vector<1x16x256xf32>
    tpu.vector_store %arg7[%c0_83, %c0_84, %c0_85], %154 {strides = array<i32>} : memref<1x16x256xf32, #tpu.memory_space<vmem>>, vector<1x16x256xf32>,
    return
  }
  func.func @transform_0(%arg0: i32) -> (i32, i32, i32) {
    %c0_i32 = arith.constant 0 : i32
    %c0_i32_0 = arith.constant 0 : i32
    %c0_i32_1 = arith.constant 0 : i32
    return %arg0, %c0_i32, %c0_i32_0 : i32, i32, i32
  }
  func.func @transform_1(%arg0: i32) -> (i32, i32, i32) {
    %c0_i32 = arith.constant 0 : i32
    %c0_i32_0 = arith.constant 0 : i32
    %c0_i32_1 = arith.constant 0 : i32
    %c0_i32_2 = arith.constant 0 : i32
    return %c0_i32, %c0_i32_0, %c0_i32_1 : i32, i32, i32
  }
  func.func @transform_2(%arg0: i32) -> (i32, i32) {
    %c0_i32 = arith.constant 0 : i32
    %c0_i32_0 = arith.constant 0 : i32
    %c0_i32_1 = arith.constant 0 : i32
    return %c0_i32, %c0_i32_0 : i32, i32
  }
  func.func @transform_3(%arg0: i32) -> (i32, i32) {
    %c0_i32 = arith.constant 0 : i32
    %c0_i32_0 = arith.constant 0 : i32
    %c0_i32_1 = arith.constant 0 : i32
    return %c0_i32, %c0_i32_0 : i32, i32
  }
  func.func @transform_4(%arg0: i32) -> (i32, i32) {
    %c0_i32 = arith.constant 0 : i32
    %c0_i32_0 = arith.constant 0 : i32
    %c0_i32_1 = arith.constant 0 : i32
    return %c0_i32, %c0_i32_0 : i32, i32
  }
  func.func @transform_5(%arg0: i32) -> (i32, i32) {
    %c0_i32 = arith.constant 0 : i32
    %c0_i32_0 = arith.constant 0 : i32
    %c0_i32_1 = arith.constant 0 : i32
    return %c0_i32, %c0_i32_0 : i32, i32
  }
  func.func @transform_6(%arg0: i32) -> (i32, i32, i32) {
    %c0_i32 = arith.constant 0 : i32
    %c0_i32_0 = arith.constant 0 : i32
    %c0_i32_1 = arith.constant 0 : i32
    return %arg0, %c0_i32, %c0_i32_0 : i32, i32, i32
  }
}

</mosaic_0001>

<bundles_post_ra>
// kernel: tpu_custom_call.1
= control target key start
LH: loop header
LB: loop body
LE: loop exit
PB: predicated region body
PF: predicated region fallthrough
CT: control target
= control target key end

     0   :  { %s3775_s0 = inlined_call_operand.vmem [shape: f32[2,19,152], index: 0, kind: input, shape index: {}]   ;;  %s3776_s1 = inlined_call_operand.hbm [shape: f32[16,128,256], index: 1, kind: input, shape index: {}]   ;;  %s3777_s2 = inlined_call_operand.hbm [shape: f32[1,256], index: 2, kind: input, shape index: {}]   ;;  %s3778_s3 = inlined_call_operand.hbm [shape: f32[1,256], index: 3, kind: input, shape index: {}]   ;;  %s3779_s4 = inlined_call_operand.hbm [shape: f32[1,256], index: 4, kind: input, shape index: {}]   ;;  %s3780_s5 = inlined_call_operand.hbm [shape: f32[256,256], index: 5, kind: input, shape index: {}]   ;;  %s3781_s6 = inlined_call_operand.hbm [shape: f32[2,16,256], index: 6, kind: output, shape index: {}]  }
   0x1   :  { %3806 = sst [smem:[#allocation40_spill]] %s3776_s1 }
   0x2   :  { %3807 = sst [smem:[#allocation41_spill]] %s3777_s2 }
   0x3   :  { %11 = vsyncpa [#allocation3], 0 }
   0x4   :  { %12 = vsyncpa [#allocation6], 0 }
   0x5   :  { %13 = vsyncpa [#allocation9], 0 }
   0x6   :  { %14 = vsyncpa [#allocation4], 0 }
   0x7   :  { %16 = vsyncpa [#allocation4 + $0x1], 0  ;;  %s3004_s21 = smov 0   ;;  %s3006_s22 = smov 0  }
   0x8   :  { %s3008_s23 = smov 0   ;;  %s3010_s24 = smov 0  }
   0x9 LB: > { %s3025_s25 = sadd.s32 4294967295, %s2954_s24   ;;  %s2467_s26 = sadd.s32 4294967294, %s2954_s24   ;;  %s2954_s24 = sphi %s3010_s24, %s3865_s24   ;;  %s2950_s23 = sphi %s3008_s23, %s3864_s23   ;;  %s2946_s22 = sphi %s3006_s22, %s3863_s22   ;;  %s2942_s21 = sphi %s3004_s21, %s3862_s21  }
   0xa   : > { %s3029_s27 = sadd.s32 1, %s2954_s24   ;;  %s160_s28 = sadd.s32 1, %s2950_s23 }
   0xb   : > { %s157_s29 = ssub.s32 %s2954_s24, %s3029_s27  ;;  %p170_p0 = scmp.ne.s32.totalorder %s2950_s23, %s2946_s22 }
   0xc   : > { %p158_p1 = scmp.eq.s32.totalorder %s157_s29, 0  ;;  %p171_p2 = scmp.eq.s32.totalorder %s3025_s25, 1 }
   0xd   : > { %p176_p3 = scmp.ne.s32.totalorder %s2946_s22, %s2942_s21  ;;  %p177_p4 = scmp.eq.s32.totalorder %s2467_s26, 1 }
   0xe   : > { %s3040_s30 = scalar_select %p158_p1, %s2950_s23, %s160_s28  }
   0xf   : > { %p3042_p5 = por %p171_p2, %p170_p0  ;;  %p3046_p6 = por %p177_p4, %p176_p3 }
  0x10   : > { %p2468_p7 = scmp.ge.s32.totalorder %s2954_s24, 1  ;;  %p184_p8 = scmp.lt.s32.totalorder %s2954_s24, 3 }
  0x11   : > { %p2532_p9 = scmp.eq.s32.totalorder %s3025_s25, 0  ;;  %s3811_s2 = sld [smem:[#allocation41_spill]] }
  0x12   : > { %p3053_p10 = pnand %p2468_p7, %p184_p8  ;;  %s2956_s13 = smov [#allocation5]  }
  0x13   : > { %s212_s14 = sshll.u32 %s2956_s13, 4  ;;  %s234_s17 = sshll.u32 %s3779_s4, 4  ;;  %s213_s14 = int_to_ptr.vmem [resolvable:$true] %s212_s14  ;;  %s235_s17 = int_to_ptr.hbm [resolvable:$true] %s234_s17 }
  0x14   : > { %p2512_p11 = pneg %p3053_p10  ;;  %s3813_s1 = sld [smem:[#allocation40_spill]] }
  0x15   : > { %s2957_s28 = smov [#allocation8]   ;;  %s2958_s10 = smov [#allocation2]  }
  0x16   : > { %p3067_p12 = pnand %p2532_p9, %p2512_p11  ;;  %s236_s29 = sshll.u32 %s2957_s28, 4  ;;  %s237_s29 = int_to_ptr.vmem [resolvable:$true] %s236_s29 }
  0x17   : > { %s210_s12 = sshll.u32 %s3811_s2, 4  ;;  %s197_s11 = sshll.u32 %s2958_s10, 4  ;;  %s211_s12 = int_to_ptr.hbm [resolvable:$true] %s210_s12  ;;  %s198_s11 = int_to_ptr.vmem [resolvable:$true] %s197_s11 }
  0x18   : > { %2518 = dma.hbm_to_vmem [thread:$0]  (!%p3067_p12), %s211_s12, 32, %s213_s14, [#allocation6]  }
  0x19   : > { %2524 = dma.hbm_to_vmem [thread:$0]  (!%p3067_p12), %s235_s17, 32, %s237_s29, [#allocation9]  }
  0x1a   : > { %s195_s26 = sshll.u32 %s3813_s1, 4  ;;  %s222_s16 = sshll.u32 %s3778_s3, 4  ;;  %s196_s26 = int_to_ptr.hbm [resolvable:$true] %s195_s26  ;;  %s223_s16 = int_to_ptr.hbm [resolvable:$true] %s222_s16 }
  0x1b   : > { %s2959_s2 = smov 256   ;;  %s2960_s19 = smov 16  }
  0x1c   : > { %2515 = dma.hbm_to_vmem [thread:$0]  (!%p3067_p12), %s196_s26, 65536, %s198_s11, [#allocation3], %s2959_s2, %s2959_s2, %s2960_s19  }
  0x1d   : > { %s2961_s20 = smov [#allocation7]   ;;  %s245_s1 = sshll.u32 %s3780_s5, 4  ;;  %s246_s1 = int_to_ptr.hbm [resolvable:$true] %s245_s1 }
  0x1e   : > { %s224_s12 = sshll.u32 %s2961_s20, 4  ;;  %s2962_s17 = smov [#allocation10]   ;;  %s225_s12 = int_to_ptr.vmem [resolvable:$true] %s224_s12 }
  0x1f   : > { %2521 = dma.hbm_to_vmem [thread:$0]  (!%p3067_p12), %s223_s16, 32, %s225_s12, [#allocation6]  }
  0x20   : > { %s247_s29 = sshll.u32 %s2962_s17, 4  ;;  %271 = sbr.rel (%p3053_p10) target bundleno = 909 (0x38d), region = 44  ;;  %s248_s29 = int_to_ptr.vmem [resolvable:$true] %s247_s29 }
  0x21   : > { %2527 = dma.hbm_to_vmem [thread:$0]  (!%p3067_p12), %s246_s1, 8192, %s248_s29, [#allocation9], %s2959_s2, %s2959_s2, %s2960_s19  }
  0x25   : > { %2925 = dma.done.wait (%p2532_p9), [#allocation3], 65536  }
  0x26   : > { %2927 = vsyncadd (%p2532_p9), [#allocation3], 4294901760 }
  0x27   : > { %2929 = dma.done.wait (%p2532_p9), [#allocation6], 64  }
  0x28   : > { %2931 = vsyncadd (%p2532_p9), [#allocation6], 4294967232 }
  0x29   : > { %2933 = dma.done.wait (%p2532_p9), [#allocation9], 8224  }
  0x2a   : > { %2935 = vsyncadd (%p2532_p9), [#allocation9], 4294959072  ;;  %p322_p13 = scmp.lt.s32.totalorder %s3025_s25, 1  ;;  %v363_v5 = vld [vmem:[#allocation2 + $0xf0] sm:$0xff]  ;;  %v364_v6 = vld [vmem:[#allocation2 + $0xf8] sm:$0xff]  ;;  %s2963_s10 = smov 120  }
  0x2b   : > { %s2964_s11 = smov 104   ;;  %v361_v8 = vld [vmem:[#allocation2 + $0xe0] sm:$0xff]  ;;  %v362_v9 = vld [vmem:[#allocation2 + $0xe8] sm:$0xff]  ;;  %v396_v10 = vld [vmem:[#allocation2 + $0x1f0] sm:$0xff]  ;;  %461 = vmatpush.msra.mxu2 %v363_v5  ;;  %484 = vmatpush.msra.mxu3 %v364_v6  ;;  %vm733_vm0 = vcmask 1046528   ;;  %s2965_s13 = smov 112  }
  0x2c   : > { %s323_s1 = scalar_select %p322_p13, %s3025_s25, 1  ;;  %v397_v12 = vld [vmem:[#allocation2 + $0x1f8] sm:$0xff]  ;;  %v394_v13 = vld [vmem:[#allocation2 + $0x1e0] sm:$0xff]  ;;  %415 = vmatpush.msra.mxu0 %v396_v10  ;;  %v359_v15 = vld [vmem:[#allocation2 + $0xd0] sm:$0xff]  ;;  %vm1115_vm1 = vcmask 1045504   ;;  %vm410_vm2 = vcmask 982016  }
  0x2d   : > { %v360_v16 = vld [vmem:[#allocation2 + $0xd8] sm:$0xff]  ;;  %462 = vmatpush.msra.mxu2 %v361_v8  ;;  %485 = vmatpush.msra.mxu3 %v362_v9  ;;  %v395_v17 = vld [vmem:[#allocation2 + $0x1e8] sm:$0xff]  ;;  %v392_v18 = vld [vmem:[#allocation2 + $0x1d0] sm:$0xff]  ;;  %vm644_vm3 = vcmask 850944   ;;  %vm1496_vm4 = vcmask 1044480   ;;  %vm548_vm5 = vcmask 916480  }
  0x2e   : > { %s2489_s2 = smul.u32 48, %s323_s1  ;;  %438 = vmatpush.msra.mxu1 %v397_v12  ;;  %416 = vmatpush.msra.mxu0 %v394_v13  ;;  %v357_v21 = vld [vmem:[#allocation2 + $0xc0] sm:$0xff]  ;;  %v358_v22 = vld [vmem:[#allocation2 + $0xc8] sm:$0xff]  ;;  %v393_v27 = vld [vmem:[#allocation2 + $0x1d8] sm:$0xff]  ;;  %s319_s15 = sand.u32 1, %s2946_s22  }
  0x2f   : > { %463 = vmatpush.msra.mxu2 %v359_v15  ;;  %486 = vmatpush.msra.mxu3 %v360_v16  ;;  %v355_v28 = vld [vmem:[#allocation2 + $0xb0] sm:$0xff]  ;;  %v356_v29 = vld [vmem:[#allocation2 + $0xb8] sm:$0xff]  ;;  %v390_v31 = vld [vmem:[#allocation2 + $0x1c0] sm:$0xff]  ;;  %s2481_s16 = sshll.u32 %s319_s15, 5  ;;  %s2488_s19 = sshll.u32 %s3025_s25, 5 }
  0x30   : > { %s326_s26 = scalar_lea.vmem %s3775_s0, %s2489_s2  ;;  %439 = vmatpush.msra.mxu1 %v395_v17  ;;  %417 = vmatpush.msra.mxu0 %v392_v18  ;;  %v391_v32 = vld [vmem:[#allocation2 + $0x1c8] sm:$0xff]  ;;  %v353_v36 = vld [vmem:[#allocation2 + $0xa0] sm:$0xff]  ;;  %v388_v38 = vld [vmem:[#allocation2 + $0x1b0] sm:$0xff]  ;;  %s321_s20 = scalar_lea.vmem [#allocation11], %s2481_s16 }
  0x31   : > { %v3109_v0 = vld [vmem:[%s326_s26] sm:$0xff]  ;;  %v3111_v1 = vld [vmem:[%s326_s26 + $0x8] sm:$0xff]  ;;  %v3115_v3 = vld [vmem:[%s326_s26 + $0x10] sm:$0xff]  ;;  %464 = vmatpush.msra.mxu2 %v357_v21  ;;  %487 = vmatpush.msra.mxu3 %v358_v22  ;;  %s2351_s28 = scalar_lea.hbm %s3781_s6, %s2488_s19  ;;  %s2352_s25 = sshll.u32 %s321_s20, 4  ;;  %s2353_s25 = int_to_ptr.vmem [resolvable:$true] %s2352_s25 }
  0x32   : > { %v2588_v2 = vpack.i.bf16 %v3111_v1, %v3109_v0  ;;  %v3117_v4 = vld [vmem:[%s326_s26 + $0x18] sm:$0xff]  ;;  %v3123_v11 = vld [vmem:[%s326_s26 + $0x20] sm:$0x7]  ;;  %v3125_v14 = vld [vmem:[%s326_s26 + $0x28] sm:$0x7]  ;;  %v734_v19 = vrot.slane %v3109_v0, 1  ;;  %440 = vmatpush.msra.mxu1 %v393_v27  ;;  %418 = vmatpush.msra.mxu0 %v390_v31 }
  0x33   : > { %v2608_v7 = vpack.i.bf16 %v3117_v4, %v3115_v3  ;;  %v735_v20 = vrot.slane %v3115_v3, 1  ;;  %v825_v23 = vrot.slane %v3111_v1, 1  ;;  %v826_v24 = vrot.slane %v3117_v4, 1  ;;  %465 = vmatpush.msra.mxu2 %v355_v28  ;;  %v354_v37 = vld [vmem:[#allocation2 + $0xa8] sm:$0xff]  ;;  %488 = vmatpush.msra.mxu3 %v356_v29  ;;  %v389_v39 = vld [vmem:[#allocation2 + $0x1b8] sm:$0xff]  ;;  %v351_v40 = vld [vmem:[#allocation2 + $0x90] sm:$0xff] }
  0x34   : > { %2589 = vrot.lane.b32.xlu0 %v2588_v2, %s2963_s10  ;;  %2599 = vrot.lane.b32.xlu1 %v2588_v2, %s2964_s11  ;;  %v737_v25 = vrot.slane %v3123_v11, 1  ;;  %v828_v26 = vrot.slane %v3125_v14, 1  ;;  %v352_v41 = vld [vmem:[#allocation2 + $0x98] sm:$0xff]  ;;  %v386_v44 = vld [vmem:[#allocation2 + $0x1a0] sm:$0xff]  ;;  %v387_v45 = vld [vmem:[#allocation2 + $0x1a8] sm:$0xff]  ;;  %s2354_s17 = sshll.u32 %s2351_s28, 4  ;;  %s2355_s17 = int_to_ptr.hbm [resolvable:$true] %s2354_s17 }
  0x35   : > { %2609 = vrot.lane.b32.xlu2 %v2608_v7, %s2964_s11  ;;  %v3137_v30 = vsel %vm733_vm0, %v734_v19, %v735_v20  ;;  %v827_v33 = vsel %vm733_vm0, %v825_v23, %v826_v24  ;;  %441 = vmatpush.msra.mxu1 %v391_v32  ;;  %v349_v46 = vld [vmem:[#allocation2 + $0x80] sm:$0xff]  ;;  %v350_v47 = vld [vmem:[#allocation2 + $0x88] sm:$0xff]  ;;  %v384_v48 = vld [vmem:[#allocation2 + $0x190] sm:$0xff]  ;;  %v1116_v23 = vrot.slane %v3109_v0, 2  ;;  %s2340_s29 = scalar_lea.sflag [#allocation4], %s319_s15  ;;  %s2894_s1 = sshra.s32 %s2355_s17, 4  ;;  %s2895_s1 = int_to_ptr.hbm [resolvable:$true] %s2894_s1 }
  0x36   : > { %v3141_v34 = vsel %vm733_vm0, %v735_v20, %v737_v25  ;;  %v829_v35 = vsel %vm733_vm0, %v826_v24, %v828_v26  ;;  %v3146_v42 = vpack.i.bf16 %v827_v33, %v3137_v30  ;;  %466 = vmatpush.msra.mxu2 %v353_v36  ;;  %489 = vmatpush.msra.mxu3 %v354_v37  ;;  %v385_v49 = vld [vmem:[#allocation2 + $0x198] sm:$0xff]  ;;  %v347_v50 = vld [vmem:[#allocation2 + $0x70] sm:$0xff]  ;;  %v382_v52 = vld [vmem:[#allocation2 + $0x180] sm:$0xff]  ;;  %v1117_v24 = vrot.slane %v3115_v3, 2  ;;  %s2896_s2 = scalar_lea.hbm %s2895_s1, 32  ;;  %s2900_s26 = scalar_lea.hbm %s3781_s6, 64 }
  0x37   : > { %v3149_v43 = vpack.i.bf16 %v829_v35, %v3141_v34  ;;  %419 = vmatpush.msra.mxu0 %v388_v38  ;;  %442 = vmatpush.msra.mxu1 %v389_v39  ;;  %v348_v51 = vld [vmem:[#allocation2 + $0x78] sm:$0xff]  ;;  %v383_v53 = vld [vmem:[#allocation2 + $0x188] sm:$0xff]  ;;  %v345_v54 = vld [vmem:[#allocation2 + $0x60] sm:$0xff]  ;;  %v1206_v25 = vrot.slane %v3111_v1, 2  ;;  %v1207_v26 = vrot.slane %v3117_v4, 2  ;;  %p2897_p0 = scmp.ne.s32.totalorder %s2895_s1, %s2896_s2  ;;  %p2901_p3 = scmp.lt.s32.totalorder %s2895_s1, %s3781_s6 }
  0x38   : > { %467 = vmatpush.msra.mxu2 %v351_v40  ;;  %490 = vmatpush.msra.mxu3 %v352_v41  ;;  %v346_v55 = vld [vmem:[#allocation2 + $0x68] sm:$0xff]  ;;  %v380_v56 = vld [vmem:[#allocation2 + $0x170] sm:$0xff]  ;;  %v381_v57 = vld [vmem:[#allocation2 + $0x178] sm:$0xff]  ;;  %v3166_v37 = vsel %vm1115_vm1, %v1116_v23, %v1117_v24  ;;  %p2902_p4 = scmp.lt.s32.totalorder %s2900_s26, %s2896_s2 }
  0x39   : > { %420 = vmatpush.msra.mxu0 %v386_v44  ;;  %443 = vmatpush.msra.mxu1 %v387_v45  ;;  %v343_v58 = vld [vmem:[#allocation2 + $0x50] sm:$0xff]  ;;  %v344_v59 = vld [vmem:[#allocation2 + $0x58] sm:$0xff]  ;;  %v378_v60 = vld [vmem:[#allocation2 + $0x160] sm:$0xff]  ;;  %v1208_v38 = vsel %vm1115_vm1, %v1206_v25, %v1207_v26  ;;  %p2898_p1 = pnand %p2897_p0, %p3042_p5 }
  0x3a   : > { %468 = vmatpush.msra.mxu2 %v349_v46  ;;  %491 = vmatpush.msra.mxu3 %v350_v47  ;;  %v379_v61 = vld [vmem:[#allocation2 + $0x168] sm:$0xff]  ;;  %v341_v62 = vld [vmem:[#allocation2 + $0x40] sm:$0xff]  ;;  %v377_v5 = vld [vmem:[#allocation2 + $0x158] sm:$0xff]  ;;  %v3170_v46 = vpack.i.bf16 %v1208_v38, %v3166_v37  ;;  %p2903_p7 = por %p2902_p4, %p2901_p3 }
  0x3b   : > { %421 = vmatpush.msra.mxu0 %v384_v48  ;;  %444 = vmatpush.msra.mxu1 %v385_v49  ;;  %v342_v63 = vld [vmem:[#allocation2 + $0x48] sm:$0xff]  ;;  %v339_v6 = vld [vmem:[#allocation2 + $0x30] sm:$0xff]  ;;  %v374_v8 = vld [vmem:[#allocation2 + $0x140] sm:$0xff]  ;;  %p2899_p2 = pneg %p2898_p1 }
  0x3c   : > { %2594 = vrot.lane.b32.xlu0 %v2608_v7, %s2963_s10  ;;  %2604 = vrot.lane.b32.xlu1 %v2588_v2, %s2965_s13  ;;  %v376_v2 = vld [vmem:[#allocation2 + $0x150] sm:$0xff]  ;;  %v375_v9 = vld [vmem:[#allocation2 + $0x148] sm:$0xff]  ;;  %v337_v10 = vld [vmem:[#allocation2 + $0x20] sm:$0xff] }
  0x3d   : > { %2614 = vrot.lane.b32.xlu2 %v2608_v7, %s2965_s13  ;;  %469 = vmatpush.msra.mxu2 %v347_v50  ;;  %v340_v7 = vld [vmem:[#allocation2 + $0x38] sm:$0xff]  ;;  %v338_v12 = vld [vmem:[#allocation2 + $0x28] sm:$0xff]  ;;  %v372_v13 = vld [vmem:[#allocation2 + $0x130] sm:$0xff]  ;;  %v1119_v50 = vrot.slane %v3123_v11, 2  ;;  %p2904_p8 = pnand %p2903_p7, %p2899_p2 }
  0x3e   : > { %492 = vmatpush.msra.mxu3 %v348_v51  ;;  %422 = vmatpush.msra.mxu0 %v382_v52  ;;  %v373_v15 = vld [vmem:[#allocation2 + $0x138] sm:$0xff]  ;;  %v335_v16 = vld [vmem:[#allocation2 + $0x10] sm:$0xff]  ;;  %v370_v18 = vld [vmem:[#allocation2 + $0x120] sm:$0xff]  ;;  %v1209_v51 = vrot.slane %v3125_v14, 2 }
  0x3f   : > { %445 = vmatpush.msra.mxu1 %v383_v53  ;;  %470 = vmatpush.msra.mxu2 %v345_v54  ;;  %v336_v17 = vld [vmem:[#allocation2 + $0x18] sm:$0xff]  ;;  %v371_v19 = vld [vmem:[#allocation2 + $0x128] sm:$0xff]  ;;  %v333_v20 = vld [vmem:[#allocation2] sm:$0xff] }
  0x40   : > { %493 = vmatpush.msra.mxu3 %v346_v55  ;;  %423 = vmatpush.msra.mxu0 %v380_v56  ;;  %v334_v21 = vld [vmem:[#allocation2 + $0x8] sm:$0xff]  ;;  %v634_v22 = vld [vmem:[#allocation2 + $0x3f0] sm:$0xff]  ;;  %v635_v27 = vld [vmem:[#allocation2 + $0x3f8] sm:$0xff] }
  0x41   : > { %446 = vmatpush.msra.mxu1 %v381_v57  ;;  %471 = vmatpush.msra.mxu2 %v343_v58  ;;  %v368_v28 = vld [vmem:[#allocation2 + $0x110] sm:$0xff]  ;;  %v369_v29 = vld [vmem:[#allocation2 + $0x118] sm:$0xff]  ;;  %v632_v31 = vld [vmem:[#allocation2 + $0x3e0] sm:$0xff] }
  0x42   : > { %494 = vmatpush.msra.mxu3 %v344_v59  ;;  %424 = vmatpush.msra.mxu0 %v378_v60  ;;  %v633_v32 = vld [vmem:[#allocation2 + $0x3e8] sm:$0xff]  ;;  %v366_v33 = vld [vmem:[#allocation2 + $0x100] sm:$0xff]  ;;  %v538_v36 = vld [vmem:[#allocation2 + $0x2f0] sm:$0xff]  ;;  %v3177_v59 = vsel %vm1115_vm1, %v1117_v24, %v1119_v50  ;;  %v1210_v60 = vsel %vm1115_vm1, %v1207_v26, %v1209_v51 }
  0x43   : > { %447 = vmatpush.msra.mxu1 %v379_v61  ;;  %472 = vmatpush.msra.mxu2 %v341_v62  ;;  %v367_v35 = vld [vmem:[#allocation2 + $0x108] sm:$0xff]  ;;  %v539_v39 = vld [vmem:[#allocation2 + $0x2f8] sm:$0xff]  ;;  %v630_v40 = vld [vmem:[#allocation2 + $0x3d0] sm:$0xff] }
  0x44   : > { %2619 = vrot.lane.b32.xlu0 %v3146_v42, %s2963_s10  ;;  %2624 = vrot.lane.b32.xlu1 %v3149_v43, %s2963_s10  ;;  %v631_v41 = vld [vmem:[#allocation2 + $0x3d8] sm:$0xff]  ;;  %v537_v44 = vld [vmem:[#allocation2 + $0x2e8] sm:$0xff]  ;;  %v628_v45 = vld [vmem:[#allocation2 + $0x3c0] sm:$0xff] }
  0x45   : > { %495 = vmatpush.msra.mxu3 %v342_v63  ;;  %425 = vmatpush.msra.mxu0 %v376_v2  ;;  %v629_v47 = vld [vmem:[#allocation2 + $0x3c8] sm:$0xff]  ;;  %v534_v48 = vld [vmem:[#allocation2 + $0x2d0] sm:$0xff]  ;;  %v535_v49 = vld [vmem:[#allocation2 + $0x2d8] sm:$0xff] }
  0x46   : > { %448 = vmatpush.msra.mxu1 %v377_v5  ;;  %473 = vmatpush.msra.mxu2 %v339_v6  ;;  %v626_v52 = vld [vmem:[#allocation2 + $0x3b0] sm:$0xff]  ;;  %v627_v53 = vld [vmem:[#allocation2 + $0x3b8] sm:$0xff]  ;;  %v532_v54 = vld [vmem:[#allocation2 + $0x2c0] sm:$0xff] }
  0x47   : > { %496 = vmatpush.msra.mxu3 %v340_v7  ;;  %426 = vmatpush.msra.mxu0 %v374_v8  ;;  %v533_v55 = vld [vmem:[#allocation2 + $0x2c8] sm:$0xff]  ;;  %v624_v56 = vld [vmem:[#allocation2 + $0x3a0] sm:$0xff]  ;;  %v530_v58 = vld [vmem:[#allocation2 + $0x2b0] sm:$0xff]  ;;  %v3183_v7 = vpack.i.bf16 %v1210_v60, %v3177_v59 }
  0x48   : > { %449 = vmatpush.msra.mxu1 %v375_v9  ;;  %474 = vmatpush.msra.mxu2 %v337_v10  ;;  %v625_v57 = vld [vmem:[#allocation2 + $0x3a8] sm:$0xff]  ;;  %v531_v61 = vld [vmem:[#allocation2 + $0x2b8] sm:$0xff]  ;;  %v622_v62 = vld [vmem:[#allocation2 + $0x390] sm:$0xff] }
  0x49   : > { %497 = vmatpush.msra.mxu3 %v338_v12  ;;  %427 = vmatpush.msra.mxu0 %v372_v13  ;;  %v623_v63 = vld [vmem:[#allocation2 + $0x398] sm:$0xff]  ;;  %v528_v2 = vld [vmem:[#allocation2 + $0x2a0] sm:$0xff]  ;;  %v529_v5 = vld [vmem:[#allocation2 + $0x2a8] sm:$0xff] }
  0x4a   : > { %450 = vmatpush.msra.mxu1 %v373_v15  ;;  %475 = vmatpush.msra.mxu2 %v335_v16  ;;  %v620_v6 = vld [vmem:[#allocation2 + $0x380] sm:$0xff]  ;;  %v621_v8 = vld [vmem:[#allocation2 + $0x388] sm:$0xff]  ;;  %v526_v9 = vld [vmem:[#allocation2 + $0x290] sm:$0xff] }
  0x4b   : > { %498 = vmatpush.msra.mxu3 %v336_v17  ;;  %428 = vmatpush.msra.mxu0 %v370_v18  ;;  %v527_v10 = vld [vmem:[#allocation2 + $0x298] sm:$0xff]  ;;  %v618_v12 = vld [vmem:[#allocation2 + $0x370] sm:$0xff]  ;;  %v525_v15 = vld [vmem:[#allocation2 + $0x288] sm:$0xff] }
  0x4c   : > { %2634 = vrot.lane.b32.xlu0 %v3146_v42, %s2965_s13  ;;  %2639 = vrot.lane.b32.xlu1 %v3149_v43, %s2964_s11  ;;  %v619_v13 = vld [vmem:[#allocation2 + $0x378] sm:$0xff]  ;;  %v616_v16 = vld [vmem:[#allocation2 + $0x360] sm:$0xff]  ;;  %v617_v17 = vld [vmem:[#allocation2 + $0x368] sm:$0xff] }
  0x4d   : > { %451 = vmatpush.msra.mxu1 %v371_v19  ;;  %476 = vmatpush.msra.mxu2 %v333_v20  ;;  %v522_v18 = vld [vmem:[#allocation2 + $0x270] sm:$0xff]  ;;  %v523_v19 = vld [vmem:[#allocation2 + $0x278] sm:$0xff]  ;;  %v521_v23 = vld [vmem:[#allocation2 + $0x268] sm:$0xff] }
  0x4e   : > { %499 = vmatpush.msra.mxu3 %v334_v21  ;;  %2629 = vrot.lane.b32.xlu2 %v3146_v42, %s2964_s11  ;;  %v536_v42 = vld [vmem:[#allocation2 + $0x2e0] sm:$0xff]  ;;  %v614_v20 = vld [vmem:[#allocation2 + $0x350] sm:$0xff]  ;;  %v615_v21 = vld [vmem:[#allocation2 + $0x358] sm:$0xff] }
  0x4f   : > { %649 = vmatpush.msrb.mxu2 %v634_v22  ;;  %429 = vmatpush.msra.mxu0 %v368_v28  ;;  %v520_v22 = vld [vmem:[#allocation2 + $0x260] sm:$0xff]  ;;  %v613_v25 = vld [vmem:[#allocation2 + $0x348] sm:$0xff]  ;;  %v518_v26 = vld [vmem:[#allocation2 + $0x250] sm:$0xff] }
  0x50   : > { %672 = vmatpush.msrb.mxu3 %v635_v27  ;;  %452 = vmatpush.msra.mxu1 %v369_v29  ;;  %v612_v24 = vld [vmem:[#allocation2 + $0x340] sm:$0xff]  ;;  %v519_v27 = vld [vmem:[#allocation2 + $0x258] sm:$0xff]  ;;  %v610_v28 = vld [vmem:[#allocation2 + $0x330] sm:$0xff] }
  0x51   : > { %650 = vmatpush.msrb.mxu2 %v632_v31  ;;  %430 = vmatpush.msra.mxu0 %v366_v33  ;;  %v611_v29 = vld [vmem:[#allocation2 + $0x338] sm:$0xff]  ;;  %v516_v31 = vld [vmem:[#allocation2 + $0x240] sm:$0xff]  ;;  %v814_v60 = vld [vmem:[#allocation2 + $0x5b0] sm:$0xff] }
  0x52   : > { %673 = vmatpush.msrb.mxu3 %v633_v32  ;;  %453 = vmatpush.msra.mxu1 %v367_v35  ;;  %v517_v32 = vld [vmem:[#allocation2 + $0x248] sm:$0xff]  ;;  %v608_v33 = vld [vmem:[#allocation2 + $0x320] sm:$0xff]  ;;  %v515_v38 = vld [vmem:[#allocation2 + $0x238] sm:$0xff] }
  0x53   : > { %553 = vmatpush.msrb.mxu0 %v538_v36  ;;  %651 = vmatpush.msrb.mxu2 %v630_v40  ;;  %v609_v35 = vld [vmem:[#allocation2 + $0x328] sm:$0xff]  ;;  %v514_v36 = vld [vmem:[#allocation2 + $0x230] sm:$0xff]  ;;  %v607_v40 = vld [vmem:[#allocation2 + $0x318] sm:$0xff] }
  0x54   : > { %576 = vmatpush.msrb.mxu1 %v539_v39  ;;  %674 = vmatpush.msrb.mxu3 %v631_v41  ;;  %v606_v39 = vld [vmem:[#allocation2 + $0x310] sm:$0xff]  ;;  %v512_v41 = vld [vmem:[#allocation2 + $0x220] sm:$0xff]  ;;  %v511_v50 = vld [vmem:[#allocation2 + $0x218] sm:$0xff] }
  0x55   : > { %554 = vmatpush.msrb.mxu0 %v536_v42  ;;  %652 = vmatpush.msrb.mxu2 %v628_v45  ;;  %v513_v42 = vld [vmem:[#allocation2 + $0x228] sm:$0xff]  ;;  %v820_v51 = vld [vmem:[#allocation2 + $0x5e0] sm:$0xff] }
  0x56   : > { %577 = vmatpush.msrb.mxu1 %v537_v44  ;;  %675 = vmatpush.msrb.mxu3 %v629_v47  ;;  %v604_v44 = vld [vmem:[#allocation2 + $0x300] sm:$0xff]  ;;  %v605_v45 = vld [vmem:[#allocation2 + $0x308] sm:$0xff]  ;;  %v822_v47 = vld [vmem:[#allocation2 + $0x5f0] sm:$0xff] }
  0x57   : > { %2649 = vrot.lane.b32.xlu0 %v3170_v46, %s2963_s10  ;;  %555 = vmatpush.msrb.mxu0 %v534_v48  ;;  %v823_v48 = vld [vmem:[#allocation2 + $0x5f8] sm:$0xff] }
  0x58   : > { %578 = vmatpush.msrb.mxu1 %v535_v49  ;;  %653 = vmatpush.msrb.mxu2 %v626_v52  ;;  %v510_v49 = vld [vmem:[#allocation2 + $0x210] sm:$0xff]  ;;  %v821_v52 = vld [vmem:[#allocation2 + $0x5e8] sm:$0xff] }
  0x59   : > { %676 = vmatpush.msrb.mxu3 %v627_v53  ;;  %556 = vmatpush.msrb.mxu0 %v532_v54  ;;  %v508_v53 = vld [vmem:[#allocation2 + $0x200] sm:$0xff]  ;;  %v509_v54 = vld [vmem:[#allocation2 + $0x208] sm:$0xff] }
  0x5a   : > { %579 = vmatpush.msrb.mxu1 %v533_v55  ;;  %654 = vmatpush.msrb.mxu2 %v624_v56  ;;  %v818_v55 = vld [vmem:[#allocation2 + $0x5d0] sm:$0xff]  ;;  %v819_v56 = vld [vmem:[#allocation2 + $0x5d8] sm:$0xff] }
  0x5b   : > { %677 = vmatpush.msrb.mxu3 %v625_v57  ;;  %2644 = vrot.lane.b32.xlu2 %v3149_v43, %s2965_s13  ;;  %v524_v43 = vld [vmem:[#allocation2 + $0x280] sm:$0xff] }
  0x5c   : > { %557 = vmatpush.msrb.mxu0 %v530_v58  ;;  %580 = vmatpush.msrb.mxu1 %v531_v61  ;;  %v816_v57 = vld [vmem:[#allocation2 + $0x5c0] sm:$0xff]  ;;  %v817_v58 = vld [vmem:[#allocation2 + $0x5c8] sm:$0xff]  ;;  %v815_v61 = vld [vmem:[#allocation2 + $0x5b8] sm:$0xff] }
  0x5d   : > { %655 = vmatpush.msrb.mxu2 %v622_v62  ;;  %678 = vmatpush.msrb.mxu3 %v623_v63  ;;  %v812_v62 = vld [vmem:[#allocation2 + $0x5a0] sm:$0xff]  ;;  %v813_v63 = vld [vmem:[#allocation2 + $0x5a8] sm:$0xff] }
  0x5e   : > { %558 = vmatpush.msrb.mxu0 %v528_v2  ;;  %581 = vmatpush.msrb.mxu1 %v529_v5  ;;  %v810_v2 = vld [vmem:[#allocation2 + $0x590] sm:$0xff]  ;;  %v811_v5 = vld [vmem:[#allocation2 + $0x598] sm:$0xff] }
  0x5f   : > { %656 = vmatpush.msrb.mxu2 %v620_v6  ;;  %679 = vmatpush.msrb.mxu3 %v621_v8  ;;  %v808_v6 = vld [vmem:[#allocation2 + $0x580] sm:$0xff]  ;;  %v809_v8 = vld [vmem:[#allocation2 + $0x588] sm:$0xff] }
  0x60   : > { %2654 = vrot.lane.b32.xlu1 %v3183_v7, %s2963_s10  ;;  %559 = vmatpush.msrb.mxu0 %v526_v9  ;;  %v806_v9 = vld [vmem:[#allocation2 + $0x570] sm:$0xff] }
  0x61   : > { %582 = vmatpush.msrb.mxu1 %v527_v10  ;;  %657 = vmatpush.msrb.mxu2 %v618_v12  ;;  %v807_v10 = vld [vmem:[#allocation2 + $0x578] sm:$0xff]  ;;  %v804_v12 = vld [vmem:[#allocation2 + $0x560] sm:$0xff] }
  0x62   : > { %680 = vmatpush.msrb.mxu3 %v619_v13  ;;  %560 = vmatpush.msrb.mxu0 %v524_v43  ;;  %v805_v13 = vld [vmem:[#allocation2 + $0x568] sm:$0xff]  ;;  %v802_v43 = vld [vmem:[#allocation2 + $0x550] sm:$0xff] }
  0x63   : > { %583 = vmatpush.msrb.mxu1 %v525_v15  ;;  %658 = vmatpush.msrb.mxu2 %v616_v16  ;;  %v803_v15 = vld [vmem:[#allocation2 + $0x558] sm:$0xff]  ;;  %v800_v16 = vld [vmem:[#allocation2 + $0x540] sm:$0xff] }
  0x64   : > { %681 = vmatpush.msrb.mxu3 %v617_v17  ;;  %561 = vmatpush.msrb.mxu0 %v522_v18  ;;  %v801_v17 = vld [vmem:[#allocation2 + $0x548] sm:$0xff]  ;;  %v798_v18 = vld [vmem:[#allocation2 + $0x530] sm:$0xff] }
  0x65   : > { %584 = vmatpush.msrb.mxu1 %v523_v19  ;;  %659 = vmatpush.msrb.mxu2 %v614_v20  ;;  %v799_v19 = vld [vmem:[#allocation2 + $0x538] sm:$0xff]  ;;  %v796_v20 = vld [vmem:[#allocation2 + $0x520] sm:$0xff] }
  0x66   : > { %682 = vmatpush.msrb.mxu3 %v615_v21  ;;  %562 = vmatpush.msrb.mxu0 %v520_v22  ;;  %v797_v21 = vld [vmem:[#allocation2 + $0x528] sm:$0xff]  ;;  %v794_v22 = vld [vmem:[#allocation2 + $0x510] sm:$0xff] }
  0x67   : > { %585 = vmatpush.msrb.mxu1 %v521_v23  ;;  %660 = vmatpush.msrb.mxu2 %v612_v24  ;;  %v795_v23 = vld [vmem:[#allocation2 + $0x518] sm:$0xff]  ;;  %v792_v24 = vld [vmem:[#allocation2 + $0x500] sm:$0xff] }
  0x68   : > { %683 = vmatpush.msrb.mxu3 %v613_v25  ;;  %563 = vmatpush.msrb.mxu0 %v518_v26  ;;  %v793_v25 = vld [vmem:[#allocation2 + $0x508] sm:$0xff] }
  0x69   : > { %586 = vmatpush.msrb.mxu1 %v519_v27  ;;  %661 = vmatpush.msrb.mxu2 %v610_v28 }
  0x6a   : > { %684 = vmatpush.msrb.mxu3 %v611_v29  ;;  %564 = vmatpush.msrb.mxu0 %v516_v31 }
  0x6b   : > { %587 = vmatpush.msrb.mxu1 %v517_v32  ;;  %662 = vmatpush.msrb.mxu2 %v608_v33  ;;  %v730_v33 = vld [vmem:[#allocation2 + $0x4f0] sm:$0xff] }
  0x6c   : > { %685 = vmatpush.msrb.mxu3 %v609_v35  ;;  %565 = vmatpush.msrb.mxu0 %v514_v36  ;;  %v731_v35 = vld [vmem:[#allocation2 + $0x4f8] sm:$0xff] }
  0x6d   : > { %588 = vmatpush.msrb.mxu1 %v515_v38  ;;  %663 = vmatpush.msrb.mxu2 %v606_v39  ;;  %v728_v39 = vld [vmem:[#allocation2 + $0x4e0] sm:$0xff] }
  0x6e   : > { %686 = vmatpush.msrb.mxu3 %v607_v40  ;;  %477 = vmatmul.f32.vlgmr.msra.gmra.mxu2 %v3109_v0 }
  0x6f   : > { %500 = vmatmul.f32.vlgmr.msra.gmra.mxu3 %v3109_v0  ;;  %566 = vmatpush.msrb.mxu0 %v512_v41  ;;  %v1018_v41 = vld [vmem:[#allocation2 + $0x7f0] sm:$0xff] }
  0x70   : > { %589 = vmatpush.msrb.mxu1 %v513_v42  ;;  %664 = vmatpush.msrb.mxu2 %v604_v44  ;;  %v1019_v42 = vld [vmem:[#allocation2 + $0x7f8] sm:$0xff]  ;;  %v726_v44 = vld [vmem:[#allocation2 + $0x4d0] sm:$0xff] }
  0x71   : > { %687 = vmatpush.msrb.mxu3 %v605_v45  ;;  %567 = vmatpush.msrb.mxu0 %v510_v49  ;;  %v727_v45 = vld [vmem:[#allocation2 + $0x4d8] sm:$0xff]  ;;  %v1016_v49 = vld [vmem:[#allocation2 + $0x7e0] sm:$0xff] }
  0x72   : > { %842 = vmatpush.msra.mxu2 %v822_v47  ;;  %590 = vmatpush.msrb.mxu1 %v511_v50  ;;  %v1017_v50 = vld [vmem:[#allocation2 + $0x7e8] sm:$0xff] }
  0x73   : > { %865 = vmatpush.msra.mxu3 %v823_v48  ;;  %568 = vmatpush.msrb.mxu0 %v508_v53  ;;  %v1587_v53 = vrot.slane %v3111_v1, 3 }
  0x74   : > { %843 = vmatpush.msra.mxu2 %v820_v51  ;;  %591 = vmatpush.msrb.mxu1 %v509_v54  ;;  %v1497_v51 = vrot.slane %v3109_v0, 3  ;;  %v1588_v54 = vrot.slane %v3117_v4, 3  ;;  %v919_v4 = vld [vmem:[#allocation2 + $0x6d0] sm:$0xff] }
  0x75   : > { %866 = vmatpush.msra.mxu3 %v821_v52  ;;  %2664 = vrot.lane.b32.xlu0 %v3170_v46, %s2965_s13  ;;  %v1498_v52 = vrot.slane %v3115_v3, 3 }
  0x76   : > { %480 = vmatmul.f32.gmra.mxu2 %v3115_v3  ;;  %2669 = vrot.lane.b32.xlu1 %v3183_v7, %s2964_s11 }
  0x77   : > { %503 = vmatmul.f32.gmra.mxu3 %v3115_v3  ;;  %844 = vmatpush.msra.mxu2 %v818_v55  ;;  %v1004_v3 = vld [vmem:[#allocation2 + $0x780] sm:$0xff] }
  0x78   : > { %867 = vmatpush.msra.mxu3 %v819_v56  ;;  %2659 = vrot.lane.b32.xlu2 %v3170_v46, %s2964_s11  ;;  %v729_v46 = vld [vmem:[#allocation2 + $0x4e8] sm:$0xff]  ;;  %v724_v56 = vld [vmem:[#allocation2 + $0x4c0] sm:$0xff] }
  0x79   : > { %845 = vmatpush.msra.mxu2 %v816_v57  ;;  %v725_v57 = vld [vmem:[#allocation2 + $0x4c8] sm:$0xff] }
  0x7a   : > { %868 = vmatpush.msra.mxu3 %v817_v58 }
  0x7b   : > { %846 = vmatpush.msra.mxu2 %v814_v60 }
  0x7c   : > { %869 = vmatpush.msra.mxu3 %v815_v61  ;;  %v722_v61 = vld [vmem:[#allocation2 + $0x4b0] sm:$0xff] }
  0x7d   : > { %847 = vmatpush.msra.mxu2 %v812_v62  ;;  %v723_v62 = vld [vmem:[#allocation2 + $0x4b8] sm:$0xff] }
  0x7e   : > { %870 = vmatpush.msra.mxu3 %v813_v63 }
  0x7f   : > { %848 = vmatpush.msra.mxu2 %v810_v2  ;;  %v3208_v2 = vsel %vm1496_vm4, %v1497_v51, %v1498_v52  ;;  %v704_v51 = vld [vmem:[#allocation2 + $0x420] sm:$0xff] }
  0x80   : > { %871 = vmatpush.msra.mxu3 %v811_v5  ;;  %v1589_v5 = vsel %vm1496_vm4, %v1587_v53, %v1588_v54  ;;  %v705_v53 = vld [vmem:[#allocation2 + $0x428] sm:$0xff]  ;;  %2674 = vrot.lane.b32.xlu2 %v3183_v7, %s2965_s13 }
  0x81   : > { %849 = vmatpush.msra.mxu2 %v808_v6  ;;  %v720_v6 = vld [vmem:[#allocation2 + $0x4a0] sm:$0xff] }
  0x82   : > { %872 = vmatpush.msra.mxu3 %v809_v8  ;;  %v721_v8 = vld [vmem:[#allocation2 + $0x4a8] sm:$0xff] }
  0x83   : > { %850 = vmatpush.msra.mxu2 %v806_v9 }
  0x84   : > { %873 = vmatpush.msra.mxu3 %v807_v10 }
  0x85   : > { %851 = vmatpush.msra.mxu2 %v804_v12  ;;  %v1014_v12 = vld [vmem:[#allocation2 + $0x7d0] sm:$0xff] }
  0x86   : > { %874 = vmatpush.msra.mxu3 %v805_v13  ;;  %v1015_v13 = vld [vmem:[#allocation2 + $0x7d8] sm:$0xff] }
  0x87   : > { %852 = vmatpush.msra.mxu2 %v802_v43  ;;  %v718_v43 = vld [vmem:[#allocation2 + $0x490] sm:$0xff] }
  0x88   : > { %875 = vmatpush.msra.mxu3 %v803_v15  ;;  %v719_v15 = vld [vmem:[#allocation2 + $0x498] sm:$0xff] }
  0x89   : > { %853 = vmatpush.msra.mxu2 %v800_v16  ;;  %v3214_v16 = vpack.i.bf16 %v1589_v5, %v3208_v2  ;;  %v924_v5 = vld [vmem:[#allocation2 + $0x6f8] sm:$0xff] }
  0x8a   : > { %876 = vmatpush.msra.mxu3 %v801_v17  ;;  %v1012_v17 = vld [vmem:[#allocation2 + $0x7c0] sm:$0xff] }
  0x8b   : > { %854 = vmatpush.msra.mxu2 %v798_v18  ;;  %v716_v18 = vld [vmem:[#allocation2 + $0x480] sm:$0xff]  ;;  %2679 = vrot.lane.b32.xlu0 %v3214_v16, %s2963_s10 }
  0x8c   : > { %877 = vmatpush.msra.mxu3 %v799_v19  ;;  %v717_v19 = vld [vmem:[#allocation2 + $0x488] sm:$0xff]  ;;  %2689 = vrot.lane.b32.xlu2 %v3214_v16, %s2964_s11 }
  0x8d   : > { %855 = vmatpush.msra.mxu2 %v796_v20 }
  0x8e   : > { %878 = vmatpush.msra.mxu3 %v797_v21 }
  0x8f   : > { %856 = vmatpush.msra.mxu2 %v794_v22  ;;  %v2610_v40 = vpop.permute.xlu2 %2609 }
  0x90   : > { %879 = vmatpush.msra.mxu3 %v795_v23  ;;  %v2612_v47 = vunpack.i.h.bf16 %v2610_v40  ;;  %v2611_v48 = vunpack.i.l.bf16 %v2610_v40 }
  0x91   : > { %857 = vmatpush.msra.mxu2 %v792_v24  ;;  %v714_v24 = vld [vmem:[#allocation2 + $0x470] sm:$0xff] }
  0x92   : > { %880 = vmatpush.msra.mxu3 %v793_v25  ;;  %v646_v0 = vsel %vm644_vm3, %v2611_v48, %v2612_v47  ;;  %v715_v25 = vld [vmem:[#allocation2 + $0x478] sm:$0xff]  ;;  %v706_v48 = vld [vmem:[#allocation2 + $0x430] sm:$0xff] }
  0x93   : > { %2694 = vrot.lane.b32.xlu0 %v3214_v16, %s2965_s13 }
  0xa6   : > { %v2590_v26 = vpop.permute.xlu0 %2589  ;;  %v2600_v27 = vpop.permute.xlu1 %2599 }
  0xa7   : > { %v2592_v28 = vunpack.i.h.bf16 %v2590_v26  ;;  %v2591_v29 = vunpack.i.l.bf16 %v2590_v26  ;;  %v2602_v31 = vunpack.i.h.bf16 %v2600_v27  ;;  %v2601_v32 = vunpack.i.l.bf16 %v2600_v27  ;;  %v2615_v26 = vpop.permute.xlu2 %2614 }
  0xa9   : > { %v411_v36 = vsel %vm410_vm2, %v2591_v29, %v2592_v28  ;;  %v645_v38 = vsel %vm644_vm3, %v2601_v32, %v2602_v31  ;;  %v712_v28 = vld [vmem:[#allocation2 + $0x460] sm:$0xff]  ;;  %v713_v29 = vld [vmem:[#allocation2 + $0x468] sm:$0xff]  ;;  %v2617_v32 = vunpack.i.h.bf16 %v2615_v26 }
  0xaa   : > { %431 = vmatmul.f32.vlgmr.msra.gmra.mxu0 %v411_v36  ;;  %454 = vmatmul.f32.vlgmr.msra.gmra.mxu1 %v411_v36  ;;  %v1010_v36 = vld [vmem:[#allocation2 + $0x7b0] sm:$0xff] }
  0xab   : > { %741 = vmatpush.msra.mxu0 %v730_v33  ;;  %764 = vmatpush.msra.mxu1 %v731_v35  ;;  %v2616_v33 = vunpack.i.l.bf16 %v2615_v26  ;;  %v1013_v35 = vld [vmem:[#allocation2 + $0x7c8] sm:$0xff] }
  0xac   : > { %665 = vmatmul.f32.vlgmr.msrb.gmra.mxu2 %v645_v38  ;;  %688 = vmatmul.f32.vlgmr.msrb.gmra.mxu3 %v645_v38  ;;  %v710_v38 = vld [vmem:[#allocation2 + $0x450] sm:$0xff]  ;;  %v910_v26 = vld [vmem:[#allocation2 + $0x688] sm:$0xff] }
  0xad   : > { %742 = vmatpush.msra.mxu0 %v728_v39  ;;  %765 = vmatpush.msra.mxu1 %v729_v46  ;;  %v711_v39 = vld [vmem:[#allocation2 + $0x458] sm:$0xff]  ;;  %v550_v47 = vsel %vm548_vm5, %v2616_v33, %v2617_v32  ;;  %v992_v33 = vld [vmem:[#allocation2 + $0x720] sm:$0xff] }
  0xae   : > { %v2595_v55 = vpop.permute.xlu0 %2594  ;;  %1032 = vmatpush.msrb.mxu2 %v1018_v41  ;;  %1055 = vmatpush.msrb.mxu3 %v1019_v42  ;;  %v2605_v63 = vpop.permute.xlu1 %2604  ;;  %v1011_v41 = vld [vmem:[#allocation2 + $0x7b8] sm:$0xff]  ;;  %v1008_v42 = vld [vmem:[#allocation2 + $0x7a0] sm:$0xff] }
  0xaf   : > { %v2597_v58 = vunpack.i.h.bf16 %v2595_v55  ;;  %v2596_v60 = vunpack.i.l.bf16 %v2595_v55  ;;  %743 = vmatpush.msra.mxu0 %v726_v44  ;;  %766 = vmatpush.msra.mxu1 %v727_v45  ;;  %v2607_v9 = vunpack.i.h.bf16 %v2605_v63  ;;  %v2606_v10 = vunpack.i.l.bf16 %v2605_v63  ;;  %v708_v44 = vld [vmem:[#allocation2 + $0x440] sm:$0xff]  ;;  %v709_v45 = vld [vmem:[#allocation2 + $0x448] sm:$0xff]  ;;  %v2630_v32 = vpop.permute.xlu2 %2629 }
  0xb0   : > { %1033 = vmatpush.msrb.mxu2 %v1016_v49  ;;  %1056 = vmatpush.msrb.mxu3 %v1017_v50  ;;  %v707_v49 = vld [vmem:[#allocation2 + $0x438] sm:$0xff]  ;;  %v1500_v55 = vrot.slane %v3123_v11, 3  ;;  %v700_v63 = vld [vmem:[#allocation2 + $0x400] sm:$0xff] }
  0xb1   : > { %744 = vmatpush.msra.mxu0 %v724_v56  ;;  %767 = vmatpush.msra.mxu1 %v725_v57  ;;  %v412_v1 = vsel %vm410_vm2, %v2596_v60, %v2597_v58  ;;  %v549_v21 = vsel %vm548_vm5, %v2606_v10, %v2607_v9  ;;  %v1590_v56 = vrot.slane %v3125_v14, 3  ;;  %v1009_v57 = vld [vmem:[#allocation2 + $0x7a8] sm:$0xff]  ;;  %v702_v58 = vld [vmem:[#allocation2 + $0x410] sm:$0xff]  ;;  %v703_v60 = vld [vmem:[#allocation2 + $0x418] sm:$0xff] }
  0xb2   : > { %434 = vmatmul.f32.gmra.mxu0 %v412_v1  ;;  %457 = vmatmul.f32.gmra.mxu1 %v412_v1  ;;  %v3229_v11 = vsel %vm1496_vm4, %v1498_v52, %v1500_v55  ;;  %v923_v1 = vld [vmem:[#allocation2 + $0x6f0] sm:$0xff]  ;;  %v920_v52 = vld [vmem:[#allocation2 + $0x6d8] sm:$0xff]  ;;  %v917_v10 = vld [vmem:[#allocation2 + $0x6c0] sm:$0xff] }
  0xb3   : > { %745 = vmatpush.msra.mxu0 %v722_v61  ;;  %768 = vmatpush.msra.mxu1 %v723_v62  ;;  %v1006_v61 = vld [vmem:[#allocation2 + $0x790] sm:$0xff]  ;;  %v1007_v62 = vld [vmem:[#allocation2 + $0x798] sm:$0xff]  ;;  %v1591_v14 = vsel %vm1496_vm4, %v1588_v54, %v1590_v56  ;;  %v1005_v54 = vld [vmem:[#allocation2 + $0x788] sm:$0xff] }
  0xb4   : > { %668 = vmatmul.f32.gmra.mxu2 %v646_v0  ;;  %691 = vmatmul.f32.gmra.mxu3 %v646_v0  ;;  %v701_v0 = vld [vmem:[#allocation2 + $0x408] sm:$0xff]  ;;  %v3235_v7 = vpack.i.bf16 %v1591_v14, %v3229_v11  ;;  %v1002_v9 = vld [vmem:[#allocation2 + $0x770] sm:$0xff]  ;;  %v896_v14 = vld [vmem:[#allocation2 + $0x618] sm:$0xff] }
  0xb5   : > { %746 = vmatpush.msra.mxu0 %v720_v6  ;;  %769 = vmatpush.msra.mxu1 %v721_v8  ;;  %v921_v6 = vld [vmem:[#allocation2 + $0x6e0] sm:$0xff]  ;;  %v922_v8 = vld [vmem:[#allocation2 + $0x6e8] sm:$0xff]  ;;  %v1204_v56 = vld [vmem:[#allocation2 + $0x9f0] sm:$0xff] }
  0xb6   : > { %v2620_v20 = vpop.permute.xlu0 %2619  ;;  %1034 = vmatpush.msrb.mxu2 %v1014_v12  ;;  %1057 = vmatpush.msrb.mxu3 %v1015_v13  ;;  %v2625_v31 = vpop.permute.xlu1 %2624  ;;  %v918_v12 = vld [vmem:[#allocation2 + $0x6c8] sm:$0xff]  ;;  %v1003_v13 = vld [vmem:[#allocation2 + $0x778] sm:$0xff] }
  0xb7   : > { %747 = vmatpush.msra.mxu0 %v718_v43  ;;  %770 = vmatpush.msra.mxu1 %v719_v15  ;;  %v2622_v22 = vunpack.i.h.bf16 %v2620_v20  ;;  %v2621_v23 = vunpack.i.l.bf16 %v2620_v20  ;;  %v2627_v46 = vunpack.i.h.bf16 %v2625_v31  ;;  %v2626_v40 = vunpack.i.l.bf16 %v2625_v31  ;;  %v1000_v43 = vld [vmem:[#allocation2 + $0x760] sm:$0xff]  ;;  %v915_v15 = vld [vmem:[#allocation2 + $0x6b0] sm:$0xff]  ;;  %v908_v31 = vld [vmem:[#allocation2 + $0x678] sm:$0xff] }
  0xb8   : > { %1035 = vmatpush.msrb.mxu2 %v1012_v17  ;;  %1058 = vmatpush.msrb.mxu3 %v1013_v35  ;;  %v916_v17 = vld [vmem:[#allocation2 + $0x6b8] sm:$0xff]  ;;  %v998_v20 = vld [vmem:[#allocation2 + $0x750] sm:$0xff]  ;;  %v905_v35 = vld [vmem:[#allocation2 + $0x660] sm:$0xff] }
  0xb9   : > { %748 = vmatpush.msra.mxu0 %v716_v18  ;;  %771 = vmatpush.msra.mxu1 %v717_v19  ;;  %v838_v27 = vsel %vm410_vm2, %v2621_v23, %v2622_v22  ;;  %v839_v50 = vsel %vm410_vm2, %v2626_v40, %v2627_v46  ;;  %v914_v18 = vld [vmem:[#allocation2 + $0x6a8] sm:$0xff]  ;;  %v912_v22 = vld [vmem:[#allocation2 + $0x698] sm:$0xff]  ;;  %v2631_v46 = vunpack.i.l.bf16 %v2630_v32  ;;  %v990_v40 = vld [vmem:[#allocation2 + $0x710] sm:$0xff] }
  0xba   : > { %569 = vmatmul.f32.vlgmr.msrb.gmra.mxu0 %v549_v21  ;;  %592 = vmatmul.f32.vlgmr.msrb.gmra.mxu1 %v549_v21  ;;  %v1001_v19 = vld [vmem:[#allocation2 + $0x768] sm:$0xff]  ;;  %v911_v21 = vld [vmem:[#allocation2 + $0x690] sm:$0xff]  ;;  %v999_v23 = vld [vmem:[#allocation2 + $0x758] sm:$0xff] }
  0xbb   : > { %749 = vmatpush.msra.mxu0 %v714_v24  ;;  %772 = vmatpush.msra.mxu1 %v715_v25  ;;  %v996_v24 = vld [vmem:[#allocation2 + $0x740] sm:$0xff] }
  0xbc   : > { %858 = vmatmul.f32.vlgmr.msra.gmra.mxu2 %v838_v27  ;;  %881 = vmatmul.f32.vlgmr.msra.gmra.mxu3 %v838_v27  ;;  %v909_v25 = vld [vmem:[#allocation2 + $0x680] sm:$0xff]  ;;  %v997_v27 = vld [vmem:[#allocation2 + $0x748] sm:$0xff] }
  0xbd   : > { %750 = vmatpush.msra.mxu0 %v712_v28  ;;  %773 = vmatpush.msra.mxu1 %v713_v29  ;;  %v994_v28 = vld [vmem:[#allocation2 + $0x730] sm:$0xff] }
  0xbe   : > { %1036 = vmatpush.msrb.mxu2 %v1010_v36  ;;  %1059 = vmatpush.msrb.mxu3 %v1011_v41  ;;  %v907_v29 = vld [vmem:[#allocation2 + $0x670] sm:$0xff]  ;;  %v906_v36 = vld [vmem:[#allocation2 + $0x668] sm:$0xff]  ;;  %v2635_v55 = vpop.permute.xlu0 %2634 }
  0xbf   : > { %751 = vmatpush.msra.mxu0 %v710_v38  ;;  %774 = vmatpush.msra.mxu1 %v711_v39  ;;  %v993_v38 = vld [vmem:[#allocation2 + $0x728] sm:$0xff]  ;;  %v2632_v39 = vunpack.i.h.bf16 %v2630_v32  ;;  %v903_v41 = vld [vmem:[#allocation2 + $0x650] sm:$0xff]  ;;  %v1106_v32 = vld [vmem:[#allocation2 + $0x8b8] sm:$0xff] }
  0xc0   : > { %1037 = vmatpush.msrb.mxu2 %v1008_v42  ;;  %1060 = vmatpush.msrb.mxu3 %v1009_v57  ;;  %v904_v42 = vld [vmem:[#allocation2 + $0x658] sm:$0xff]  ;;  %v897_v57 = vld [vmem:[#allocation2 + $0x620] sm:$0xff] }
  0xc1   : > { %752 = vmatpush.msra.mxu0 %v708_v44  ;;  %775 = vmatpush.msra.mxu1 %v709_v45  ;;  %v991_v44 = vld [vmem:[#allocation2 + $0x718] sm:$0xff]  ;;  %v988_v45 = vld [vmem:[#allocation2 + $0x700] sm:$0xff] }
  0xc2   : > { %572 = vmatmul.f32.gmra.mxu0 %v550_v47  ;;  %595 = vmatmul.f32.gmra.mxu1 %v550_v47  ;;  %v901_v47 = vld [vmem:[#allocation2 + $0x640] sm:$0xff] }
  0xc3   : > { %753 = vmatpush.msra.mxu0 %v706_v48  ;;  %776 = vmatpush.msra.mxu1 %v707_v49  ;;  %v902_v48 = vld [vmem:[#allocation2 + $0x648] sm:$0xff] }
  0xc4   : > { %861 = vmatmul.f32.gmra.mxu2 %v839_v50  ;;  %884 = vmatmul.f32.gmra.mxu3 %v839_v50  ;;  %v989_v49 = vld [vmem:[#allocation2 + $0x708] sm:$0xff]  ;;  %v1028_v50 = vsel %vm644_vm3, %v2631_v46, %v2632_v39  ;;  %v1101_v46 = vld [vmem:[#allocation2 + $0x890] sm:$0xff] }
  0xc5   : > { %754 = vmatpush.msra.mxu0 %v704_v51  ;;  %777 = vmatpush.msra.mxu1 %v705_v53  ;;  %v899_v51 = vld [vmem:[#allocation2 + $0x630] sm:$0xff]  ;;  %v900_v53 = vld [vmem:[#allocation2 + $0x638] sm:$0xff]  ;;  %v1191_v39 = vld [vmem:[#allocation2 + $0x988] sm:$0xff] }
  0xc6   : > { %1038 = vmatpush.msrb.mxu2 %v1006_v61  ;;  %1061 = vmatpush.msrb.mxu3 %v1007_v62  ;;  %v2636_v61 = vunpack.i.l.bf16 %v2635_v55  ;;  %v1205_v62 = vld [vmem:[#allocation2 + $0x9f8] sm:$0xff] }
  0xc7   : > { %755 = vmatpush.msra.mxu0 %v702_v58  ;;  %778 = vmatpush.msra.mxu1 %v703_v60  ;;  %v898_v58 = vld [vmem:[#allocation2 + $0x628] sm:$0xff]  ;;  %v2637_v60 = vunpack.i.h.bf16 %v2635_v55  ;;  %v1095_v55 = vld [vmem:[#allocation2 + $0x860] sm:$0xff] }
  0xc8   : > { %2684 = vrot.lane.b32.xlu1 %v3235_v7, %s2963_s10  ;;  %1039 = vmatpush.msrb.mxu2 %v1004_v3  ;;  %v894_v3 = vld [vmem:[#allocation2 + $0x608] sm:$0xff] }
  0xc9   : > { %756 = vmatpush.msra.mxu0 %v700_v63  ;;  %779 = vmatpush.msra.mxu1 %v701_v0  ;;  %v1202_v63 = vld [vmem:[#allocation2 + $0x9e0] sm:$0xff]  ;;  %v895_v0 = vld [vmem:[#allocation2 + $0x610] sm:$0xff] }
  0xca   : > { %757 = vmatmul.f32.vlgmr.msra.gmra.mxu0 %v3137_v30  ;;  %780 = vmatmul.f32.vlgmr.msra.gmra.mxu1 %v3137_v30  ;;  %v913_v30 = vld [vmem:[#allocation2 + $0x6a0] sm:$0xff] }
  0xcb   : > { %937 = vmatpush.msrb.mxu0 %v923_v1  ;;  %960 = vmatpush.msrb.mxu1 %v924_v5  ;;  %v2640_v1 = vpop.permute.xlu1 %2639  ;;  %v1203_v5 = vld [vmem:[#allocation2 + $0x9e8] sm:$0xff] }
  0xcc   : > { %1062 = vmatpush.msrb.mxu3 %v1005_v54  ;;  %1040 = vmatpush.msrb.mxu2 %v1002_v9  ;;  %v933_v54 = vsel %vm548_vm5, %v2636_v61, %v2637_v60  ;;  %v1113_v9 = vld [vmem:[#allocation2 + $0x8f0] sm:$0xff]  ;;  %v1094_v61 = vld [vmem:[#allocation2 + $0x858] sm:$0xff] }
  0xcd   : > { %938 = vmatpush.msrb.mxu0 %v921_v6  ;;  %961 = vmatpush.msrb.mxu1 %v922_v8  ;;  %v1200_v6 = vld [vmem:[#allocation2 + $0x9d0] sm:$0xff]  ;;  %v893_v8 = vld [vmem:[#allocation2 + $0x600] sm:$0xff] }
  0xce   : > { %1063 = vmatpush.msrb.mxu3 %v1003_v13  ;;  %1041 = vmatpush.msrb.mxu2 %v1000_v43  ;;  %v1198_v13 = vld [vmem:[#allocation2 + $0x9c0] sm:$0xff]  ;;  %v1093_v60 = vld [vmem:[#allocation2 + $0x850] sm:$0xff] }
  0xcf   : > { %939 = vmatpush.msrb.mxu0 %v919_v4  ;;  %962 = vmatpush.msrb.mxu1 %v920_v52  ;;  %v2642_v4 = vunpack.i.h.bf16 %v2640_v1  ;;  %v2641_v52 = vunpack.i.l.bf16 %v2640_v1  ;;  %v1111_v43 = vld [vmem:[#allocation2 + $0x8e0] sm:$0xff]  ;;  %v1092_v1 = vld [vmem:[#allocation2 + $0x848] sm:$0xff] }
  0xd0   : > { %1064 = vmatpush.msrb.mxu3 %v1001_v19  ;;  %1042 = vmatpush.msrb.mxu2 %v998_v20  ;;  %v1109_v19 = vld [vmem:[#allocation2 + $0x8d0] sm:$0xff] }
  0xd1   : > { %940 = vmatpush.msrb.mxu0 %v917_v10  ;;  %963 = vmatpush.msrb.mxu1 %v918_v12  ;;  %v1114_v10 = vld [vmem:[#allocation2 + $0x8f8] sm:$0xff] }
  0xd2   : > { %760 = vmatmul.f32.gmra.mxu0 %v3141_v34  ;;  %783 = vmatmul.f32.gmra.mxu1 %v3141_v34  ;;  %v995_v34 = vld [vmem:[#allocation2 + $0x738] sm:$0xff] }
  0xd3   : > { %941 = vmatpush.msrb.mxu0 %v915_v15  ;;  %964 = vmatpush.msrb.mxu1 %v916_v17  ;;  %v1201_v12 = vld [vmem:[#allocation2 + $0x9d8] sm:$0xff]  ;;  %v1112_v15 = vld [vmem:[#allocation2 + $0x8e8] sm:$0xff]  ;;  %v2645_v17 = vpop.permute.xlu2 %2644 }
  0xd4   : > { %1065 = vmatpush.msrb.mxu3 %v999_v23  ;;  %1043 = vmatpush.msrb.mxu2 %v996_v24  ;;  %v2647_v20 = vunpack.i.h.bf16 %v2645_v17  ;;  %v1196_v23 = vld [vmem:[#allocation2 + $0x9b0] sm:$0xff]  ;;  %v1197_v24 = vld [vmem:[#allocation2 + $0x9b8] sm:$0xff] }
  0xd5   : > { %942 = vmatpush.msrb.mxu0 %v913_v30  ;;  %965 = vmatpush.msrb.mxu1 %v914_v18  ;;  %v1199_v30 = vld [vmem:[#allocation2 + $0x9c8] sm:$0xff]  ;;  %v1029_v18 = vsel %vm644_vm3, %v2641_v52, %v2642_v4  ;;  %v1090_v52 = vld [vmem:[#allocation2 + $0x838] sm:$0xff] }
  0xd6   : > { %1066 = vmatpush.msrb.mxu3 %v997_v27  ;;  %1044 = vmatpush.msrb.mxu2 %v994_v28  ;;  %v1194_v27 = vld [vmem:[#allocation2 + $0x9a0] sm:$0xff]  ;;  %v1195_v28 = vld [vmem:[#allocation2 + $0x9a8] sm:$0xff] }
  0xd7   : > { %943 = vmatpush.msrb.mxu0 %v911_v21  ;;  %966 = vmatpush.msrb.mxu1 %v912_v22  ;;  %v2646_v21 = vunpack.i.l.bf16 %v2645_v17  ;;  %v1110_v22 = vld [vmem:[#allocation2 + $0x8d8] sm:$0xff]  ;;  %v1399_v17 = vld [vmem:[#allocation2 + $0xbf0] sm:$0xff] }
  0xd8   : > { %1067 = vmatpush.msrb.mxu3 %v995_v34  ;;  %1045 = vmatpush.msrb.mxu2 %v992_v33  ;;  %v1192_v34 = vld [vmem:[#allocation2 + $0x990] sm:$0xff]  ;;  %v1193_v33 = vld [vmem:[#allocation2 + $0x998] sm:$0xff] }
  0xd9   : > { %944 = vmatpush.msrb.mxu0 %v909_v25  ;;  %967 = vmatpush.msrb.mxu1 %v910_v26  ;;  %v1107_v25 = vld [vmem:[#allocation2 + $0x8c0] sm:$0xff]  ;;  %v1108_v26 = vld [vmem:[#allocation2 + $0x8c8] sm:$0xff] }
  0xda   : > { %1068 = vmatpush.msrb.mxu3 %v993_v38  ;;  %1046 = vmatpush.msrb.mxu2 %v990_v40  ;;  %v1190_v38 = vld [vmem:[#allocation2 + $0x980] sm:$0xff]  ;;  %v1102_v40 = vld [vmem:[#allocation2 + $0x898] sm:$0xff] }
  0xdb   : > { %945 = vmatpush.msrb.mxu0 %v907_v29  ;;  %968 = vmatpush.msrb.mxu1 %v908_v31  ;;  %v934_v29 = vsel %vm548_vm5, %v2646_v21, %v2647_v20  ;;  %v1105_v31 = vld [vmem:[#allocation2 + $0x8b0] sm:$0xff]  ;;  %v1397_v20 = vld [vmem:[#allocation2 + $0xbe0] sm:$0xff]  ;;  %v1398_v21 = vld [vmem:[#allocation2 + $0xbe8] sm:$0xff] }
  0xdc   : > { %1069 = vmatpush.msrb.mxu3 %v991_v44  ;;  %1047 = vmatpush.msrb.mxu2 %v988_v45  ;;  %v1099_v44 = vld [vmem:[#allocation2 + $0x880] sm:$0xff]  ;;  %v1100_v45 = vld [vmem:[#allocation2 + $0x888] sm:$0xff] }
  0xdd   : > { %946 = vmatpush.msrb.mxu0 %v905_v35  ;;  %969 = vmatpush.msrb.mxu1 %v906_v36  ;;  %v1103_v35 = vld [vmem:[#allocation2 + $0x8a0] sm:$0xff]  ;;  %v1104_v36 = vld [vmem:[#allocation2 + $0x8a8] sm:$0xff] }
  0xde   : > { %1070 = vmatpush.msrb.mxu3 %v989_v49  ;;  %1048 = vmatmul.f32.vlgmr.msrb.gmra.mxu2 %v1028_v50  ;;  %v1097_v49 = vld [vmem:[#allocation2 + $0x870] sm:$0xff] }
  0xdf   : > { %947 = vmatpush.msrb.mxu0 %v903_v41  ;;  %970 = vmatpush.msrb.mxu1 %v904_v42  ;;  %v1188_v41 = vld [vmem:[#allocation2 + $0x970] sm:$0xff]  ;;  %v1189_v42 = vld [vmem:[#allocation2 + $0x978] sm:$0xff] }
  0xe0   : > { %1071 = vmatmul.f32.vlgmr.msrb.gmra.mxu3 %v1028_v50  ;;  %1223 = vmatpush.msra.mxu2 %v1204_v56  ;;  %v1098_v50 = vld [vmem:[#allocation2 + $0x878] sm:$0xff]  ;;  %v1096_v56 = vld [vmem:[#allocation2 + $0x868] sm:$0xff] }
  0xe1   : > { %948 = vmatpush.msrb.mxu0 %v901_v47  ;;  %971 = vmatpush.msrb.mxu1 %v902_v48  ;;  %v1186_v47 = vld [vmem:[#allocation2 + $0x960] sm:$0xff]  ;;  %v1187_v48 = vld [vmem:[#allocation2 + $0x968] sm:$0xff] }
  0xe2   : > { %1246 = vmatpush.msra.mxu3 %v1205_v62  ;;  %1224 = vmatpush.msra.mxu2 %v1202_v63  ;;  %v1180_v62 = vld [vmem:[#allocation2 + $0x930] sm:$0xff]  ;;  %v1181_v63 = vld [vmem:[#allocation2 + $0x938] sm:$0xff] }
  0xe3   : > { %949 = vmatpush.msrb.mxu0 %v899_v51  ;;  %972 = vmatpush.msrb.mxu1 %v900_v53  ;;  %v1184_v51 = vld [vmem:[#allocation2 + $0x950] sm:$0xff]  ;;  %v1185_v53 = vld [vmem:[#allocation2 + $0x958] sm:$0xff] }
  0xe4   : > { %1247 = vmatpush.msra.mxu3 %v1203_v5  ;;  %1225 = vmatpush.msra.mxu2 %v1200_v6  ;;  %v1178_v5 = vld [vmem:[#allocation2 + $0x920] sm:$0xff]  ;;  %v1179_v6 = vld [vmem:[#allocation2 + $0x928] sm:$0xff] }
  0xe5   : > { %950 = vmatpush.msrb.mxu0 %v897_v57  ;;  %973 = vmatpush.msrb.mxu1 %v898_v58  ;;  %v1182_v57 = vld [vmem:[#allocation2 + $0x940] sm:$0xff]  ;;  %v1183_v58 = vld [vmem:[#allocation2 + $0x948] sm:$0xff] }
  0xe6   : > { %1248 = vmatpush.msra.mxu3 %v1201_v12  ;;  %1226 = vmatpush.msra.mxu2 %v1198_v13  ;;  %v1088_v12 = vld [vmem:[#allocation2 + $0x828] sm:$0xff]  ;;  %v1174_v13 = vld [vmem:[#allocation2 + $0x900] sm:$0xff] }
  0xe7   : > { %951 = vmatpush.msrb.mxu0 %v895_v0  ;;  %974 = vmatpush.msrb.mxu1 %v896_v14  ;;  %v1091_v0 = vld [vmem:[#allocation2 + $0x840] sm:$0xff]  ;;  %v2650_v14 = vpop.permute.xlu0 %2649 }
  0xe8   : > { %1249 = vmatpush.msra.mxu3 %v1199_v30  ;;  %1051 = vmatmul.f32.gmra.mxu2 %v1029_v18  ;;  %v2651_v4 = vunpack.i.l.bf16 %v2650_v14  ;;  %v1400_v30 = vld [vmem:[#allocation2 + $0xbf8] sm:$0xff] }
  0xe9   : > { %952 = vmatpush.msrb.mxu0 %v893_v8  ;;  %975 = vmatpush.msrb.mxu1 %v894_v3  ;;  %v1089_v8 = vld [vmem:[#allocation2 + $0x830] sm:$0xff]  ;;  %v2652_v3 = vunpack.i.h.bf16 %v2650_v14  ;;  %v1380_v14 = vld [vmem:[#allocation2 + $0xb58] sm:$0xff] }
  0xea   : > { %953 = vmatmul.f32.vlgmr.msrb.gmra.mxu0 %v933_v54  ;;  %976 = vmatmul.f32.vlgmr.msrb.gmra.mxu1 %v933_v54  ;;  %v1176_v54 = vld [vmem:[#allocation2 + $0x910] sm:$0xff] }
  0xeb   : > { %1123 = vmatpush.msra.mxu0 %v1113_v9  ;;  %1146 = vmatpush.msra.mxu1 %v1114_v10  ;;  %v1177_v9 = vld [vmem:[#allocation2 + $0x918] sm:$0xff]  ;;  %v1087_v10 = vld [vmem:[#allocation2 + $0x820] sm:$0xff] }
  0xec   : > { %1074 = vmatmul.f32.gmra.mxu3 %v1029_v18  ;;  %1227 = vmatpush.msra.mxu2 %v1196_v23  ;;  %v1085_v18 = vld [vmem:[#allocation2 + $0x810] sm:$0xff]  ;;  %v1083_v23 = vld [vmem:[#allocation2 + $0x800] sm:$0xff] }
  0xed   : > { %1124 = vmatpush.msra.mxu0 %v1111_v43  ;;  %1147 = vmatpush.msra.mxu1 %v1112_v15  ;;  %v1175_v43 = vld [vmem:[#allocation2 + $0x908] sm:$0xff]  ;;  %v1219_v15 = vsel %vm410_vm2, %v2651_v4, %v2652_v3 }
  0xee   : > { %1250 = vmatpush.msra.mxu3 %v1197_v24  ;;  %1228 = vmatpush.msra.mxu2 %v1194_v27  ;;  %v1084_v24 = vld [vmem:[#allocation2 + $0x808] sm:$0xff]  ;;  %v1305_v27 = vld [vmem:[#allocation2 + $0xaf8] sm:$0xff] }
  0xef   : > { %1125 = vmatpush.msra.mxu0 %v1109_v19  ;;  %1148 = vmatpush.msra.mxu1 %v1110_v22  ;;  %v1086_v19 = vld [vmem:[#allocation2 + $0x818] sm:$0xff]  ;;  %v2655_v22 = vpop.permute.xlu1 %2654  ;;  %v1378_v4 = vld [vmem:[#allocation2 + $0xb48] sm:$0xff] }
  0xf0   : > { %1251 = vmatpush.msra.mxu3 %v1195_v28  ;;  %1229 = vmatpush.msra.mxu2 %v1192_v34  ;;  %v2657_v16 = vunpack.i.h.bf16 %v2655_v22  ;;  %v1395_v28 = vld [vmem:[#allocation2 + $0xbd0] sm:$0xff]  ;;  %v1393_v34 = vld [vmem:[#allocation2 + $0xbc0] sm:$0xff] }
  0xf1   : > { %1126 = vmatpush.msra.mxu0 %v1107_v25  ;;  %1149 = vmatpush.msra.mxu1 %v1108_v26  ;;  %v2656_v25 = vunpack.i.l.bf16 %v2655_v22  ;;  %v1304_v26 = vld [vmem:[#allocation2 + $0xaf0] sm:$0xff] }
  0xf2   : > { %956 = vmatmul.f32.gmra.mxu0 %v934_v29  ;;  %979 = vmatmul.f32.gmra.mxu1 %v934_v29  ;;  %v1396_v29 = vld [vmem:[#allocation2 + $0xbd8] sm:$0xff]  ;;  %v501_v3 = vpop.f32.mrf.mxu3 }
  0xf3   : > { %1127 = vmatpush.msra.mxu0 %v1105_v31  ;;  %1150 = vmatpush.msra.mxu1 %v1106_v32  ;;  %v1302_v31 = vld [vmem:[#allocation2 + $0xae0] sm:$0xff]  ;;  %v1303_v32 = vld [vmem:[#allocation2 + $0xae8] sm:$0xff] }
  0xf4   : > { %1252 = vmatpush.msra.mxu3 %v1193_v33  ;;  %2699 = vrot.lane.b32.xlu1 %v3235_v7, %s2964_s11  ;;  %v1394_v33 = vld [vmem:[#allocation2 + $0xbc8] sm:$0xff] }
  0xf5   : > { %1128 = vmatpush.msra.mxu0 %v1103_v35  ;;  %1151 = vmatpush.msra.mxu1 %v1104_v36  ;;  %v1220_v35 = vsel %vm410_vm2, %v2656_v25, %v2657_v16  ;;  %v1300_v36 = vld [vmem:[#allocation2 + $0xad0] sm:$0xff]  ;;  %v1278_v16 = vld [vmem:[#allocation2 + $0xa20] sm:$0xff]  ;;  %v2665_v25 = vpop.permute.xlu0 %2664 }
  0xf6   : > { %1230 = vmatpush.msra.mxu2 %v1190_v38  ;;  %1253 = vmatpush.msra.mxu3 %v1191_v39  ;;  %v1301_v38 = vld [vmem:[#allocation2 + $0xad8] sm:$0xff]  ;;  %v1391_v39 = vld [vmem:[#allocation2 + $0xbb0] sm:$0xff] }
  0xf7   : > { %1129 = vmatpush.msra.mxu0 %v1101_v46  ;;  %1152 = vmatpush.msra.mxu1 %v1102_v40  ;;  %v1392_v46 = vld [vmem:[#allocation2 + $0xbb8] sm:$0xff]  ;;  %v1299_v40 = vld [vmem:[#allocation2 + $0xac8] sm:$0xff] }
  0xf8   : > { %1231 = vmatpush.msra.mxu2 %v1188_v41  ;;  %1254 = vmatpush.msra.mxu3 %v1189_v42  ;;  %v1389_v41 = vld [vmem:[#allocation2 + $0xba0] sm:$0xff]  ;;  %v1390_v42 = vld [vmem:[#allocation2 + $0xba8] sm:$0xff] }
  0xf9   : > { %1130 = vmatpush.msra.mxu0 %v1099_v44  ;;  %1153 = vmatpush.msra.mxu1 %v1100_v45  ;;  %v1296_v44 = vld [vmem:[#allocation2 + $0xab0] sm:$0xff]  ;;  %v1297_v45 = vld [vmem:[#allocation2 + $0xab8] sm:$0xff] }
  0xfa   : > { %1232 = vmatpush.msra.mxu2 %v1186_v47  ;;  %1255 = vmatpush.msra.mxu3 %v1187_v48  ;;  %v1387_v47 = vld [vmem:[#allocation2 + $0xb90] sm:$0xff]  ;;  %v1388_v48 = vld [vmem:[#allocation2 + $0xb98] sm:$0xff] }
  0xfb   : > { %1131 = vmatpush.msra.mxu0 %v1097_v49  ;;  %1154 = vmatpush.msra.mxu1 %v1098_v50  ;;  %v1294_v49 = vld [vmem:[#allocation2 + $0xaa0] sm:$0xff]  ;;  %v1295_v50 = vld [vmem:[#allocation2 + $0xaa8] sm:$0xff] }
  0xfc   : > { %1233 = vmatpush.msra.mxu2 %v1184_v51  ;;  %1256 = vmatpush.msra.mxu3 %v1185_v53  ;;  %v1385_v51 = vld [vmem:[#allocation2 + $0xb80] sm:$0xff]  ;;  %v1386_v53 = vld [vmem:[#allocation2 + $0xb88] sm:$0xff] }
  0xfd   : > { %1132 = vmatpush.msra.mxu0 %v1095_v55  ;;  %1155 = vmatpush.msra.mxu1 %v1096_v56  ;;  %v1292_v55 = vld [vmem:[#allocation2 + $0xa90] sm:$0xff]  ;;  %v1293_v56 = vld [vmem:[#allocation2 + $0xa98] sm:$0xff] }
  0xfe   : > { %1234 = vmatpush.msra.mxu2 %v1182_v57  ;;  %1257 = vmatpush.msra.mxu3 %v1183_v58  ;;  %v1383_v57 = vld [vmem:[#allocation2 + $0xb70] sm:$0xff]  ;;  %v1290_v58 = vld [vmem:[#allocation2 + $0xa80] sm:$0xff] }
  0xff   : > { %1133 = vmatpush.msra.mxu0 %v1093_v60  ;;  %1156 = vmatpush.msra.mxu1 %v1094_v61  ;;  %v1291_v60 = vld [vmem:[#allocation2 + $0xa88] sm:$0xff]  ;;  %v1381_v61 = vld [vmem:[#allocation2 + $0xb60] sm:$0xff] }
 0x100   : > { %1235 = vmatpush.msra.mxu2 %v1180_v62  ;;  %1258 = vmatpush.msra.mxu3 %v1181_v63  ;;  %v1288_v62 = vld [vmem:[#allocation2 + $0xa70] sm:$0xff]  ;;  %v1289_v63 = vld [vmem:[#allocation2 + $0xa78] sm:$0xff] }
 0x101   : > { %1134 = vmatpush.msra.mxu0 %v1091_v0  ;;  %1157 = vmatpush.msra.mxu1 %v1092_v1  ;;  %v1379_v0 = vld [vmem:[#allocation2 + $0xb50] sm:$0xff]  ;;  %v1286_v1 = vld [vmem:[#allocation2 + $0xa60] sm:$0xff] }
 0x102   : > { %1236 = vmatpush.msra.mxu2 %v1178_v5  ;;  %1259 = vmatpush.msra.mxu3 %v1179_v6  ;;  %v1287_v5 = vld [vmem:[#allocation2 + $0xa68] sm:$0xff]  ;;  %v1377_v6 = vld [vmem:[#allocation2 + $0xb40] sm:$0xff] }
 0x103   : > { %1135 = vmatpush.msra.mxu0 %v1089_v8  ;;  %1158 = vmatpush.msra.mxu1 %v1090_v52  ;;  %v478_v8 = vpop.f32.mrf.mxu2  ;;  %v1284_v52 = vld [vmem:[#allocation2 + $0xa50] sm:$0xff] }
 0x104   : > { %1237 = vmatpush.msra.mxu2 %v1176_v54  ;;  %1260 = vmatpush.msra.mxu3 %v1177_v9  ;;  %v1285_v54 = vld [vmem:[#allocation2 + $0xa58] sm:$0xff]  ;;  %v1375_v9 = vld [vmem:[#allocation2 + $0xb30] sm:$0xff] }
 0x105   : > { %1136 = vmatpush.msra.mxu0 %v1087_v10  ;;  %1159 = vmatpush.msra.mxu1 %v1088_v12  ;;  %v2660_v10 = vpop.permute.xlu2 %2659  ;;  %v1376_v12 = vld [vmem:[#allocation2 + $0xb38] sm:$0xff] }
 0x106   : > { %1238 = vmatpush.msra.mxu2 %v1174_v13  ;;  %1261 = vmatpush.msra.mxu3 %v1175_v43  ;;  %v1282_v13 = vld [vmem:[#allocation2 + $0xa40] sm:$0xff]  ;;  %v1283_v43 = vld [vmem:[#allocation2 + $0xa48] sm:$0xff] }
 0x107   : > { %1239 = vmatmul.f32.vlgmr.msra.gmra.mxu2 %v1219_v15  ;;  %1262 = vmatmul.f32.vlgmr.msra.gmra.mxu3 %v1219_v15  ;;  %v1373_v15 = vld [vmem:[#allocation2 + $0xb20] sm:$0xff] }
 0x108   : > { %1413 = vmatpush.msrb.mxu2 %v1399_v17  ;;  %1436 = vmatpush.msrb.mxu3 %v1400_v30  ;;  %v1374_v17 = vld [vmem:[#allocation2 + $0xb28] sm:$0xff]  ;;  %v2662_v30 = vunpack.i.h.bf16 %v2660_v10 }
 0x109   : > { %1137 = vmatpush.msra.mxu0 %v1085_v18  ;;  %1160 = vmatpush.msra.mxu1 %v1086_v19  ;;  %v2661_v18 = vunpack.i.l.bf16 %v2660_v10  ;;  %v1280_v19 = vld [vmem:[#allocation2 + $0xa30] sm:$0xff] }
 0x10a   : > { %1414 = vmatpush.msrb.mxu2 %v1397_v20  ;;  %1437 = vmatpush.msrb.mxu3 %v1398_v21  ;;  %v1281_v20 = vld [vmem:[#allocation2 + $0xa38] sm:$0xff]  ;;  %v1371_v21 = vld [vmem:[#allocation2 + $0xb10] sm:$0xff] }
 0x10b   : > { %1138 = vmatpush.msra.mxu0 %v1083_v23  ;;  %1161 = vmatpush.msra.mxu1 %v1084_v24  ;;  %v1372_v24 = vld [vmem:[#allocation2 + $0xb18] sm:$0xff] }
 0x10c   : > { %1139 = vmatmul.f32.vlgmr.msra.gmra.mxu0 %v3166_v37  ;;  %1162 = vmatmul.f32.vlgmr.msra.gmra.mxu1 %v3166_v37  ;;  %v1298_v37 = vld [vmem:[#allocation2 + $0xac0] sm:$0xff] }
 0x10d   : > { %1318 = vmatpush.msrb.mxu0 %v1304_v26  ;;  %1341 = vmatpush.msrb.mxu1 %v1305_v27 }
 0x10e   : > { %1415 = vmatpush.msrb.mxu2 %v1395_v28  ;;  %1438 = vmatpush.msrb.mxu3 %v1396_v29  ;;  %v1279_v28 = vld [vmem:[#allocation2 + $0xa28] sm:$0xff]  ;;  %v1369_v29 = vld [vmem:[#allocation2 + $0xb00] sm:$0xff] }
 0x10f   : > { %1319 = vmatpush.msrb.mxu0 %v1302_v31  ;;  %1342 = vmatpush.msrb.mxu1 %v1303_v32  ;;  %v481_v31 = vpop.f32.mrf.mxu2  ;;  %v504_v32 = vpop.f32.mrf.mxu3 }
 0x110   : > { %1416 = vmatpush.msrb.mxu2 %v1393_v34  ;;  %1439 = vmatpush.msrb.mxu3 %v1394_v33  ;;  %v1370_v34 = vld [vmem:[#allocation2 + $0xb08] sm:$0xff]  ;;  %v1409_v33 = vsel %vm644_vm3, %v2661_v18, %v2662_v30  ;;  %v1486_v18 = vld [vmem:[#allocation2 + $0xcb0] sm:$0xff] }
 0x111   : > { %1242 = vmatmul.f32.gmra.mxu2 %v1220_v35  ;;  %1265 = vmatmul.f32.gmra.mxu3 %v1220_v35  ;;  %v2667_v35 = vunpack.i.h.bf16 %v2665_v25 }
 0x112   : > { %1320 = vmatpush.msrb.mxu0 %v1300_v36  ;;  %1343 = vmatpush.msrb.mxu1 %v1301_v38  ;;  %v2666_v36 = vunpack.i.l.bf16 %v2665_v25  ;;  %v1585_v38 = vld [vmem:[#allocation2 + $0xdf0] sm:$0xff]  ;;  %v1571_v25 = vld [vmem:[#allocation2 + $0xd80] sm:$0xff] }
 0x113   : > { %1417 = vmatpush.msrb.mxu2 %v1391_v39  ;;  %1440 = vmatpush.msrb.mxu3 %v1392_v46  ;;  %v1586_v39 = vld [vmem:[#allocation2 + $0xdf8] sm:$0xff]  ;;  %v1276_v46 = vld [vmem:[#allocation2 + $0xa10] sm:$0xff] }
 0x114   : > { %1321 = vmatpush.msrb.mxu0 %v1298_v37  ;;  %1344 = vmatpush.msrb.mxu1 %v1299_v40  ;;  %v1277_v37 = vld [vmem:[#allocation2 + $0xa18] sm:$0xff]  ;;  %v1583_v40 = vld [vmem:[#allocation2 + $0xde0] sm:$0xff] }
 0x115   : > { %1418 = vmatpush.msrb.mxu2 %v1389_v41  ;;  %1441 = vmatpush.msrb.mxu3 %v1390_v42  ;;  %v2670_v41 = vpop.permute.xlu1 %2669  ;;  %v1584_v42 = vld [vmem:[#allocation2 + $0xde8] sm:$0xff] }
 0x116   : > { %2704 = vrot.lane.b32.xlu2 %v3235_v7, %s2965_s13  ;;  %1142 = vmatmul.f32.gmra.mxu0 %v3177_v59  ;;  %v1384_v7 = vld [vmem:[#allocation2 + $0xb78] sm:$0xff] }
 0x117   : > { %1165 = vmatmul.f32.gmra.mxu1 %v3177_v59  ;;  %1322 = vmatpush.msrb.mxu0 %v1296_v44  ;;  %v1382_v59 = vld [vmem:[#allocation2 + $0xb68] sm:$0xff]  ;;  %v1274_v44 = vld [vmem:[#allocation2 + $0xa00] sm:$0xff] }
 0x118   : > { %1345 = vmatpush.msrb.mxu1 %v1297_v45  ;;  %1419 = vmatpush.msrb.mxu2 %v1387_v47  ;;  %v1275_v45 = vld [vmem:[#allocation2 + $0xa08] sm:$0xff]  ;;  %v1314_v47 = vsel %vm548_vm5, %v2666_v36, %v2667_v35  ;;  %v1570_v35 = vld [vmem:[#allocation2 + $0xd78] sm:$0xff]  ;;  %v1480_v36 = vld [vmem:[#allocation2 + $0xc80] sm:$0xff] }
 0x119   : > { %1442 = vmatpush.msrb.mxu3 %v1388_v48  ;;  %1323 = vmatpush.msrb.mxu0 %v1294_v49 }
 0x11a   : > { %1346 = vmatpush.msrb.mxu1 %v1295_v50  ;;  %1420 = vmatpush.msrb.mxu2 %v1385_v51  ;;  %v2672_v50 = vunpack.i.h.bf16 %v2670_v41  ;;  %v2671_v51 = vunpack.i.l.bf16 %v2670_v41  ;;  %v1478_v41 = vld [vmem:[#allocation2 + $0xc70] sm:$0xff] }
 0x11b   : > { %1443 = vmatpush.msrb.mxu3 %v1386_v53  ;;  %1324 = vmatpush.msrb.mxu0 %v1292_v55  ;;  %v1494_v53 = vld [vmem:[#allocation2 + $0xcf0] sm:$0xff] }
 0x11c   : > { %1347 = vmatpush.msrb.mxu1 %v1293_v56  ;;  %1421 = vmatpush.msrb.mxu2 %v1383_v57  ;;  %v1495_v57 = vld [vmem:[#allocation2 + $0xcf8] sm:$0xff] }
 0x11d   : > { %1444 = vmatpush.msrb.mxu3 %v1384_v7  ;;  %1325 = vmatpush.msrb.mxu0 %v1290_v58  ;;  %v1581_v7 = vld [vmem:[#allocation2 + $0xdd0] sm:$0xff]  ;;  %v1582_v58 = vld [vmem:[#allocation2 + $0xdd8] sm:$0xff] }
 0x11e   : > { %1348 = vmatpush.msrb.mxu1 %v1291_v60  ;;  %1422 = vmatpush.msrb.mxu2 %v1381_v61  ;;  %v1492_v60 = vld [vmem:[#allocation2 + $0xce0] sm:$0xff]  ;;  %v2675_v61 = vpop.permute.xlu2 %2674 }
 0x11f   : > { %1445 = vmatpush.msrb.mxu3 %v1382_v59  ;;  %1326 = vmatpush.msrb.mxu0 %v1288_v62  ;;  %v1493_v59 = vld [vmem:[#allocation2 + $0xce8] sm:$0xff]  ;;  %v1579_v62 = vld [vmem:[#allocation2 + $0xdc0] sm:$0xff] }
 0x120   : > { %1349 = vmatpush.msrb.mxu1 %v1289_v63  ;;  %1423 = vmatpush.msrb.mxu2 %v1379_v0 }
 0x121   : > { %1446 = vmatpush.msrb.mxu3 %v1380_v14  ;;  %1327 = vmatpush.msrb.mxu0 %v1286_v1  ;;  %v1580_v14 = vld [vmem:[#allocation2 + $0xdc8] sm:$0xff]  ;;  %v1410_v1 = vsel %vm644_vm3, %v2671_v51, %v2672_v50  ;;  %v1563_v51 = vld [vmem:[#allocation2 + $0xd40] sm:$0xff] }
 0x122   : > { %1350 = vmatpush.msrb.mxu1 %v1287_v5  ;;  %1424 = vmatpush.msrb.mxu2 %v1377_v6  ;;  %v2677_v5 = vunpack.i.h.bf16 %v2675_v61  ;;  %v2676_v6 = vunpack.i.l.bf16 %v2675_v61  ;;  %v1477_v50 = vld [vmem:[#allocation2 + $0xc68] sm:$0xff]  ;;  %v1562_v61 = vld [vmem:[#allocation2 + $0xd38] sm:$0xff] }
 0x123   : > { %1447 = vmatpush.msrb.mxu3 %v1378_v4  ;;  %1328 = vmatpush.msrb.mxu0 %v1284_v52  ;;  %v1577_v4 = vld [vmem:[#allocation2 + $0xdb0] sm:$0xff]  ;;  %v1578_v52 = vld [vmem:[#allocation2 + $0xdb8] sm:$0xff] }
 0x124   : > { %1351 = vmatpush.msrb.mxu1 %v1285_v54  ;;  %1425 = vmatpush.msrb.mxu2 %v1375_v9  ;;  %v1488_v54 = vld [vmem:[#allocation2 + $0xcc0] sm:$0xff]  ;;  %v1315_v30 = vsel %vm548_vm5, %v2676_v6, %v2677_v5  ;;  %v1560_v6 = vld [vmem:[#allocation2 + $0xd28] sm:$0xff] }
 0x125   : > { %1448 = vmatpush.msrb.mxu3 %v1376_v12  ;;  %1329 = vmatpush.msrb.mxu0 %v1282_v13  ;;  %v1489_v12 = vld [vmem:[#allocation2 + $0xcc8] sm:$0xff]  ;;  %v1575_v13 = vld [vmem:[#allocation2 + $0xda0] sm:$0xff] }
 0x126   : > { %1352 = vmatpush.msrb.mxu1 %v1283_v43  ;;  %1426 = vmatpush.msrb.mxu2 %v1373_v15 }
 0x127   : > { %v432_v22 = vpop.f32.mrf.mxu0  ;;  %v455_v23 = vpop.f32.mrf.mxu1  ;;  %1449 = vmatpush.msrb.mxu3 %v1374_v17  ;;  %1330 = vmatpush.msrb.mxu0 %v1280_v19  ;;  %v1576_v17 = vld [vmem:[#allocation2 + $0xda8] sm:$0xff] }
 0x128   : > { %v3261_v26 = vadd.f32 %v478_v8, %v432_v22  ;;  %v3263_v27 = vadd.f32 %v501_v3, %v455_v23  ;;  %1353 = vmatpush.msrb.mxu1 %v1281_v20  ;;  %1427 = vmatpush.msrb.mxu2 %v1371_v21  ;;  %v1490_v8 = vld [vmem:[#allocation2 + $0xcd0] sm:$0xff]  ;;  %v1491_v3 = vld [vmem:[#allocation2 + $0xcd8] sm:$0xff] }
 0x129   : > { %1450 = vmatpush.msrb.mxu3 %v1372_v24  ;;  %1331 = vmatpush.msrb.mxu0 %v1278_v16  ;;  %v1487_v21 = vld [vmem:[#allocation2 + $0xcb8] sm:$0xff]  ;;  %v1573_v22 = vld [vmem:[#allocation2 + $0xd90] sm:$0xff]  ;;  %v1484_v24 = vld [vmem:[#allocation2 + $0xca0] sm:$0xff] }
 0x12a   : > { %1354 = vmatpush.msrb.mxu1 %v1279_v28  ;;  %1428 = vmatpush.msrb.mxu2 %v1369_v29  ;;  %v1574_v23 = vld [vmem:[#allocation2 + $0xd98] sm:$0xff]  ;;  %v1485_v16 = vld [vmem:[#allocation2 + $0xca8] sm:$0xff]  ;;  %v1482_v29 = vld [vmem:[#allocation2 + $0xc90] sm:$0xff] }
 0x12b   : > { %1451 = vmatpush.msrb.mxu3 %v1370_v34  ;;  %1429 = vmatmul.f32.vlgmr.msrb.gmra.mxu2 %v1409_v33  ;;  %v1572_v28 = vld [vmem:[#allocation2 + $0xd88] sm:$0xff] }
 0x12c   : > { %1452 = vmatmul.f32.vlgmr.msrb.gmra.mxu3 %v1409_v33  ;;  %1604 = vmatpush.msra.mxu2 %v1585_v38 }
 0x12d   : > { %1627 = vmatpush.msra.mxu3 %v1586_v39  ;;  %1332 = vmatpush.msrb.mxu0 %v1276_v46  ;;  %v1481_v46 = vld [vmem:[#allocation2 + $0xc88] sm:$0xff] }
 0x12e   : > { %1355 = vmatpush.msrb.mxu1 %v1277_v37  ;;  %1605 = vmatpush.msra.mxu2 %v1583_v40  ;;  %v1567_v37 = vld [vmem:[#allocation2 + $0xd60] sm:$0xff]  ;;  %v1568_v40 = vld [vmem:[#allocation2 + $0xd68] sm:$0xff] }
 0x12f   : > { %v435_v48 = vpop.f32.mrf.mxu0  ;;  %v458_v49 = vpop.f32.mrf.mxu1  ;;  %1628 = vmatpush.msra.mxu3 %v1584_v42  ;;  %1333 = vmatpush.msrb.mxu0 %v1274_v44 }
 0x130   : > { %v3267_v55 = vadd.f32 %v481_v31, %v435_v48  ;;  %v3269_v56 = vadd.f32 %v504_v32, %v458_v49  ;;  %1356 = vmatpush.msrb.mxu1 %v1275_v45  ;;  %1334 = vmatmul.f32.vlgmr.msrb.gmra.mxu0 %v1314_v47  ;;  %v666_v63 = vpop.f32.mrf.mxu2  ;;  %v689_v0 = vpop.f32.mrf.mxu3  ;;  %v1483_v31 = vld [vmem:[#allocation2 + $0xc98] sm:$0xff]  ;;  %v1569_v32 = vld [vmem:[#allocation2 + $0xd70] sm:$0xff]  ;;  %v1476_v49 = vld [vmem:[#allocation2 + $0xc60] sm:$0xff] }
 0x131   : > { %1357 = vmatmul.f32.vlgmr.msrb.gmra.mxu1 %v1314_v47  ;;  %1504 = vmatpush.msra.mxu0 %v1494_v53  ;;  %v1479_v45 = vld [vmem:[#allocation2 + $0xc78] sm:$0xff]  ;;  %v1565_v47 = vld [vmem:[#allocation2 + $0xd50] sm:$0xff]  ;;  %v1564_v53 = vld [vmem:[#allocation2 + $0xd48] sm:$0xff] }
 0x132   : > { %1527 = vmatpush.msra.mxu1 %v1495_v57  ;;  %1606 = vmatpush.msra.mxu2 %v1581_v7  ;;  %v1566_v48 = vld [vmem:[#allocation2 + $0xd58] sm:$0xff]  ;;  %v1561_v7 = vld [vmem:[#allocation2 + $0xd30] sm:$0xff] }
 0x133   : > { %1629 = vmatpush.msra.mxu3 %v1582_v58  ;;  %1505 = vmatpush.msra.mxu0 %v1492_v60  ;;  %v1475_v57 = vld [vmem:[#allocation2 + $0xc58] sm:$0xff] }
 0x134   : > { %1528 = vmatpush.msra.mxu1 %v1493_v59  ;;  %1607 = vmatpush.msra.mxu2 %v1579_v62  ;;  %v1472_v59 = vld [vmem:[#allocation2 + $0xc40] sm:$0xff] }
 0x135   : > { %1630 = vmatpush.msra.mxu3 %v1580_v14  ;;  %1432 = vmatmul.f32.gmra.mxu2 %v1410_v1  ;;  %v1559_v14 = vld [vmem:[#allocation2 + $0xd20] sm:$0xff] }
 0x136   : > { %1455 = vmatmul.f32.gmra.mxu3 %v1410_v1  ;;  %1506 = vmatpush.msra.mxu0 %v1490_v8 }
 0x137   : > { %v570_v9 = vpop.f32.mrf.mxu0  ;;  %v593_v10 = vpop.f32.mrf.mxu1  ;;  %1529 = vmatpush.msra.mxu1 %v1491_v3  ;;  %1608 = vmatpush.msra.mxu2 %v1577_v4  ;;  %v1470_v4 = vld [vmem:[#allocation2 + $0xc30] sm:$0xff] }
 0x138   : > { %v599_v43 = vadd.f32 %v570_v9, %v3261_v26  ;;  %v600_v15 = vadd.f32 %v593_v10, %v3263_v27  ;;  %1631 = vmatpush.msra.mxu3 %v1578_v52  ;;  %1507 = vmatpush.msra.mxu0 %v1488_v54  ;;  %v669_v26 = vpop.f32.mrf.mxu2  ;;  %v692_v27 = vpop.f32.mrf.mxu3  ;;  %v1471_v52 = vld [vmem:[#allocation2 + $0xc38] sm:$0xff]  ;;  %v1557_v54 = vld [vmem:[#allocation2 + $0xd10] sm:$0xff] }
 0x139   : > { %1530 = vmatpush.msra.mxu1 %v1489_v12  ;;  %1609 = vmatpush.msra.mxu2 %v1575_v13  ;;  %v1558_v12 = vld [vmem:[#allocation2 + $0xd18] sm:$0xff]  ;;  %v1468_v13 = vld [vmem:[#allocation2 + $0xc20] sm:$0xff] }
 0x13a   : > { %v3275_v19 = vadd.f32 %v666_v63, %v599_v43  ;;  %v3277_v20 = vadd.f32 %v689_v0, %v600_v15  ;;  %1632 = vmatpush.msra.mxu3 %v1576_v17  ;;  %1337 = vmatmul.f32.gmra.mxu0 %v1315_v30  ;;  %v1473_v0 = vld [vmem:[#allocation2 + $0xc48] sm:$0xff]  ;;  %v1555_v15 = vld [vmem:[#allocation2 + $0xd00] sm:$0xff] }
 0x13b   : > { %1360 = vmatmul.f32.gmra.mxu1 %v1315_v30  ;;  %1508 = vmatpush.msra.mxu0 %v1486_v18  ;;  %v1469_v43 = vld [vmem:[#allocation2 + $0xc28] sm:$0xff]  ;;  %v1780_v18 = vld [vmem:[#allocation2 + $0xff0] sm:$0xff] }
 0x13c   : > { %1531 = vmatpush.msra.mxu1 %v1487_v21  ;;  %1610 = vmatpush.msra.mxu2 %v1573_v22  ;;  %v1556_v17 = vld [vmem:[#allocation2 + $0xd08] sm:$0xff]  ;;  %v1467_v21 = vld [vmem:[#allocation2 + $0xc18] sm:$0xff]  ;;  %v1778_v22 = vld [vmem:[#allocation2 + $0xfe0] sm:$0xff] }
 0x13d   : > { %1633 = vmatpush.msra.mxu3 %v1574_v23  ;;  %1509 = vmatpush.msra.mxu0 %v1484_v24  ;;  %v2685_v23 = vpop.permute.xlu1 %2684  ;;  %v1779_v24 = vld [vmem:[#allocation2 + $0xfe8] sm:$0xff] }
 0x13e   : > { %1532 = vmatpush.msra.mxu1 %v1485_v16  ;;  %1611 = vmatpush.msra.mxu2 %v1571_v25  ;;  %v1464_v16 = vld [vmem:[#allocation2 + $0xc00] sm:$0xff]  ;;  %v1465_v25 = vld [vmem:[#allocation2 + $0xc08] sm:$0xff] }
 0x13f   : > { %v573_v34 = vpop.f32.mrf.mxu0  ;;  %v596_v33 = vpop.f32.mrf.mxu1  ;;  %1634 = vmatpush.msra.mxu3 %v1572_v28  ;;  %1510 = vmatpush.msra.mxu0 %v1482_v29  ;;  %v1685_v28 = vld [vmem:[#allocation2 + $0xef0] sm:$0xff]  ;;  %v1686_v29 = vld [vmem:[#allocation2 + $0xef8] sm:$0xff] }
 0x140   : > { %v601_v38 = vadd.f32 %v573_v34, %v3267_v55  ;;  %v602_v39 = vadd.f32 %v596_v33, %v3269_v56  ;;  %1533 = vmatpush.msra.mxu1 %v1483_v31  ;;  %1612 = vmatpush.msra.mxu2 %v1569_v32  ;;  %v1474_v55 = vld [vmem:[#allocation2 + $0xc50] sm:$0xff]  ;;  %v2680_v56 = vpop.permute.xlu0 %2679  ;;  %v859_v58 = vpop.f32.mrf.mxu2  ;;  %v1777_v32 = vld [vmem:[#allocation2 + $0xfd8] sm:$0xff]  ;;  %v1683_v34 = vld [vmem:[#allocation2 + $0xee0] sm:$0xff] }
 0x141   : > { %1635 = vmatpush.msra.mxu3 %v1570_v35  ;;  %1511 = vmatpush.msra.mxu0 %v1480_v36  ;;  %v882_v60 = vpop.f32.mrf.mxu3  ;;  %v2682_v8 = vunpack.i.h.bf16 %v2680_v56  ;;  %v2681_v3 = vunpack.i.l.bf16 %v2680_v56  ;;  %v1776_v31 = vld [vmem:[#allocation2 + $0xfd0] sm:$0xff]  ;;  %v1684_v33 = vld [vmem:[#allocation2 + $0xee8] sm:$0xff]  ;;  %v1774_v35 = vld [vmem:[#allocation2 + $0xfc0] sm:$0xff] }
 0x142   : > { %v3281_v42 = vadd.f32 %v669_v26, %v601_v38  ;;  %v3283_v44 = vadd.f32 %v692_v27, %v602_v39  ;;  %1534 = vmatpush.msra.mxu1 %v1481_v46  ;;  %1613 = vmatpush.msra.mxu2 %v1567_v37  ;;  %v2687_v26 = vunpack.i.h.bf16 %v2685_v23  ;;  %v2686_v27 = vunpack.i.l.bf16 %v2685_v23  ;;  %v1775_v36 = vld [vmem:[#allocation2 + $0xfc8] sm:$0xff]  ;;  %v1681_v39 = vld [vmem:[#allocation2 + $0xed0] sm:$0xff]  ;;  %v1682_v46 = vld [vmem:[#allocation2 + $0xed8] sm:$0xff] }
 0x143   : > { %1636 = vmatpush.msra.mxu3 %v1568_v40  ;;  %1512 = vmatpush.msra.mxu0 %v1478_v41  ;;  %v1600_v30 = vsel %vm410_vm2, %v2681_v3, %v2682_v8  ;;  %v1772_v37 = vld [vmem:[#allocation2 + $0xfb0] sm:$0xff]  ;;  %v1773_v40 = vld [vmem:[#allocation2 + $0xfb8] sm:$0xff]  ;;  %v1679_v41 = vld [vmem:[#allocation2 + $0xec0] sm:$0xff] }
 0x144   : > { %1535 = vmatpush.msra.mxu1 %v1479_v45  ;;  %1614 = vmatpush.msra.mxu2 %v1565_v47  ;;  %v1601_v38 = vsel %vm410_vm2, %v2686_v27, %v2687_v26  ;;  %v1770_v45 = vld [vmem:[#allocation2 + $0xfa0] sm:$0xff]  ;;  %v1771_v47 = vld [vmem:[#allocation2 + $0xfa8] sm:$0xff]  ;;  %v1752_v23 = vld [vmem:[#allocation2 + $0xf10] sm:$0xff] }
 0x145   : > { %1637 = vmatpush.msra.mxu3 %v1566_v48  ;;  %1513 = vmatpush.msra.mxu0 %v1476_v49  ;;  %v1677_v48 = vld [vmem:[#allocation2 + $0xeb0] sm:$0xff]  ;;  %v1678_v49 = vld [vmem:[#allocation2 + $0xeb8] sm:$0xff]  ;;  %v1766_v56 = vld [vmem:[#allocation2 + $0xf80] sm:$0xff] }
 0x146   : > { %1536 = vmatpush.msra.mxu1 %v1477_v50  ;;  %1615 = vmatpush.msra.mxu2 %v1563_v51  ;;  %v1768_v50 = vld [vmem:[#allocation2 + $0xf90] sm:$0xff]  ;;  %v1769_v51 = vld [vmem:[#allocation2 + $0xf98] sm:$0xff]  ;;  %v1668_v8 = vld [vmem:[#allocation2 + $0xe68] sm:$0xff] }
 0x147   : > { %v758_v62 = vpop.f32.mrf.mxu0  ;;  %v781_v63 = vpop.f32.mrf.mxu1  ;;  %1638 = vmatpush.msra.mxu3 %v1564_v53  ;;  %1514 = vmatpush.msra.mxu0 %v1474_v55  ;;  %v1675_v53 = vld [vmem:[#allocation2 + $0xea0] sm:$0xff]  ;;  %v1676_v55 = vld [vmem:[#allocation2 + $0xea8] sm:$0xff] }
 0x148   : > { %v787_v1 = vadd.f32 %v758_v62, %v3275_v19  ;;  %v788_v5 = vadd.f32 %v781_v63, %v3277_v20  ;;  %1537 = vmatpush.msra.mxu1 %v1475_v57  ;;  %1616 = vmatpush.msra.mxu2 %v1561_v7  ;;  %v1781_v19 = vld [vmem:[#allocation2 + $0xff8] sm:$0xff]  ;;  %v1466_v20 = vld [vmem:[#allocation2 + $0xc10] sm:$0xff]  ;;  %v1767_v57 = vld [vmem:[#allocation2 + $0xf88] sm:$0xff] }
 0x149   : > { %1639 = vmatpush.msra.mxu3 %v1562_v61  ;;  %1515 = vmatpush.msra.mxu0 %v1472_v59  ;;  %v1673_v7 = vld [vmem:[#allocation2 + $0xe90] sm:$0xff]  ;;  %v1765_v61 = vld [vmem:[#allocation2 + $0xf78] sm:$0xff]  ;;  %v1671_v59 = vld [vmem:[#allocation2 + $0xe80] sm:$0xff] }
 0x14a   : > { %v3287_v9 = vadd.f32 %v859_v58, %v787_v1  ;;  %v3289_v10 = vadd.f32 %v882_v60, %v788_v5  ;;  %1538 = vmatpush.msra.mxu1 %v1473_v0  ;;  %1617 = vmatpush.msra.mxu2 %v1559_v14  ;;  %v1674_v58 = vld [vmem:[#allocation2 + $0xe98] sm:$0xff]  ;;  %v1764_v60 = vld [vmem:[#allocation2 + $0xf70] sm:$0xff]  ;;  %v1672_v62 = vld [vmem:[#allocation2 + $0xe88] sm:$0xff] }
 0x14b   : > { %1640 = vmatpush.msra.mxu3 %v1560_v6  ;;  %1516 = vmatpush.msra.mxu0 %v1470_v4  ;;  %v1762_v63 = vld [vmem:[#allocation2 + $0xf60] sm:$0xff]  ;;  %v1669_v0 = vld [vmem:[#allocation2 + $0xe70] sm:$0xff]  ;;  %v1670_v14 = vld [vmem:[#allocation2 + $0xe78] sm:$0xff] }
 0x14c   : > { %1539 = vmatpush.msra.mxu1 %v1471_v52  ;;  %1618 = vmatpush.msra.mxu2 %v1557_v54  ;;  %v1760_v1 = vld [vmem:[#allocation2 + $0xf50] sm:$0xff]  ;;  %v1761_v5 = vld [vmem:[#allocation2 + $0xf58] sm:$0xff]  ;;  %v1667_v6 = vld [vmem:[#allocation2 + $0xe60] sm:$0xff] }
 0x14d   : > { %1641 = vmatpush.msra.mxu3 %v1558_v12  ;;  %1517 = vmatpush.msra.mxu0 %v1468_v13  ;;  %v1758_v3 = vld [vmem:[#allocation2 + $0xf40] sm:$0xff]  ;;  %v1759_v4 = vld [vmem:[#allocation2 + $0xf48] sm:$0xff]  ;;  %v1665_v52 = vld [vmem:[#allocation2 + $0xe50] sm:$0xff]  ;;  %v2690_v13 = vpop.permute.xlu2 %2689 }
 0x14e   : > { %1540 = vmatpush.msra.mxu1 %v1469_v43  ;;  %1619 = vmatpush.msra.mxu2 %v1555_v15  ;;  %v1666_v54 = vld [vmem:[#allocation2 + $0xe58] sm:$0xff]  ;;  %v1756_v12 = vld [vmem:[#allocation2 + $0xf30] sm:$0xff]  ;;  %v1663_v15 = vld [vmem:[#allocation2 + $0xe40] sm:$0xff] }
 0x14f   : > { %1642 = vmatpush.msra.mxu3 %v1556_v17  ;;  %1620 = vmatmul.f32.vlgmr.msra.gmra.mxu2 %v1600_v30  ;;  %v1757_v43 = vld [vmem:[#allocation2 + $0xf38] sm:$0xff]  ;;  %v1664_v17 = vld [vmem:[#allocation2 + $0xe48] sm:$0xff]  ;;  %v1750_v27 = vld [vmem:[#allocation2 + $0xf00] sm:$0xff] }
 0x150   : > { %1643 = vmatmul.f32.vlgmr.msra.gmra.mxu3 %v1600_v30  ;;  %1794 = vmatpush.msrb.mxu2 %v1780_v18  ;;  %v1754_v30 = vld [vmem:[#allocation2 + $0xf20] sm:$0xff]  ;;  %v1755_v18 = vld [vmem:[#allocation2 + $0xf28] sm:$0xff] }
 0x151   : > { %1817 = vmatpush.msrb.mxu3 %v1781_v19  ;;  %1518 = vmatpush.msra.mxu0 %v1466_v20  ;;  %v2692_v19 = vunpack.i.h.bf16 %v2690_v13  ;;  %v2691_v20 = vunpack.i.l.bf16 %v2690_v13  ;;  %v1660_v26 = vld [vmem:[#allocation2 + $0xe28] sm:$0xff] }
 0x152   : > { %1541 = vmatpush.msra.mxu1 %v1467_v21  ;;  %1795 = vmatpush.msrb.mxu2 %v1778_v22  ;;  %v1661_v21 = vld [vmem:[#allocation2 + $0xe30] sm:$0xff]  ;;  %v1662_v22 = vld [vmem:[#allocation2 + $0xe38] sm:$0xff] }
 0x153   : > { %1818 = vmatpush.msrb.mxu3 %v1779_v24  ;;  %1519 = vmatpush.msra.mxu0 %v1464_v16  ;;  %v2695_v24 = vpop.permute.xlu0 %2694  ;;  %v1753_v16 = vld [vmem:[#allocation2 + $0xf18] sm:$0xff] }
 0x154   : > { %1542 = vmatpush.msra.mxu1 %v1465_v25  ;;  %1520 = vmatmul.f32.vlgmr.msra.gmra.mxu0 %v3208_v2  ;;  %v1659_v25 = vld [vmem:[#allocation2 + $0xe20] sm:$0xff] }
 0x155   : > { %1543 = vmatmul.f32.vlgmr.msra.gmra.mxu1 %v3208_v2  ;;  %1699 = vmatpush.msrb.mxu0 %v1685_v28  ;;  %v1680_v2 = vld [vmem:[#allocation2 + $0xec8] sm:$0xff] }
 0x156   : > { %1722 = vmatpush.msrb.mxu1 %v1686_v29  ;;  %1796 = vmatpush.msrb.mxu2 %v1776_v31  ;;  %v1751_v28 = vld [vmem:[#allocation2 + $0xf08] sm:$0xff]  ;;  %v2697_v29 = vunpack.i.h.bf16 %v2695_v24  ;;  %v2696_v31 = vunpack.i.l.bf16 %v2695_v24 }
 0x157   : > { %1819 = vmatpush.msrb.mxu3 %v1777_v32  ;;  %1700 = vmatpush.msrb.mxu0 %v1683_v34  ;;  %v1790_v32 = vsel %vm644_vm3, %v2691_v20, %v2692_v19  ;;  %v1657_v34 = vld [vmem:[#allocation2 + $0xe10] sm:$0xff]  ;;  %v3377_v20 = vld [vmem:[#allocation10 + $0xd8] sm:$0xff] }
 0x158   : > { %1723 = vmatpush.msrb.mxu1 %v1684_v33  ;;  %1797 = vmatpush.msrb.mxu2 %v1774_v35  ;;  %v1658_v35 = vld [vmem:[#allocation2 + $0xe18] sm:$0xff]  ;;  %v3389_v24 = vld [vmem:[#allocation10 + $0xc8] sm:$0xff] }
 0x159   : > { %1820 = vmatpush.msrb.mxu3 %v1775_v36  ;;  %1623 = vmatmul.f32.gmra.mxu2 %v1601_v38  ;;  %v1655_v36 = vld [vmem:[#allocation2 + $0xe00] sm:$0xff]  ;;  %v3375_v19 = vld [vmem:[#allocation10 + $0x1d0] sm:$0xff] }
 0x15a   : > { %1646 = vmatmul.f32.gmra.mxu3 %v1601_v38  ;;  %1701 = vmatpush.msrb.mxu0 %v1681_v39  ;;  %v1656_v38 = vld [vmem:[#allocation2 + $0xe08] sm:$0xff] }
 0x15b   : > { %1724 = vmatpush.msrb.mxu1 %v1682_v46  ;;  %1798 = vmatpush.msrb.mxu2 %v1772_v37  ;;  %v1695_v37 = vsel %vm548_vm5, %v2696_v31, %v2697_v29  ;;  %v3409_v31 = vld [vmem:[#allocation10 + $0x1b8] sm:$0xff] }
 0x15c   : > { %1821 = vmatpush.msrb.mxu3 %v1773_v40  ;;  %1702 = vmatpush.msrb.mxu0 %v1679_v41 }
 0x15d   : > { %1725 = vmatpush.msrb.mxu1 %v1680_v2  ;;  %1799 = vmatpush.msrb.mxu2 %v1770_v45 }
 0x15e   : > { %1822 = vmatpush.msrb.mxu3 %v1771_v47  ;;  %1523 = vmatmul.f32.gmra.mxu0 %v3229_v11 }
 0x15f   : > { %1546 = vmatmul.f32.gmra.mxu1 %v3229_v11  ;;  %1703 = vmatpush.msrb.mxu0 %v1677_v48  ;;  %v1763_v11 = vld [vmem:[#allocation2 + $0xf68] sm:$0xff]  ;;  %v3301_v48 = vpop.f32.mrf.mxu0 }
 0x160   : > { %1726 = vmatpush.msrb.mxu1 %v1678_v49  ;;  %1800 = vmatpush.msrb.mxu2 %v1768_v50  ;;  %v3303_v49 = vpop.f32.mrf.mxu1  ;;  %v3305_v50 = vpop.f32.mrf.mxu2 }
 0x161   : > { %1823 = vmatpush.msrb.mxu3 %v1769_v51  ;;  %1704 = vmatpush.msrb.mxu0 %v1675_v53  ;;  %v3307_v51 = vpop.f32.mrf.mxu3 }
 0x162   : > { %1727 = vmatpush.msrb.mxu1 %v1676_v55  ;;  %1801 = vmatpush.msrb.mxu2 %v1766_v56 }
 0x163   : > { %1824 = vmatpush.msrb.mxu3 %v1767_v57  ;;  %1705 = vmatpush.msrb.mxu0 %v1673_v7 }
 0x164   : > { %1728 = vmatpush.msrb.mxu1 %v1674_v58  ;;  %1802 = vmatpush.msrb.mxu2 %v1764_v60 }
 0x165   : > { %1825 = vmatpush.msrb.mxu3 %v1765_v61  ;;  %1706 = vmatpush.msrb.mxu0 %v1671_v59 }
 0x166   : > { %1729 = vmatpush.msrb.mxu1 %v1672_v62  ;;  %1803 = vmatpush.msrb.mxu2 %v1762_v63  ;;  %v2700_v33 = vpop.permute.xlu1 %2699  ;;  %v3329_v63 = vld [vmem:[#allocation10 + $0xf0] sm:$0xff] }
 0x167   : > { %1826 = vmatpush.msrb.mxu3 %v1763_v11  ;;  %1707 = vmatpush.msrb.mxu0 %v1669_v0  ;;  %v2702_v39 = vunpack.i.h.bf16 %v2700_v33  ;;  %v2701_v46 = vunpack.i.l.bf16 %v2700_v33  ;;  %v3309_v53 = vpop.f32.mrf.mxu0  ;;  %v3331_v11 = vld [vmem:[#allocation10 + $0x1f0] sm:$0xff]  ;;  %v3333_v0 = vld [vmem:[#allocation10 + $0xf8] sm:$0xff]  ;;  %v3417_v33 = vld [vmem:[#allocation10 + $0x1a0] sm:$0xff] }
 0x168   : > { %1730 = vmatpush.msrb.mxu1 %v1670_v14  ;;  %1804 = vmatpush.msrb.mxu2 %v1760_v1  ;;  %v3311_v55 = vpop.f32.mrf.mxu1  ;;  %v3313_v56 = vpop.f32.mrf.mxu2  ;;  %v3339_v1 = vld [vmem:[#allocation10 + $0x1f8] sm:$0xff] }
 0x169   : > { %1827 = vmatpush.msrb.mxu3 %v1761_v5  ;;  %1708 = vmatpush.msrb.mxu0 %v1667_v6  ;;  %v1791_v45 = vsel %vm644_vm3, %v2701_v46, %v2702_v39  ;;  %v3315_v57 = vpop.f32.mrf.mxu3  ;;  %v3429_v39 = vld [vmem:[#allocation10 + $0x90] sm:$0xff] }
 0x16a   : > { %1731 = vmatpush.msrb.mxu1 %v1668_v8  ;;  %1805 = vmatpush.msrb.mxu2 %v1758_v3  ;;  %v3431_v46 = vld [vmem:[#allocation10 + $0x190] sm:$0xff] }
 0x16b   : > { %1828 = vmatpush.msrb.mxu3 %v1759_v4  ;;  %1709 = vmatpush.msrb.mxu0 %v1665_v52  ;;  %3815 = vst [vmem:[#allocation17_spill] sm:$0xff] %v3431_v46 }
 0x16c   : > { %1732 = vmatpush.msrb.mxu1 %v1666_v54  ;;  %1806 = vmatpush.msrb.mxu2 %v1756_v12 }
 0x16d   : > { %1829 = vmatpush.msrb.mxu3 %v1757_v43  ;;  %1710 = vmatpush.msrb.mxu0 %v1663_v15  ;;  %v3361_v43 = vld [vmem:[#allocation10 + $0xe0] sm:$0xff] }
 0x16e   : > { %1733 = vmatpush.msrb.mxu1 %v1664_v17  ;;  %1807 = vmatpush.msrb.mxu2 %v1754_v30  ;;  %v3363_v15 = vld [vmem:[#allocation10 + $0x1e0] sm:$0xff]  ;;  %v3365_v17 = vld [vmem:[#allocation10 + $0xe8] sm:$0xff] }
 0x16f   : > { %1830 = vmatpush.msrb.mxu3 %v1755_v18  ;;  %1711 = vmatpush.msrb.mxu0 %v1661_v21  ;;  %v3317_v7 = vpop.f32.mrf.mxu0  ;;  %v3369_v30 = vld [vmem:[#allocation10 + $0x1e8] sm:$0xff]  ;;  %v3373_v18 = vld [vmem:[#allocation10 + $0xd0] sm:$0xff]  ;;  %v3381_v21 = vld [vmem:[#allocation10 + $0x1d8] sm:$0xff] }
 0x170   : > { %1734 = vmatpush.msrb.mxu1 %v1662_v22  ;;  %1808 = vmatpush.msrb.mxu2 %v1752_v23  ;;  %v2705_v40 = vpop.permute.xlu2 %2704  ;;  %v3319_v58 = vpop.f32.mrf.mxu1  ;;  %v3385_v22 = vld [vmem:[#allocation10 + $0xc0] sm:$0xff] }
 0x171   : > { %1831 = vmatpush.msrb.mxu3 %v1753_v16  ;;  %1712 = vmatpush.msrb.mxu0 %v1659_v25  ;;  %v2707_v41 = vunpack.i.h.bf16 %v2705_v40  ;;  %v2706_v2 = vunpack.i.l.bf16 %v2705_v40  ;;  %v3321_v60 = vpop.f32.mrf.mxu2  ;;  %v3323_v61 = vpop.f32.mrf.mxu3  ;;  %v3387_v23 = vld [vmem:[#allocation10 + $0x1c0] sm:$0xff]  ;;  %v3393_v16 = vld [vmem:[#allocation10 + $0x1c8] sm:$0xff]  ;;  %v789_v40 = vadd.f32 %v3301_v48, %v3281_v42  ;;  %v983_v42 = vadd.f32 %v3309_v53, %v3287_v9  ;;  %v3467_v9 = vld [vmem:[#allocation10 + $0x78] sm:$0xff] }
 0x172   : > { %1735 = vmatpush.msrb.mxu1 %v1660_v26  ;;  %1809 = vmatpush.msrb.mxu2 %v1750_v27  ;;  %v3399_v26 = vld [vmem:[#allocation10 + $0xb0] sm:$0xff]  ;;  %v3455_v48 = vld [vmem:[#allocation10 + $0x188] sm:$0xff]  ;;  %3823 = vst [vmem:[#allocation25_spill] sm:$0xff] %v3467_v9 }
 0x173   : > { %1832 = vmatpush.msrb.mxu3 %v1751_v28  ;;  %1810 = vmatmul.f32.vlgmr.msrb.gmra.mxu2 %v1790_v32  ;;  %v1696_v47 = vsel %vm548_vm5, %v2706_v2, %v2707_v41  ;;  %v3401_v27 = vld [vmem:[#allocation10 + $0x1b0] sm:$0xff]  ;;  %v3403_v28 = vld [vmem:[#allocation10 + $0xb8] sm:$0xff]  ;;  %v790_v2 = vadd.f32 %v3303_v49, %v3283_v44  ;;  %3820 = vst [vmem:[#allocation22_spill] sm:$0xff] %v3455_v48 }
 0x174   : > { %1833 = vmatmul.f32.vlgmr.msrb.gmra.mxu3 %v1790_v32  ;;  %1713 = vmatpush.msrb.mxu0 %v1657_v34  ;;  %v3415_v34 = vld [vmem:[#allocation10 + $0xa0] sm:$0xff]  ;;  %v3439_v41 = vld [vmem:[#allocation10 + $0x198] sm:$0xff]  ;;  %v984_v44 = vadd.f32 %v3311_v55, %v3289_v10  ;;  %v890_v53 = vadd.f32 %v3305_v50, %v789_v40  ;;  %v3485_v50 = vld [vmem:[#allocation10 + $0x68] sm:$0xff]  ;;  %v1078_v40 = vadd.f32 %v3313_v56, %v983_v42 }
 0x175   : > { %1736 = vmatpush.msrb.mxu1 %v1658_v35  ;;  %1972 = vmatpush.msra.mxu2 %v3333_v0  ;;  %v3419_v35 = vld [vmem:[#allocation10 + $0xa8] sm:$0xff]  ;;  %3816 = vst [vmem:[#allocation18_spill] sm:$0xff] %v3439_v41  ;;  %v3474_v10 = vld [vmem:[#allocation10 + $0x178] sm:$0xff]  ;;  %v891_v55 = vadd.f32 %v3307_v51, %v790_v2  ;;  %v3501_v56 = vld [vmem:[#allocation10 + $0x150] sm:$0xff] }
 0x176   : > { %1714 = vmatpush.msrb.mxu0 %v1655_v36  ;;  %1992 = vmatpush.msra.mxu3 %v3339_v1  ;;  %3824 = vst [vmem:[#allocation26_spill] sm:$0xff] %v3474_v10  ;;  %v3493_v51 = vld [vmem:[#allocation10 + $0x168] sm:$0xff]  ;;  %v1079_v2 = vadd.f32 %v3315_v57, %v984_v44  ;;  %v3515_v44 = vld [vmem:[#allocation10 + $0x140] sm:$0xff] }
 0x177   : > { %1737 = vmatpush.msrb.mxu1 %v1656_v38  ;;  %1715 = vmatmul.f32.vlgmr.msrb.gmra.mxu0 %v1695_v37  ;;  %v3425_v38 = vld [vmem:[#allocation10 + $0x1a8] sm:$0xff]  ;;  %3825 = vst [vmem:[#allocation27_spill] sm:$0xff] %v3501_v56 }
 0x178   : > { %1738 = vmatmul.f32.vlgmr.msrb.gmra.mxu1 %v1695_v37  ;;  %1932 = vmatpush.msra.mxu0 %v3329_v63  ;;  %3814 = vst [vmem:[#allocation16_spill] sm:$0xff] %v3425_v38  ;;  %v3433_v37 = vld [vmem:[#allocation10 + $0x98] sm:$0xff] }
 0x179   : > { %1952 = vmatpush.msra.mxu1 %v3331_v11  ;;  %1973 = vmatpush.msra.mxu2 %v3365_v17  ;;  %3827 = vst [vmem:[#allocation29_spill] sm:$0xff] %v3515_v44 }
 0x17a   : > { %1933 = vmatpush.msra.mxu0 %v3361_v43  ;;  %1993 = vmatpush.msra.mxu3 %v3369_v30 }
 0x17b   : > { %1813 = vmatmul.f32.gmra.mxu2 %v1791_v45  ;;  %1953 = vmatpush.msra.mxu1 %v3363_v15 }
 0x17c   : > { %1836 = vmatmul.f32.gmra.mxu3 %v1791_v45  ;;  %1934 = vmatpush.msra.mxu0 %v3373_v18  ;;  %v3445_v45 = vld [vmem:[#allocation10 + $0x80] sm:$0xff] }
 0x17d   : > { %1954 = vmatpush.msra.mxu1 %v3375_v19  ;;  %1974 = vmatpush.msra.mxu2 %v3377_v20  ;;  %3817 = vst [vmem:[#allocation19_spill] sm:$0xff] %v3445_v45 }
 0x17e   : > { %1994 = vmatpush.msra.mxu3 %v3381_v21  ;;  %1935 = vmatpush.msra.mxu0 %v3385_v22 }
 0x17f   : > { %1718 = vmatmul.f32.gmra.mxu0 %v1696_v47  ;;  %1955 = vmatpush.msra.mxu1 %v3387_v23 }
 0x180   : > { %1741 = vmatmul.f32.gmra.mxu1 %v1696_v47  ;;  %1975 = vmatpush.msra.mxu2 %v3389_v24  ;;  %v3447_v47 = vld [vmem:[#allocation10 + $0x180] sm:$0xff] }
 0x181   : > { %1995 = vmatpush.msra.mxu3 %v3393_v16  ;;  %1936 = vmatpush.msra.mxu0 %v3399_v26  ;;  %3818 = vst [vmem:[#allocation20_spill] sm:$0xff] %v3447_v47 }
 0x182   : > { %1956 = vmatpush.msra.mxu1 %v3401_v27  ;;  %1976 = vmatpush.msra.mxu2 %v3403_v28 }
 0x183   : > { %1996 = vmatpush.msra.mxu3 %v3409_v31  ;;  %1937 = vmatpush.msra.mxu0 %v3415_v34 }
 0x184   : > { %1957 = vmatpush.msra.mxu1 %v3417_v33  ;;  %1977 = vmatpush.msra.mxu2 %v3419_v35 }
 0x185   : > { %1997 = vmatpush.msra.mxu3 %v3425_v38  ;;  %1938 = vmatpush.msra.mxu0 %v3429_v39  ;;  %v3449_v38 = vld [vmem:[#allocation10 + $0x88] sm:$0xff] }
 0x186   : > { %1958 = vmatpush.msra.mxu1 %v3431_v46  ;;  %1978 = vmatpush.msra.mxu2 %v3433_v37  ;;  %3819 = vst [vmem:[#allocation21_spill] sm:$0xff] %v3449_v38  ;;  %v3465_v46 = vld [vmem:[#allocation10 + $0x170] sm:$0xff] }
 0x187   : > { %1998 = vmatpush.msra.mxu3 %v3439_v41  ;;  %1939 = vmatpush.msra.mxu0 %v3445_v45  ;;  %v3463_v41 = vld [vmem:[#allocation10 + $0x70] sm:$0xff]  ;;  %3822 = vst [vmem:[#allocation24_spill] sm:$0xff] %v3465_v46  ;;  %v3483_v45 = vld [vmem:[#allocation10 + $0x160] sm:$0xff] }
 0x188   : > { %1959 = vmatpush.msra.mxu1 %v3447_v47  ;;  %1979 = vmatpush.msra.mxu2 %v3449_v38  ;;  %3821 = vst [vmem:[#allocation23_spill] sm:$0xff] %v3463_v41 }
 0x189   : > { %v3325_v59 = vpop.f32.mrf.mxu0  ;;  %v3327_v62 = vpop.f32.mrf.mxu1  ;;  %1999 = vmatpush.msra.mxu3 %v3455_v48  ;;  %1940 = vmatpush.msra.mxu0 %v3463_v41  ;;  %v3481_v48 = vld [vmem:[#allocation10 + $0x60] sm:$0xff] }
 0x18a   : > { %v3335_v14 = vpop.f32.mrf.mxu2  ;;  %v3341_v5 = vpop.f32.mrf.mxu3  ;;  %1960 = vmatpush.msra.mxu1 %v3465_v46  ;;  %1980 = vmatpush.msra.mxu2 %v3467_v9  ;;  %v985_v46 = vadd.f32 %v3317_v7, %v890_v53  ;;  %v3499_v9 = vld [vmem:[#allocation10 + $0x50] sm:$0xff]  ;;  %v3503_v7 = vld [vmem:[#allocation10 + $0x58] sm:$0xff]  ;;  %v1169_v42 = vadd.f32 %v3325_v59, %v1078_v40  ;;  %v1170_v57 = vadd.f32 %v3327_v62, %v1079_v2  ;;  %v3522_v40 = vld [vmem:[#allocation10 + $0x148] sm:$0xff] }
 0x18b   : > { %2000 = vmatpush.msra.mxu3 %v3474_v10  ;;  %1941 = vmatpush.msra.mxu0 %v3481_v48  ;;  %v986_v10 = vadd.f32 %v3319_v58, %v891_v55  ;;  %v3508_v53 = vld [vmem:[#allocation10 + $0x158] sm:$0xff]  ;;  %v3513_v58 = vld [vmem:[#allocation10 + $0x40] sm:$0xff]  ;;  %v3517_v55 = vld [vmem:[#allocation10 + $0x48] sm:$0xff]  ;;  %3829 = vst [vmem:[#allocation31_spill] sm:$0xff] %v3522_v40 }
 0x18c   : > { %1961 = vmatpush.msra.mxu1 %v3483_v45  ;;  %1981 = vmatpush.msra.mxu2 %v3485_v50  ;;  %3826 = vst [vmem:[#allocation28_spill] sm:$0xff] %v3508_v53  ;;  %v1080_v59 = vadd.f32 %v3321_v60, %v985_v46  ;;  %v3527_v2 = vld [vmem:[#allocation10 + $0x30] sm:$0xff]  ;;  %v1269_v60 = vadd.f32 %v3335_v14, %v1169_v42  ;;  %v3545_v14 = vld [vmem:[#allocation10 + $0x120] sm:$0xff] }
 0x18d   : > { %2001 = vmatpush.msra.mxu3 %v3493_v51  ;;  %1942 = vmatpush.msra.mxu0 %v3499_v9  ;;  %3828 = vst [vmem:[#allocation30_spill] sm:$0xff] %v3517_v55  ;;  %v1081_v62 = vadd.f32 %v3323_v61, %v986_v10  ;;  %v1270_v61 = vadd.f32 %v3341_v5, %v1170_v57  ;;  %v3552_v5 = vld [vmem:[#allocation10 + $0x128] sm:$0xff]  ;;  %v3556_v57 = vld [vmem:[#allocation10 + $0x110] sm:$0xff] }
 0x18e   : > { %1962 = vmatpush.msra.mxu1 %v3501_v56  ;;  %1982 = vmatpush.msra.mxu2 %v3503_v7  ;;  %v3531_v56 = vld [vmem:[#allocation10 + $0x38] sm:$0xff]  ;;  %3834 = vst [vmem:[#allocation36_spill] sm:$0xff] %v3545_v14 }
 0x18f   : > { %2002 = vmatpush.msra.mxu3 %v3508_v53  ;;  %1943 = vmatpush.msra.mxu0 %v3513_v58  ;;  %v3529_v53 = vld [vmem:[#allocation10 + $0x130] sm:$0xff]  ;;  %3831 = vst [vmem:[#allocation33_spill] sm:$0xff] %v3531_v56 }
 0x190   : > { %1963 = vmatpush.msra.mxu1 %v3515_v44  ;;  %1983 = vmatpush.msra.mxu2 %v3517_v55  ;;  %3830 = vst [vmem:[#allocation32_spill] sm:$0xff] %v3529_v53  ;;  %v3537_v44 = vld [vmem:[#allocation10 + $0x138] sm:$0xff]  ;;  %v3543_v55 = vld [vmem:[#allocation10 + $0x20] sm:$0xff] }
 0x191   : > { %2003 = vmatpush.msra.mxu3 %v3522_v40  ;;  %1944 = vmatpush.msra.mxu0 %v3527_v2  ;;  %3832 = vst [vmem:[#allocation34_spill] sm:$0xff] %v3537_v44 }
 0x192   : > { %1964 = vmatpush.msra.mxu1 %v3529_v53  ;;  %1984 = vmatpush.msra.mxu2 %v3531_v56  ;;  %3833 = vst [vmem:[#allocation35_spill] sm:$0xff] %v3543_v55  ;;  %v3561_v53 = vld [vmem:[#allocation10 + $0x18] sm:$0xff]  ;;  %v3570_v56 = vld [vmem:[#allocation10 + $0x100] sm:$0xff] }
 0x193   : > { %v3345_v6 = vpop.f32.mrf.mxu0  ;;  %2004 = vmatpush.msra.mxu3 %v3537_v44  ;;  %1945 = vmatpush.msra.mxu0 %v3543_v55  ;;  %3836 = vst [vmem:[#allocation38_spill] sm:$0xff] %v3552_v5 }
 0x194   : > { %v3347_v8 = vpop.f32.mrf.mxu1  ;;  %v3349_v3 = vpop.f32.mrf.mxu2  ;;  %v1171_v46 = vadd.f32 %v3345_v6, %v1080_v59  ;;  %v3547_v6 = vld [vmem:[#allocation10 + $0x28] sm:$0xff]  ;;  %1965 = vmatpush.msra.mxu1 %v3545_v14  ;;  %3837 = vst [vmem:[#allocation39_spill] sm:$0xff] %v3556_v57 }
 0x195   : > { %v3351_v4 = vpop.f32.mrf.mxu3  ;;  %v1172_v10 = vadd.f32 %v3347_v8, %v1081_v62  ;;  %3835 = vst [vmem:[#allocation37_spill] sm:$0xff] %v3547_v6  ;;  %v3554_v8 = vld [vmem:[#allocation10 + $0x10] sm:$0xff]  ;;  %1985 = vmatpush.msra.mxu2 %v3547_v6  ;;  %2005 = vmatpush.msra.mxu3 %v3552_v5 }
 0x196   : > { %v1271_v14 = vadd.f32 %v3349_v3, %v1171_v46  ;;  %1946 = vmatpush.msra.mxu0 %v3554_v8  ;;  %1966 = vmatpush.msra.mxu1 %v3556_v57 }
 0x197   : > { %v1272_v5 = vadd.f32 %v3351_v4, %v1172_v10  ;;  %1986 = vmatpush.msra.mxu2 %v3561_v53 }
 0x198   : > { %1967 = vmatpush.msra.mxu1 %v3570_v56 }
 0x19a   : > { %2065 = vmatpush.msrb.mxu1 %v3331_v11 }
 0x19c   : > { %2066 = vmatpush.msrb.mxu1 %v3363_v15 }
 0x19e   : > { %2067 = vmatpush.msrb.mxu1 %v3375_v19 }
 0x1a0   : > { %2068 = vmatpush.msrb.mxu1 %v3387_v23 }
 0x1a2   : > { %2069 = vmatpush.msrb.mxu1 %v3401_v27 }
 0x1a4   : > { %2070 = vmatpush.msrb.mxu1 %v3417_v33  ;;  %v3842_v33 = vld [vmem:[#allocation21_spill] sm:$0xff] }
 0x1ad   : > { %v3353_v52 = vpop.f32.mrf.mxu0 }
 0x1ae   : > { %v3355_v54 = vpop.f32.mrf.mxu1  ;;  %v3357_v12 = vpop.f32.mrf.mxu2  ;;  %v1364_v42 = vadd.f32 %v3353_v52, %v1269_v60  ;;  %v3563_v52 = vld [vmem:[#allocation10 + $0x118] sm:$0xff]  ;;  %v3565_v60 = vld [vmem:[#allocation10] sm:$0xff] }
 0x1af   : > { %v3359_v13 = vpop.f32.mrf.mxu3  ;;  %v1365_v62 = vadd.f32 %v3355_v54, %v1270_v61  ;;  %v3572_v54 = vld [vmem:[#allocation10 + $0x8] sm:$0xff]  ;;  %2006 = vmatpush.msra.mxu3 %v3563_v52  ;;  %1947 = vmatpush.msra.mxu0 %v3565_v60 }
 0x1b0   : > { %v3574_v61 = vld [vmem:[#allocation10 + $0x108] sm:$0xff]  ;;  %v1459_v6 = vadd.f32 %v3357_v12, %v1364_v42  ;;  %1987 = vmatpush.msra.mxu2 %v3572_v54 }
 0x1b1   : > { %v1460_v46 = vadd.f32 %v3359_v13, %v1365_v62  ;;  %2007 = vmatpush.msra.mxu3 %v3574_v61  ;;  %2045 = vmatpush.msrb.mxu0 %v3329_v63  ;;  %v3846_v42 = vld [vmem:[#allocation25_spill] sm:$0xff] }
 0x1b2   : > { %2085 = vmatpush.msrb.mxu2 %v3333_v0 }
 0x1b3   : > { %2105 = vmatpush.msrb.mxu3 %v3339_v1  ;;  %2046 = vmatpush.msrb.mxu0 %v3361_v43 }
 0x1b4   : > { %2086 = vmatpush.msrb.mxu2 %v3365_v17 }
 0x1b5   : > { %2106 = vmatpush.msrb.mxu3 %v3369_v30  ;;  %2047 = vmatpush.msrb.mxu0 %v3373_v18  ;;  %v1844_v30 = vld [vmem:[#allocation5] sm:$0x3] }
 0x1b6   : > { %2087 = vmatpush.msrb.mxu2 %v3377_v20 }
 0x1b7   : > { %v3395_v25 = vpop.f32.mrf.mxu0  ;;  %2107 = vmatpush.msrb.mxu3 %v3381_v21  ;;  %2048 = vmatpush.msrb.mxu0 %v3385_v22  ;;  %v1846_v22 = vperm.slane %v1844_v30, 0 }
 0x1b8   : > { %v3405_v29 = vpop.f32.mrf.mxu1  ;;  %v3411_v32 = vpop.f32.mrf.mxu2  ;;  %v1366_v3 = vadd.f32 %v3395_v25, %v1271_v14  ;;  %2088 = vmatpush.msrb.mxu2 %v3389_v24 }
 0x1b9   : > { %v3421_v36 = vpop.f32.mrf.mxu3  ;;  %v1367_v57 = vadd.f32 %v3405_v29, %v1272_v5  ;;  %2108 = vmatpush.msrb.mxu3 %v3393_v16  ;;  %2049 = vmatpush.msrb.mxu0 %v3399_v26  ;;  %v1847_v16 = vperm.slane %v1844_v30, 1  ;;  %v3847_v5 = vld [vmem:[#allocation24_spill] sm:$0xff] }
 0x1ba   : > { %v1461_v13 = vadd.f32 %v3411_v32, %v1366_v3  ;;  %2089 = vmatpush.msrb.mxu2 %v3403_v28  ;;  %v3838_v28 = vld [vmem:[#allocation16_spill] sm:$0xff] }
 0x1bb   : > { %2109 = vmatpush.msrb.mxu3 %v3409_v31  ;;  %2050 = vmatpush.msrb.mxu0 %v3415_v34  ;;  %v3840_v34 = vld [vmem:[#allocation18_spill] sm:$0xff] }
 0x1bc   : > { %2090 = vmatpush.msrb.mxu2 %v3419_v35 }
 0x1bd   : > { %2110 = vmatpush.msrb.mxu3 %v3838_v28  ;;  %2051 = vmatpush.msrb.mxu0 %v3429_v39  ;;  %v3843_v39 = vld [vmem:[#allocation20_spill] sm:$0xff] }
 0x1be   : > { %2091 = vmatpush.msrb.mxu2 %v3433_v37  ;;  %v3844_v37 = vld [vmem:[#allocation22_spill] sm:$0xff] }
 0x1bf   : > { %2111 = vmatpush.msrb.mxu3 %v3840_v34 }
 0x1c0   : > { %2092 = vmatpush.msrb.mxu2 %v3842_v33 }
 0x1c1   : > { %2112 = vmatpush.msrb.mxu3 %v3844_v37 }
 0x1c2   : > { %2093 = vmatpush.msrb.mxu2 %v3846_v42 }
 0x1c4   : > { %2094 = vmatpush.msrb.mxu2 %v3485_v50 }
 0x1c6   : > { %2095 = vmatpush.msrb.mxu2 %v3503_v7 }
 0x1d1   : > { %v3459_v49 = vpop.f32.mrf.mxu0 }
 0x1d2   : > { %v3470_v47 = vpop.f32.mrf.mxu1  ;;  %v3477_v38 = vpop.f32.mrf.mxu2  ;;  %v1550_v4 = vadd.f32 %v3459_v49, %v1459_v6  ;;  %v1462_v49 = vadd.f32 %v3421_v36, %v1367_v57  ;;  %v3845_v6 = vld [vmem:[#allocation23_spill] sm:$0xff]  ;;  %v3848_v57 = vld [vmem:[#allocation26_spill] sm:$0xff] }
 0x1d3   : > { %v3489_v41 = vpop.f32.mrf.mxu3  ;;  %v1551_v12 = vadd.f32 %v3470_v47, %v1460_v46  ;;  %2113 = vmatpush.msrb.mxu3 %v3848_v57 }
 0x1d4   : > { %v1650_v63 = vadd.f32 %v3477_v38, %v1550_v4 }
 0x1d5   : > { %v1651_v1 = vadd.f32 %v3489_v41, %v1551_v12  ;;  %v3839_v41 = vld [vmem:[#allocation17_spill] sm:$0xff]  ;;  %2114 = vmatpush.msrb.mxu3 %v3493_v51  ;;  %v3849_v12 = vld [vmem:[#allocation27_spill] sm:$0xff] }
 0x1d6   : > { %2071 = vmatpush.msrb.mxu1 %v3839_v41 }
 0x1d8   : > { %2072 = vmatpush.msrb.mxu1 %v3843_v39 }
 0x1da   : > { %2073 = vmatpush.msrb.mxu1 %v3847_v5 }
 0x1db   : > { %v1524_v40 = vpop.f32.mrf.mxu0 }
 0x1dc   : > { %v1547_v59 = vpop.f32.mrf.mxu1  ;;  %v1624_v44 = vpop.f32.mrf.mxu2  ;;  %v1552_v0 = vadd.f32 %v1524_v40, %v1461_v13  ;;  %2074 = vmatpush.msrb.mxu1 %v3483_v45  ;;  %v3853_v45 = vld [vmem:[#allocation31_spill] sm:$0xff] }
 0x1dd   : > { %v1647_v55 = vpop.f32.mrf.mxu3  ;;  %v1553_v43 = vadd.f32 %v1547_v59, %v1462_v49  ;;  %v3855_v49 = vld [vmem:[#allocation32_spill] sm:$0xff] }
 0x1de   : > { %v1652_v18 = vadd.f32 %v1624_v44, %v1552_v0  ;;  %v3841_v44 = vld [vmem:[#allocation19_spill] sm:$0xff]  ;;  %2075 = vmatpush.msrb.mxu1 %v3849_v12 }
 0x1df   : > { %v1653_v20 = vadd.f32 %v1647_v55, %v1553_v43  ;;  %2052 = vmatpush.msrb.mxu0 %v3841_v44  ;;  %v3857_v0 = vld [vmem:[#allocation35_spill] sm:$0xff]  ;;  %v3860_v43 = vld [vmem:[#allocation38_spill] sm:$0xff] }
 0x1e1   : > { %2053 = vmatpush.msrb.mxu0 %v3845_v6 }
 0x1e3   : > { %2054 = vmatpush.msrb.mxu0 %v3481_v48  ;;  %v3851_v48 = vld [vmem:[#allocation30_spill] sm:$0xff] }
 0x1e4   : > { %2096 = vmatpush.msrb.mxu2 %v3851_v48 }
 0x1e5   : > { %2055 = vmatpush.msrb.mxu0 %v3499_v9  ;;  %v3854_v9 = vld [vmem:[#allocation33_spill] sm:$0xff] }
 0x1e6   : > { %2097 = vmatpush.msrb.mxu2 %v3854_v9 }
 0x1e7   : > { %2056 = vmatpush.msrb.mxu0 %v3513_v58  ;;  %v3858_v58 = vld [vmem:[#allocation37_spill] sm:$0xff] }
 0x1e8   : > { %2098 = vmatpush.msrb.mxu2 %v3858_v58  ;;  %v2155_v58 = vld [vmem:[#allocation7] sm:$0x3] }
 0x1e9   : > { %2057 = vmatpush.msrb.mxu0 %v3527_v2 }
 0x1ea   : > { %2099 = vmatpush.msrb.mxu2 %v3561_v53 }
 0x1eb   : > { %2058 = vmatpush.msrb.mxu0 %v3857_v0 }
 0x1ec   : > { %2100 = vmatpush.msrb.mxu2 %v3572_v54 }
 0x1ed   : > { %2059 = vmatpush.msrb.mxu0 %v3554_v8  ;;  %v2966_v8 = vmov 512.0  }
 0x1ee   : > { %2708 = vrcp.f32 %v2966_v8 }
 0x1ef   : > { %2060 = vmatpush.msrb.mxu0 %v3565_v60 }
 0x1f4   : > { %v1716_v25 = vpop.f32.mrf.mxu0  ;;  %v2709_v53 = vpop.eup %2708 }
 0x1f5   : > { %v1739_v29 = vpop.f32.mrf.mxu1  ;;  %v1745_v17 = vadd.f32 %v1716_v25, %v1650_v63  ;;  %v3850_v25 = vld [vmem:[#allocation28_spill] sm:$0xff]  ;;  %v2013_v30 = vmul.f32 512.0, %v2709_v53  ;;  %vm2017_vm6 = vweird.f32 %v2709_v53 }
 0x1f6   : > { %v1811_v10 = vpop.f32.mrf.mxu2  ;;  %v1746_v15 = vadd.f32 %v1739_v29, %v1651_v1  ;;  %2115 = vmatpush.msrb.mxu3 %v3850_v25  ;;  %v3852_v29 = vld [vmem:[#allocation29_spill] sm:$0xff]  ;;  %v3859_v1 = vld [vmem:[#allocation36_spill] sm:$0xff] }
 0x1f7   : > { %v1834_v11 = vpop.f32.mrf.mxu3  ;;  %v1840_v21 = vadd.f32 %v1811_v10, %v1745_v17  ;;  %2076 = vmatpush.msrb.mxu1 %v3852_v29  ;;  %v3856_v10 = vld [vmem:[#allocation34_spill] sm:$0xff] }
 0x1f8   : > { %v1841_v23 = vadd.f32 %v1834_v11, %v1746_v15  ;;  %2116 = vmatpush.msrb.mxu3 %v3853_v45  ;;  %v3861_v15 = vld [vmem:[#allocation39_spill] sm:$0xff] }
 0x1f9   : > { %v3621_v35 = vadd.f32 %v1846_v22, %v1840_v21  ;;  %2077 = vmatpush.msrb.mxu1 %v3855_v49 }
 0x1fa   : > { %v3627_v55 = vadd.f32 %v1847_v16, %v1841_v23  ;;  %2117 = vmatpush.msrb.mxu3 %v3856_v10 }
 0x1fb   : > { %2078 = vmatpush.msrb.mxu1 %v3859_v1 }
 0x1fc   : > { %v1719_v19 = vpop.f32.mrf.mxu0  ;;  %2118 = vmatpush.msrb.mxu3 %v3860_v43  ;;  %v2165_v43 = vld [vmem:[#allocation8] sm:$0x3] }
 0x1fd   : > { %v1747_v24 = vadd.f32 %v1719_v19, %v1652_v18  ;;  %v1742_v32 = vpop.f32.mrf.mxu1  ;;  %2079 = vmatpush.msrb.mxu1 %v3861_v15  ;;  %v2014_v18 = vsub.f32 1.0, %v2013_v30  ;;  %v2157_v15 = vperm.slane %v2155_v58, 0 }
 0x1fe   : > { %v1748_v36 = vadd.f32 %v1742_v32, %v1653_v20  ;;  %v1814_v26 = vpop.f32.mrf.mxu2  ;;  %2119 = vmatpush.msrb.mxu3 %v3563_v52 }
 0x1ff   : > { %v1842_v38 = vadd.f32 %v1814_v26, %v1747_v24  ;;  %v1837_v27 = vpop.f32.mrf.mxu3  ;;  %2080 = vmatpush.msrb.mxu1 %v3570_v56  ;;  %v2015_v20 = vmul.f32 %v2709_v53, %v2014_v18  ;;  %v2167_v18 = vperm.slane %v2165_v43, 0 }
 0x200   : > { %v1843_v31 = vadd.f32 %v1837_v27, %v1748_v36  ;;  %2120 = vmatpush.msrb.mxu3 %v3574_v61 }
 0x201   : > { %v3623_v47 = vadd.f32 %v1846_v22, %v1842_v38  ;;  %v2016_v19 = vadd.f32 %v2709_v53, %v2015_v20 }
 0x202   : > { %v3629_v40 = vadd.f32 %v1847_v16, %v1843_v31 }
 0x203   : > { %v1854_v14 = vadd.f32 %v3623_v47, %v3621_v35  ;;  %v2018_v22 = vsel %vm2017_vm6, %v2709_v53, %v2016_v19 }
 0x204   : > { %v1861_v59 = vadd.f32 %v3629_v40, %v3627_v55 }
 0x205   : > { %v1855_v62 = vrot.slane %v1854_v14, 4 }
 0x206   : > { %v1862_v3 = vrot.slane %v1861_v59, 4 }
 0x207   : > { %v1856_v46 = vadd.f32 %v1855_v62, %v1854_v14 }
 0x208   : > { %v1863_v4 = vadd.f32 %v1862_v3, %v1861_v59 }
 0x209   : > { %v1857_v13 = vrot.slane %v1856_v46, 2 }
 0x20a   : > { %v1864_v50 = vrot.slane %v1863_v4, 2 }
 0x20b   : > { %v1858_v51 = vadd.f32 %v1857_v13, %v1856_v46 }
 0x20c   : > { %v1865_v7 = vadd.f32 %v1864_v50, %v1863_v4 }
 0x20d   : > { %v1859_v63 = vrot.slane %v1858_v51, 1 }
 0x20e   : > { %v1866_v11 = vrot.slane %v1865_v7, 1 }
 0x20f   : > { %v1860_v17 = vadd.f32 %v1859_v63, %v1858_v51 }
 0x210   : > { %v1867_v2 = vadd.f32 %v1866_v11, %v1865_v7 }
 0x211   : > { %1948 = vmatmul.f32.vlgmr.msra.gmra.mxu0 %v1860_v17  ;;  %1988 = vmatmul.f32.vlgmr.msra.gmra.mxu2 %v1860_v17 }
 0x212   : > { %1968 = vmatmul.f32.vlgmr.msra.gmra.mxu1 %v1867_v2  ;;  %2008 = vmatmul.f32.vlgmr.msra.gmra.mxu3 %v1867_v2 }
 0x28e   : > { %v1949_v52 = vpop.f32.mrf.mxu0 }
 0x28f   : > { %v1969_v21 = vpop.f32.mrf.mxu1 }
 0x290   : > { %v1970_v24 = vadd.f32 %v1969_v21, %v1949_v52 }
 0x292   : > { %v2019_v32 = vmul.f32 %v2018_v22, %v1970_v24 }
 0x294   : > { %v2021_v60 = vperm.slane %v2019_v32, 0  ;;  %v1989_v23 = vpop.f32.mrf.mxu2 }
 0x295   : > { %v2009_v54 = vpop.f32.mrf.mxu3 }
 0x296   : > { %v2023_v56 = vsub.f32 %v3621_v35, %v2021_v60  ;;  %v2025_v61 = vsub.f32 %v3623_v47, %v2021_v60  ;;  %v2010_v16 = vadd.f32 %v2009_v54, %v1989_v23  ;;  %v2158_v60 = vperm.slane %v2155_v58, 1 }
 0x298   : > { %v2027_v36 = vmul.f32 %v2023_v56, %v2023_v56  ;;  %v2029_v26 = vmul.f32 %v2025_v61, %v2025_v61  ;;  %v2020_v28 = vmul.f32 %v2018_v22, %v2010_v16  ;;  %v2168_v16 = vperm.slane %v2165_v43, 1 }
 0x29a   : > { %v2031_v38 = vadd.f32 %v2029_v26, %v2027_v36  ;;  %v2022_v27 = vperm.slane %v2020_v28, 0 }
 0x29c   : > { %v2032_v31 = vrot.slane %v2031_v38, 4  ;;  %v3672_v41 = vsub.f32 %v3627_v55, %v2022_v27  ;;  %v3675_v34 = vsub.f32 %v3629_v40, %v2022_v27 }
 0x29e   : > { %v2033_v44 = vadd.f32 %v2032_v31, %v2031_v38  ;;  %v2028_v33 = vmul.f32 %v3672_v41, %v3672_v41  ;;  %v2030_v35 = vmul.f32 %v3675_v34, %v3675_v34 }
 0x2a0   : > { %v2038_v47 = vadd.f32 %v2030_v35, %v2028_v33  ;;  %v2034_v39 = vrot.slane %v2033_v44, 2 }
 0x2a2   : > { %v2039_v37 = vrot.slane %v2038_v47, 4  ;;  %v2035_v14 = vadd.f32 %v2034_v39, %v2033_v44 }
 0x2a4   : > { %v2040_v6 = vadd.f32 %v2039_v37, %v2038_v47  ;;  %v2036_v42 = vrot.slane %v2035_v14, 1 }
 0x2a6   : > { %v2037_v59 = vadd.f32 %v2036_v42, %v2035_v14  ;;  %v2041_v5 = vrot.slane %v2040_v6, 2 }
 0x2a8   : > { %2061 = vmatmul.f32.vlgmr.msrb.gmra.mxu0 %v2037_v59  ;;  %2101 = vmatmul.f32.vlgmr.msrb.gmra.mxu2 %v2037_v59  ;;  %v2042_v55 = vadd.f32 %v2041_v5, %v2040_v6 }
 0x2aa   : > { %v2043_v40 = vrot.slane %v2042_v55, 1 }
 0x2ac   : > { %v2044_v57 = vadd.f32 %v2043_v40, %v2042_v55 }
 0x2ae   : > { %2081 = vmatmul.f32.vlgmr.msrb.gmra.mxu1 %v2044_v57  ;;  %2121 = vmatmul.f32.vlgmr.msrb.gmra.mxu3 %v2044_v57 }
 0x325   : > { %v2062_v62 = vpop.f32.mrf.mxu0 }
 0x32b   : > { %v2082_v3 = vpop.f32.mrf.mxu1  ;;  %v2102_v25 = vpop.f32.mrf.mxu2 }
 0x32c   : > { %v2083_v46 = vadd.f32 %v2082_v3, %v2062_v62 }
 0x32e   : > { %v2125_v4 = vmul.f32 %v2083_v46, %v2018_v22 }
 0x330   : > { %v2127_v12 = vadd.f32 1e-05, %v2125_v4 }
 0x331   : > { %v2122_v13 = vpop.f32.mrf.mxu3 }
 0x332   : > { %2710 = vrsqrt.f32 %v2127_v12  ;;  %v2123_v48 = vadd.f32 %v2122_v13, %v2102_v25  ;;  %vm2135_vm8 = vweird.f32 %v2127_v12 }
 0x334   : > { %v2126_v50 = vmul.f32 %v2123_v48, %v2018_v22 }
 0x336   : > { %v2128_v29 = vadd.f32 1e-05, %v2126_v50 }
 0x338   : > { %v2711_v45 = vpop.eup %2710  ;;  %2712 = vrsqrt.f32 %v2128_v29  ;;  %vm2145_vm11 = vweird.f32 %v2128_v29 }
 0x339   : > { %v2130_v51 = vmul.f32 %v2711_v45, %v2127_v12  ;;  %vm2136_vm7 = vweird.f32 %v2711_v45 }
 0x33a   : > { %vm2137_vm9 = vmor %vm2135_vm8, %vm2136_vm7 }
 0x33b   : > { %v2131_v9 = vmul.f32 %v2711_v45, %v2130_v51 }
 0x33d   : > { %v2132_v7 = vmul.f32 0.5, %v2131_v9 }
 0x33e   : > { %v2713_v49 = vpop.eup %2712 }
 0x33f   : > { %v2133_v10 = vsub.f32 1.5, %v2132_v7  ;;  %v2140_v63 = vmul.f32 %v2713_v49, %v2128_v29  ;;  %vm2146_vm10 = vweird.f32 %v2713_v49 }
 0x340   : > { %vm2147_vm12 = vmor %vm2145_vm11, %vm2146_vm10 }
 0x341   : > { %v2134_v0 = vmul.f32 %v2711_v45, %v2133_v10  ;;  %v2141_v11 = vmul.f32 %v2713_v49, %v2140_v63 }
 0x343   : > { %v2138_v1 = vsel %vm2137_vm9, %v2711_v45, %v2134_v0  ;;  %v2142_v17 = vmul.f32 0.5, %v2141_v11 }
 0x344   : > { %v2149_v2 = vperm.slane %v2138_v1, 0 }
 0x345   : > { %v2143_v8 = vsub.f32 1.5, %v2142_v17 }
 0x346   : > { %v2151_v53 = vmul.f32 %v2149_v2, %v2023_v56  ;;  %v2153_v30 = vmul.f32 %v2149_v2, %v2025_v61 }
 0x347   : > { %v2144_v20 = vmul.f32 %v2713_v49, %v2143_v8 }
 0x348   : > { %v2161_v19 = vmul.f32 %v2157_v15, %v2151_v53  ;;  %v2163_v52 = vmul.f32 %v2157_v15, %v2153_v30 }
 0x349   : > { %v2148_v21 = vsel %vm2147_vm12, %v2713_v49, %v2144_v20 }
 0x34a   : > { %v3681_v22 = vadd.f32 %v2167_v18, %v2161_v19  ;;  %v3683_v24 = vadd.f32 %v2167_v18, %v2163_v52  ;;  %v2150_v32 = vperm.slane %v2148_v21, 0 }
 0x34c   : > { %v3686_v23 = vmul.f32 0.70710677, %v3681_v22  ;;  %v3689_v54 = vmul.f32 0.70710677, %v3683_v24  ;;  %v2152_v56 = vmul.f32 %v2150_v32, %v3672_v41  ;;  %v2154_v61 = vmul.f32 %v2150_v32, %v3675_v34 }
 0x34e   : > { %v2179_v36 = vand.u32 2147483647, %v3686_v23  ;;  %v2181_v26 = vand.u32 2147483647, %v3689_v54  ;;  %v2162_v28 = vmul.f32 %v2158_v60, %v2152_v56  ;;  %v2164_v38 = vmul.f32 %v2158_v60, %v2154_v61 }
 0x350   : > { %v2183_v27 = vmul.f32 0.3275911, %v2179_v36  ;;  %v2185_v31 = vmul.f32 0.3275911, %v2181_v26  ;;  %v3695_v44 = vadd.f32 %v2168_v16, %v2162_v28  ;;  %v3697_v33 = vadd.f32 %v2168_v16, %v2164_v38 }
 0x351   : > { %v2287_v3 = vsub.f32 0.0, %v2179_v36  ;;  %v2289_v12 = vsub.f32 0.0, %v2181_v26 }
 0x352   : > { %v2187_v35 = vadd.f32 1.0, %v2183_v27  ;;  %v2189_v47 = vadd.f32 1.0, %v2185_v31  ;;  %v3700_v39 = vmul.f32 0.70710677, %v3695_v44  ;;  %v3703_v41 = vmul.f32 0.70710677, %v3697_v33 }
 0x353   : > { %v2291_v51 = vmul.f32 %v2287_v3, %v2179_v36  ;;  %v2293_v49 = vmul.f32 %v2289_v12, %v2181_v26 }
 0x354   : > { %2714 = vrcp.f32 %v2187_v35  ;;  %v3706_v34 = vand.u32 2147483647, %v3700_v39  ;;  %v3709_v37 = vand.u32 2147483647, %v3703_v41  ;;  %v2202_v46 = vand.u32 2147483648, %v2187_v35 }
 0x355   : > { %2716 = vrcp.f32 %v2189_v47  ;;  %v2200_v13 = vand.u32 2147483647, %v2187_v35  ;;  %v2232_v48 = vand.u32 2147483648, %v2189_v47  ;;  %v2230_v29 = vand.u32 2147483647, %v2189_v47 }
 0x356   : > { %v2184_v14 = vmul.f32 0.3275911, %v3706_v34  ;;  %v2186_v6 = vmul.f32 0.3275911, %v3709_v37  ;;  %vm2196_vm15 = vweird.f32 %v2187_v35  ;;  %v2203_v9 = vor.u32 1.1754944e-38, %v2202_v46 }
 0x357   : > { %vm2226_vm1 = vweird.f32 %v2189_v47  ;;  %vm2201_vm2 = vcmp.eq.f32.partialorder %v2200_v13, 8.507059e+37  ;;  %v2233_v0 = vor.u32 1.1754944e-38, %v2232_v48  ;;  %vm2231_vm4 = vcmp.eq.f32.partialorder %v2230_v29, 8.507059e+37 }
 0x358   : > { %v3713_v55 = vadd.f32 1.0, %v2184_v14  ;;  %v3715_v40 = vadd.f32 1.0, %v2186_v6  ;;  %v2295_v15 = vmul.f32 1.442695, %v2291_v51  ;;  %v2299_v30 = vmul.f32 1.442695, %v2293_v49 }
 0x359   : > { %v2288_v38 = vsub.f32 0.0, %v3706_v34  ;;  %v2290_v3 = vsub.f32 0.0, %v3709_v37 }
 0x35a   : > { %v2715_v42 = vpop.eup %2714  ;;  %2718 = vrcp.f32 %v3713_v55  ;;  %v2215_v19 = vand.u32 2147483647, %v3713_v55  ;;  %v2217_v52 = vand.u32 2147483648, %v3713_v55  ;;  %v2247_v56 = vand.u32 2147483648, %v3715_v40 }
 0x35b   : > { %v2717_v59 = vpop.eup %2716  ;;  %v2192_v5 = vmul.f32 %v2715_v42, %v2187_v35  ;;  %2720 = vrcp.f32 %v3715_v40  ;;  %vm2197_vm13 = vweird.f32 %v2715_v42  ;;  %v2245_v36 = vand.u32 2147483647, %v3715_v40 }
 0x35c   : > { %v2222_v57 = vmul.f32 %v2717_v59, %v2189_v47  ;;  %vm2227_vm14 = vweird.f32 %v2717_v59  ;;  %vm2198_vm0 = vmor %vm2196_vm15, %vm2197_vm13  ;;  %vm2211_vm7 = vweird.f32 %v3713_v55  ;;  %v2218_v31 = vor.u32 1.1754944e-38, %v2217_v52 }
 0x35d   : > { %v2193_v62 = vsub.f32 1.0, %v2192_v5  ;;  %vm2228_vm3 = vmor %vm2226_vm1, %vm2227_vm14  ;;  %vm2241_vm9 = vweird.f32 %v3715_v40  ;;  %vm2216_vm10 = vcmp.eq.f32.partialorder %v2215_v19, 8.507059e+37  ;;  %v2248_v6 = vor.u32 1.1754944e-38, %v2247_v56 }
 0x35e   : > { %v2223_v4 = vsub.f32 1.0, %v2222_v57  ;;  %vm2246_vm12 = vcmp.eq.f32.partialorder %v2245_v36, 8.507059e+37  ;;  %2722 = vpow2.f32 %v2295_v15  ;;  %v2292_v48 = vmul.f32 %v2288_v38, %v3706_v34 }
 0x35f   : > { %v2194_v25 = vmul.f32 %v2715_v42, %v2193_v62  ;;  %2724 = vpow2.f32 %v2299_v30  ;;  %vm2311_vm13 = vcmp.lt.f32.partialorder %v3686_v23, 0.0  ;;  %vm2313_vm14 = vcmp.lt.f32.partialorder %v3689_v54, 0.0 }
 0x360   : > { %v2224_v50 = vmul.f32 %v2717_v59, %v2223_v4  ;;  %v2719_v10 = vpop.eup %2718  ;;  %vm2312_vm15 = vcmp.lt.f32.partialorder %v3700_v39, 0.0 }
 0x361   : > { %v2195_v45 = vadd.f32 %v2715_v42, %v2194_v25  ;;  %v2721_v58 = vpop.eup %2720  ;;  %v2207_v43 = vmul.f32 %v2719_v10, %v3713_v55  ;;  %vm2212_vm5 = vweird.f32 %v2719_v10 }
 0x362   : > { %v2225_v7 = vadd.f32 %v2717_v59, %v2224_v50  ;;  %v2237_v8 = vmul.f32 %v2721_v58, %v3715_v40  ;;  %vm2242_vm6 = vweird.f32 %v2721_v58  ;;  %vm2213_vm8 = vmor %vm2211_vm7, %vm2212_vm5 }
 0x363   : > { %v2199_v63 = vsel %vm2198_vm0, %v2715_v42, %v2195_v45  ;;  %v2208_v18 = vsub.f32 1.0, %v2207_v43  ;;  %vm2243_vm11 = vmor %vm2241_vm9, %vm2242_vm6  ;;  %v2294_v45 = vmul.f32 %v2290_v3, %v3709_v37  ;;  %vm2314_vm0 = vcmp.lt.f32.partialorder %v3703_v41, 0.0 }
 0x364   : > { %v2204_v11 = vsel %vm2201_vm2, %v2203_v9, %v2199_v63  ;;  %v2229_v1 = vsel %vm2228_vm3, %v2717_v59, %v2225_v7  ;;  %v2238_v21 = vsub.f32 1.0, %v2237_v8 }
 0x365   : > { %v2234_v17 = vsel %vm2231_vm4, %v2233_v0, %v2229_v1  ;;  %v2251_v2 = vmul.f32 1.0614054, %v2204_v11  ;;  %v2209_v60 = vmul.f32 %v2719_v10, %v2208_v18  ;;  %v2297_v0 = vmul.f32 1.442695, %v2292_v48 }
 0x366   : > { %v2253_v53 = vmul.f32 1.0614054, %v2234_v17  ;;  %v2239_v16 = vmul.f32 %v2721_v58, %v2238_v21 }
 0x367   : > { %v2255_v20 = vadd.f32 -1.4531521, %v2251_v2  ;;  %v2210_v28 = vadd.f32 %v2719_v10, %v2209_v60  ;;  %v2301_v2 = vmul.f32 1.442695, %v2294_v45  ;;  %2726 = vpow2.f32 %v2297_v0 }
 0x368   : > { %v2257_v32 = vadd.f32 -1.4531521, %v2253_v53  ;;  %v2240_v35 = vadd.f32 %v2721_v58, %v2239_v16 }
 0x369   : > { %v2259_v61 = vmul.f32 %v2255_v20, %v2204_v11  ;;  %v2214_v14 = vsel %vm2213_vm8, %v2719_v10, %v2210_v28  ;;  %2728 = vpow2.f32 %v2301_v2  ;;  %v2325_v28 = vmul.f32 0.5, %v3683_v24 }
 0x36a   : > { %v2261_v26 = vmul.f32 %v2257_v32, %v2234_v17  ;;  %v2219_v59 = vsel %vm2216_vm10, %v2218_v31, %v2214_v14  ;;  %v2244_v5 = vsel %vm2243_vm11, %v2721_v58, %v2240_v35  ;;  %v2723_v58 = vpop.eup %2722 }
 0x36b   : > { %v2263_v27 = vadd.f32 1.4214138, %v2259_v61  ;;  %v2249_v62 = vsel %vm2246_vm12, %v2248_v6, %v2244_v5  ;;  %v2252_v55 = vmul.f32 1.0614054, %v2219_v59  ;;  %v2725_v15 = vpop.eup %2724  ;;  %v2323_v61 = vmul.f32 0.5, %v3681_v22 }
 0x36c   : > { %v2265_v47 = vadd.f32 1.4214138, %v2261_v26  ;;  %v2254_v4 = vmul.f32 1.0614054, %v2249_v62  ;;  %v2324_v5 = vmul.f32 0.5, %v3695_v44 }
 0x36d   : > { %v2267_v42 = vmul.f32 %v2263_v27, %v2204_v11  ;;  %v2256_v25 = vadd.f32 -1.4531521, %v2252_v55  ;;  %v2727_v26 = vpop.eup %2726 }
 0x36e   : > { %v2269_v57 = vmul.f32 %v2265_v47, %v2234_v17  ;;  %v2258_v13 = vadd.f32 -1.4531521, %v2254_v4 }
 0x36f   : > { %v2271_v46 = vadd.f32 -0.28449672, %v2267_v42  ;;  %v2260_v29 = vmul.f32 %v2256_v25, %v2219_v59  ;;  %v2729_v23 = vpop.eup %2728 }
 0x370   : > { %v2273_v12 = vadd.f32 -0.28449672, %v2269_v57  ;;  %v2262_v9 = vmul.f32 %v2258_v13, %v2249_v62 }
 0x371   : > { %v2275_v40 = vmul.f32 %v2271_v46, %v2204_v11  ;;  %v2264_v49 = vadd.f32 1.4214138, %v2260_v29 }
 0x372   : > { %v2277_v50 = vmul.f32 %v2273_v12, %v2234_v17  ;;  %v2266_v63 = vadd.f32 1.4214138, %v2262_v9 }
 0x373   : > { %v2279_v51 = vadd.f32 0.2548296, %v2275_v40  ;;  %v2268_v43 = vmul.f32 %v2264_v49, %v2219_v59 }
 0x374   : > { %v2281_v7 = vadd.f32 0.2548296, %v2277_v50  ;;  %v2270_v34 = vmul.f32 %v2266_v63, %v2249_v62 }
 0x375   : > { %v2283_v10 = vmul.f32 %v2279_v51, %v2204_v11  ;;  %v2272_v30 = vadd.f32 -0.28449672, %v2268_v43 }
 0x376   : > { %v2285_v1 = vmul.f32 %v2281_v7, %v2234_v17  ;;  %v2274_v37 = vadd.f32 -0.28449672, %v2270_v34 }
 0x377   : > { %v2303_v8 = vmul.f32 %v2723_v58, %v2283_v10  ;;  %v2276_v19 = vmul.f32 %v2272_v30, %v2219_v59 }
 0x378   : > { %v2305_v53 = vmul.f32 %v2725_v15, %v2285_v1  ;;  %v2278_v52 = vmul.f32 %v2274_v37, %v2249_v62 }
 0x379   : > { %v2307_v18 = vsub.f32 1.0, %v2303_v8  ;;  %v2280_v21 = vadd.f32 0.2548296, %v2276_v19 }
 0x37a   : > { %v2309_v20 = vsub.f32 1.0, %v2305_v53  ;;  %v2282_v60 = vadd.f32 0.2548296, %v2278_v52 }
 0x37b   : > { %v2315_v11 = vsub.f32 0.0, %v2307_v18  ;;  %v2284_v36 = vmul.f32 %v2280_v21, %v2219_v59 }
 0x37c   : > { %v2317_v17 = vsub.f32 0.0, %v2309_v20  ;;  %v2286_v27 = vmul.f32 %v2282_v60, %v2249_v62  ;;  %v2326_v62 = vmul.f32 0.5, %v3697_v33 }
 0x37d   : > { %v2319_v32 = vsel %vm2311_vm13, %v2315_v11, %v2307_v18  ;;  %v2304_v35 = vmul.f32 %v2727_v26, %v2284_v36 }
 0x37e   : > { %v2321_v56 = vsel %vm2313_vm14, %v2317_v17, %v2309_v20  ;;  %v2327_v16 = vadd.f32 1.0, %v2319_v32  ;;  %v2306_v14 = vmul.f32 %v2729_v23, %v2286_v27 }
 0x37f   : > { %v2329_v38 = vadd.f32 1.0, %v2321_v56  ;;  %v2308_v6 = vsub.f32 1.0, %v2304_v35 }
 0x380   : > { %v2331_v31 = vmul.f32 %v2327_v16, %v2323_v61  ;;  %v2310_v54 = vsub.f32 1.0, %v2306_v14 }
 0x381   : > { %v2333_v47 = vmul.f32 %v2329_v38, %v2325_v28  ;;  %v2316_v22 = vsub.f32 0.0, %v2308_v6 }
 0x382   : > { %2335 = vst [vmem:[%s321_s20] sm:$0xff] %v2331_v31  ;;  %v2318_v24 = vsub.f32 0.0, %v2310_v54 }
 0x383   : > { %2337 = vst [vmem:[%s321_s20 + $0x10] sm:$0xff] %v2333_v47  ;;  %v2320_v42 = vsel %vm2312_vm15, %v2316_v22, %v2308_v6 }
 0x384   : > { %v2322_v59 = vsel %vm2314_vm0, %v2318_v24, %v2310_v54  ;;  %v2328_v57 = vadd.f32 1.0, %v2320_v42 }
 0x385   : > { %v2330_v55 = vadd.f32 1.0, %v2322_v59 }
 0x386   : > { %v2332_v3 = vmul.f32 %v2328_v57, %v2324_v5 }
 0x387   : > { %v2334_v46 = vmul.f32 %v2330_v55, %v2326_v62 }
 0x388   : > { %2336 = vst [vmem:[%s321_s20 + $0x8] sm:$0xff] %v2332_v3 }
 0x389   : > { %2338 = vst [vmem:[%s321_s20 + $0x18] sm:$0xff] %v2334_v46 }
 0x38a   : > { %2907 = shalt.err (!%p2904_p8)
}
 0x38b   : > { %s2967_s13 = smov 256   ;;  %s2968_s15 = smov 16  }
 0x38c   : > { %2510 = dma.vmem_to_hbm [thread:$0]  (%p3042_p5), %s2353_s25, 512, %s2355_s17, %s2340_s29, %s2967_s13, %s2967_s13, %s2968_s15  }
 0x38d PF: > { %p2542_p9 = scmp.ge.s32.totalorder %s2954_s24, 2  ;;  %s2369_s16 = sand.u32 1, %s2942_s21  }
 0x38e   : > { %s2370_s19 = scalar_lea.sflag [#allocation4], %s2369_s16 }
 0x38f   : > { %p2529_p10 = pnand %p2542_p9, %p3046_p6 }
 0x391   : > { %p2530_p11 = pneg %p2529_p10 }
 0x393   : > { %2937 = dma.done.wait (%p2530_p11), %s2370_s19, 512  }
 0x394   : > { %2939 = vsyncadd (%p2530_p11), %s2370_s19, 4294966784  ;;  %p19_p12 = scmp.ge.s32.totalorder %s3029_s27, 4   ;;  %s3862_s21 = smov %s2946_s22 }
 0x395   : > { %s3863_s22 = smov %s2950_s23  ;;  %s3864_s23 = smov %s3040_s30 }
 0x396   : > { %s3865_s24 = smov %s3029_s27  ;;  %21 = sbr.rel (!%p19_p12) target bundleno = 9 (0x9), region = 115 }
 0x39b   :  { %2376 = vsyncpa [#allocation3], 1 }
 0x39c   :  { %2378 = vsyncpa [#allocation3 + $0x1], 1 }
 0x39d   :  { %2379 = vsyncpa [#allocation6], 1 }
 0x39e   :  { %2380 = vsyncpa [#allocation9], 1 }
 0x39f   :  { %2381 = vsyncpa [#allocation4], 1 }
 0x3a0   :  { %2383 = vsyncpa [#allocation4 + $0x1], 1 }

</bundles_post_ra>
